<compile_context>
chip_gen: v7x
topology: tpu7x:2x2x1
jax: 0.10.0
libtpu: 0.0.40
codegen_flags: <defaults>
</compile_context>

<pallas_src>
import functools

import jax
import jax.numpy as jnp
from jax.experimental import pallas as pl
from jax.experimental.pallas import tpu as pltpu

LANE = 128
VMEM_LIMIT_BYTES = 48 * 1024 * 1024  # fits v7x's 64 MiB physical VMEM with headroom


def _round_up(x, m):
    return ((x + m - 1) // m) * m


def _cparams(semantics):
    return pltpu.CompilerParams(dimension_semantics=semantics,
                                vmem_limit_bytes=VMEM_LIMIT_BYTES)


def _pick_tile_m(M):
    # Largest M tile <= 256 dividing M (keeps grid > 1 at the toy shapes so the
    # pipeline actually tiles).  For real Mask R-CNN feature maps this should be
    # raised toward the per-generation VMEM budget (e.g. 1024-2048 rows on
    # v5e/v6e, roughly half that on v7x's 64 MiB VMEM).
    for tm in (256, 128, 64, 32, 16, 8):
        if M % tm == 0:
            return tm
    return M


# ----------------------------- Pallas kernels ------------------------------------


def _mm_stats_kernel(x_ref, w_ref, y_ref, sum_ref, sq_ref):
    """y = x @ w (per M tile); accumulate per-channel sum / sumsq across the grid."""
    y = jnp.dot(x_ref[...], w_ref[...], preferred_element_type=jnp.float32)
    y_ref[...] = y

    @pl.when(pl.program_id(0) == 0)
    def _init():
        sum_ref[...] = jnp.zeros_like(sum_ref)
        sq_ref[...] = jnp.zeros_like(sq_ref)

    sum_ref[...] += jnp.sum(y, axis=0, keepdims=True)
    sq_ref[...] += jnp.sum(y * y, axis=0, keepdims=True)


def _bn_relu_mm_stats_kernel(y_ref, scale_ref, shift_ref, w_ref,
                             o_ref, sum_ref, sq_ref):
    """a = relu(y*scale + shift); o = a @ w; accumulate next-stage BN stats."""
    a = jnp.maximum(y_ref[...] * scale_ref[...] + shift_ref[...], 0.0)
    y = jnp.dot(a, w_ref[...], preferred_element_type=jnp.float32)
    o_ref[...] = y

    @pl.when(pl.program_id(0) == 0)
    def _init():
        sum_ref[...] = jnp.zeros_like(sum_ref)
        sq_ref[...] = jnp.zeros_like(sq_ref)

    sum_ref[...] += jnp.sum(y, axis=0, keepdims=True)
    sq_ref[...] += jnp.sum(y * y, axis=0, keepdims=True)


def _conv3x3_mm_stats_kernel(xpad_ref, w_ref, y_ref, sum_ref, sq_ref, *, H, W):
    """3x3 SAME conv for one image as 9 shifted-window matmuls, f32 accumulate.

    xpad_ref: (1, H+2, W+2, C) spatially padded NHWC activation.
    w_ref:    (9, C, Co) weight, index kh*3+kw.
    y_ref:    (1, H*W, Co) pre-BN conv output.
    """
    C = xpad_ref.shape[-1]
    Co = w_ref.shape[-1]
    acc = jnp.zeros((H * W, Co), jnp.float32)
    for kh in range(3):
        for kw in range(3):
            win = xpad_ref[0, kh:kh + H, kw:kw + W, :]           # (H, W, C)
            acc = acc + jnp.dot(win.reshape(H * W, C),
                                w_ref[kh * 3 + kw, :, :],
                                preferred_element_type=jnp.float32)
    y_ref[0, :, :] = acc

    @pl.when(pl.program_id(0) == 0)
    def _init():
        sum_ref[...] = jnp.zeros_like(sum_ref)
        sq_ref[...] = jnp.zeros_like(sq_ref)

    sum_ref[...] += jnp.sum(acc, axis=0, keepdims=True)
    sq_ref[...] += jnp.sum(acc * acc, axis=0, keepdims=True)


def _bn_relu_kernel(y_ref, scale_ref, shift_ref, o_ref):
    o_ref[...] = jnp.maximum(y_ref[...] * scale_ref[...] + shift_ref[...], 0.0)


def _bn_add_relu_kernel(y_ref, scale_ref, shift_ref, res_ref, o_ref):
    o_ref[...] = jnp.maximum(
        y_ref[...] * scale_ref[...] + shift_ref[...] + res_ref[...], 0.0)


# ----------------------------- pallas_call wrappers --------------------------------


def conv1x1_stats(x2d, w, tm):
    M, K = x2d.shape
    C = w.shape[1]
    return pl.pallas_call(
        _mm_stats_kernel,
        grid=(M // tm,),
        in_specs=[pl.BlockSpec((tm, K), lambda i: (i, 0)),
                  pl.BlockSpec((K, C), lambda i: (0, 0))],
        out_specs=[pl.BlockSpec((tm, C), lambda i: (i, 0)),
                   pl.BlockSpec((1, C), lambda i: (0, 0)),
                   pl.BlockSpec((1, C), lambda i: (0, 0))],
        out_shape=[jax.ShapeDtypeStruct((M, C), jnp.float32),
                   jax.ShapeDtypeStruct((1, C), jnp.float32),
                   jax.ShapeDtypeStruct((1, C), jnp.float32)],
        compiler_params=_cparams(("arbitrary",)),   # stats accumulator across M tiles
    )(x2d, w)


def bn_relu_conv1x1_stats(y2d, scale, shift, w, tm):
    M, K = y2d.shape
    C = w.shape[1]
    return pl.pallas_call(
        _bn_relu_mm_stats_kernel,
        grid=(M // tm,),
        in_specs=[pl.BlockSpec((tm, K), lambda i: (i, 0)),
                  pl.BlockSpec((1, K), lambda i: (0, 0)),
                  pl.BlockSpec((1, K), lambda i: (0, 0)),
                  pl.BlockSpec((K, C), lambda i: (0, 0))],
        out_specs=[pl.BlockSpec((tm, C), lambda i: (i, 0)),
                   pl.BlockSpec((1, C), lambda i: (0, 0)),
                   pl.BlockSpec((1, C), lambda i: (0, 0))],
        out_shape=[jax.ShapeDtypeStruct((M, C), jnp.float32),
                   jax.ShapeDtypeStruct((1, C), jnp.float32),
                   jax.ShapeDtypeStruct((1, C), jnp.float32)],
        compiler_params=_cparams(("arbitrary",)),
    )(y2d, scale, shift, w)


def conv3x3_stats(a_pad, w2):
    # a_pad: (N, H+2, W+2, C) padded NHWC activation; w2: (9, C, Co).
    # Grid over images; each step does the whole image's 3x3 conv in VMEM.
    # TODO(synk): for very large H*W, tile rows with a halo DMA instead of whole images.
    N, Hp2, Wp2, C = a_pad.shape
    H, W = Hp2 - 2, Wp2 - 2
    Co = w2.shape[-1]
    kernel = functools.partial(_conv3x3_mm_stats_kernel, H=H, W=W)
    y, s, q = pl.pallas_call(
        kernel,
        grid=(N,),
        in_specs=[pl.BlockSpec((1, Hp2, Wp2, C), lambda n: (n, 0, 0, 0)),
                  pl.BlockSpec((9, C, Co), lambda n: (0, 0, 0))],
        out_specs=[pl.BlockSpec((1, H * W, Co), lambda n: (n, 0, 0)),
                   pl.BlockSpec((1, Co), lambda n: (0, 0)),
                   pl.BlockSpec((1, Co), lambda n: (0, 0))],
        out_shape=[jax.ShapeDtypeStruct((N, H * W, Co), jnp.float32),
                   jax.ShapeDtypeStruct((1, Co), jnp.float32),
                   jax.ShapeDtypeStruct((1, Co), jnp.float32)],
        compiler_params=_cparams(("arbitrary",)),
    )(a_pad, w2)
    return y.reshape(N * H * W, Co), s, q


def bn_relu(y2d, scale, shift, tm):
    M, C = y2d.shape
    return pl.pallas_call(
        _bn_relu_kernel,
        grid=(M // tm,),
        in_specs=[pl.BlockSpec((tm, C), lambda i: (i, 0)),
                  pl.BlockSpec((1, C), lambda i: (0, 0)),
                  pl.BlockSpec((1, C), lambda i: (0, 0))],
        out_specs=pl.BlockSpec((tm, C), lambda i: (i, 0)),
        out_shape=jax.ShapeDtypeStruct((M, C), jnp.float32),
        compiler_params=_cparams(("parallel",)),
    )(y2d, scale, shift)


def bn_add_relu(y2d, scale, shift, res, tm):
    M, C = y2d.shape
    return pl.pallas_call(
        _bn_add_relu_kernel,
        grid=(M // tm,),
        in_specs=[pl.BlockSpec((tm, C), lambda i: (i, 0)),
                  pl.BlockSpec((1, C), lambda i: (0, 0)),
                  pl.BlockSpec((1, C), lambda i: (0, 0)),
                  pl.BlockSpec((tm, C), lambda i: (i, 0))],
        out_specs=pl.BlockSpec((tm, C), lambda i: (i, 0)),
        out_shape=jax.ShapeDtypeStruct((M, C), jnp.float32),
        compiler_params=_cparams(("parallel",)),
    )(y2d, scale, shift, res)


# ----------------------------- BN stats -> affine ----------------------------------


def _bn_scale_shift(s, q, gamma, beta, count, eps):
    # Tiny (1, C) math on the globally reduced sums (training-mode BN, biased var).
    mean = s / count
    var = q / count - mean * mean
    scale = gamma * jax.lax.rsqrt(var + eps)
    shift = beta - mean * scale
    return scale, shift


# ----------------------------- Bottleneck forward -----------------------------------


def bottleneck_forward(x_nchw, prepped, *, cout, eps=1e-3):
    N, Cin, H, W = x_nchw.shape
    Cin_p, Cp = prepped["w1"].shape
    C3p = prepped["w3"].shape[1]
    assert Cin == cout, "downsample=None requires inplanes == 4*planes"
    assert Cin_p == C3p
    assert W % 8 == 0, "W must be a multiple of 8 (sublane) for the fused 3x3 conv"
    M = N * H * W
    tm = _pick_tile_m(M)

    # NCHW -> NHWC -> lane-padded (M, Cin_p) rows (glue, done once).
    x_nhwc = jnp.transpose(x_nchw, (0, 2, 3, 1)).astype(jnp.float32)
    x_nhwc = jnp.pad(x_nhwc, ((0, 0), (0, 0), (0, 0), (0, Cin_p - Cin)))
    x2d = x_nhwc.reshape(M, Cin_p)

    # --- stage 1: conv1 (1x1) + global BN1 stats, then normalize + ReLU ---------
    y1, s1, q1 = conv1x1_stats(x2d, prepped["w1"], tm)
    sc1, sh1 = _bn_scale_shift(s1, q1, prepped["g1"], prepped["be1"], M, eps)
    a1 = bn_relu(y1, sc1, sh1, tm)

    # --- stage 2: SamePad2d(3,1) + conv2 (3x3) fused in-kernel + BN2 stats ------
    a1_pad = jnp.pad(a1.reshape(N, H, W, Cp), ((0, 0), (1, 1), (1, 1), (0, 0)))
    y2, s2, q2 = conv3x3_stats(a1_pad, prepped["w2"])
    sc2, sh2 = _bn_scale_shift(s2, q2, prepped["g2"], prepped["be2"], M, eps)

    # --- stage 3: (bn2 + relu fused) conv3 (1x1) + BN3 stats --------------------
    y3, s3, q3 = bn_relu_conv1x1_stats(y2, sc2, sh2, prepped["w3"], tm)
    sc3, sh3 = _bn_scale_shift(s3, q3, prepped["g3"], prepped["be3"], M, eps)

    # --- bn3 + residual add + final ReLU ----------------------------------------
    out2d = bn_add_relu(y3, sc3, sh3, x2d, tm)

    out = out2d.reshape(N, H, W, C3p)[..., :cout]
    return jnp.transpose(out, (0, 3, 1, 2))          # back to NCHW


# ----------------------------- parameter preparation --------------------------------


def prepare_params(raw):
    """One-time weight prep: reshape/transpose to (K, C) matmul layout and pad
    every channel dim to a multiple of 128 lanes (zeros -> padded channels are
    exactly 0 through the whole block and are sliced off at the end)."""
    planes, inplanes = raw["w1"].shape[0], raw["w1"].shape[1]
    cout = 4 * planes
    cin_p = _round_up(inplanes, LANE)
    cp = _round_up(planes, LANE)
    c3p = _round_up(cout, LANE)

    w1 = raw["w1"].reshape(planes, inplanes).T                       # (Cin, planes)
    w1 = jnp.pad(w1, ((0, cin_p - inplanes), (0, cp - planes)))

    w2 = jnp.transpose(raw["w2"], (2, 3, 1, 0)).reshape(9, planes, planes)
    w2 = jnp.pad(w2, ((0, 0), (0, cp - planes), (0, cp - planes)))   # (9, Cp, Cp)

    w3 = raw["w3"].reshape(cout, planes).T                           # (planes, 4*planes)
    w3 = jnp.pad(w3, ((0, cp - planes), (0, c3p - cout)))

    def vec(v, c):
        return jnp.pad(v, (0, c - v.shape[0])).reshape(1, c)

    # NOTE: conv biases b1/b2/b3 are intentionally not used: training-mode BN
    # subtracts the batch mean, which cancels a per-channel bias exactly.
    return {
        "w1": w1, "w2": w2, "w3": w3,
        "g1": vec(raw["g1"], cp), "be1": vec(raw["be1"], cp),
        "g2": vec(raw["g2"], cp), "be2": vec(raw["be2"], cp),
        "g3": vec(raw["g3"], c3p), "be3": vec(raw["be3"], c3p),
    }


def make_params(key, inplanes, planes):
    ks = jax.random.split(key, 6)
    return {
        "w1": 0.1 * jax.random.normal(ks[0], (planes, inplanes, 1, 1), jnp.float32),
        "b1": 0.05 * jax.random.normal(ks[1], (planes,), jnp.float32),   # cancelled by BN
        "w2": 0.1 * jax.random.normal(ks[2], (planes, planes, 3, 3), jnp.float32),
        "b2": 0.05 * jax.random.normal(ks[3], (planes,), jnp.float32),   # cancelled by BN
        "w3": 0.1 * jax.random.normal(ks[4], (4 * planes, planes, 1, 1), jnp.float32),
        "b3": 0.05 * jax.random.normal(ks[5], (4 * planes,), jnp.float32),  # cancelled
        "g1": jnp.full((planes,), 1.1, jnp.float32),
        "be1": jnp.full((planes,), 0.02, jnp.float32),
        "g2": jnp.full((planes,), 0.9, jnp.float32),
        "be2": jnp.full((planes,), -0.01, jnp.float32),
        "g3": jnp.full((4 * planes,), 1.05, jnp.float32),
        "be3": jnp.full((4 * planes,), 0.03, jnp.float32),
    }


if __name__ == "__main__":
    key = jax.random.PRNGKey(0)
    k_x, k_p = jax.random.split(key)

    # Residual add with downsample=None requires inplanes == 4*planes, stride=1.
    N, planes, H, W = 2, 8, 16, 16
    inplanes = 4 * planes  # 32

    x = jax.random.normal(k_x, (N, inplanes, H, W), jnp.float32)
    raw = make_params(k_p, inplanes, planes)
    prepped = prepare_params(raw)

    fwd = jax.jit(functools.partial(bottleneck_forward, cout=4 * planes, eps=1e-3))
    out = jax.block_until_ready(fwd(x, prepped))
    assert out.shape == (N, 4 * planes, H, W)
    print("KERNEL_OK")
</pallas_src>

<mosaic_0001>
module attributes {stable_mosaic.version = 11 : i64} {
  func.func @_bn_relu_kernel(%arg0: i32, %arg1: memref<256x128xf32, #tpu.memory_space<vmem>>, %arg2: memref<1x128xf32, #tpu.memory_space<vmem>>, %arg3: memref<1x128xf32, #tpu.memory_space<vmem>>, %arg4: memref<256x128xf32, #tpu.memory_space<vmem>>) attributes {dimension_semantics = [#tpu.dimension_semantics<parallel>], iteration_bounds = array<i64: 2>, scalar_prefetch = 0 : i64, scratch_operands = 0 : i64, tpu.core_type = #tpu.core_type<tc>, window_params = [{transform_indices = @transform_0, window_bounds = array<i64: 256, 128>}, {pipeline_mode = #tpu.pipeline_mode<synchronous>, transform_indices = @transform_1, window_bounds = array<i64: 1, 128>}, {pipeline_mode = #tpu.pipeline_mode<synchronous>, transform_indices = @transform_2, window_bounds = array<i64: 1, 128>}, {transform_indices = @transform_3, window_bounds = array<i64: 256, 128>}]} {
    %c0 = arith.constant 0 : index
    %c0_0 = arith.constant 0 : index
    %0 = vector.load %arg1[%c0, %c0_0] : memref<256x128xf32, #tpu.memory_space<vmem>>, vector<256x128xf32>
    %c0_1 = arith.constant 0 : index
    %c0_2 = arith.constant 0 : index
    %1 = vector.load %arg2[%c0_1, %c0_2] : memref<1x128xf32, #tpu.memory_space<vmem>>, vector<1x128xf32>
    %2 = vector.broadcast %1 : vector<1x128xf32> to vector<256x128xf32>
    %3 = arith.mulf %0, %2 : vector<256x128xf32>
    %c0_3 = arith.constant 0 : index
    %c0_4 = arith.constant 0 : index
    %4 = vector.load %arg3[%c0_3, %c0_4] : memref<1x128xf32, #tpu.memory_space<vmem>>, vector<1x128xf32>
    %5 = vector.broadcast %4 : vector<1x128xf32> to vector<256x128xf32>
    %6 = arith.addf %3, %5 : vector<256x128xf32>
    %cst = arith.constant 0.000000e+00 : f32
    %7 = vector.broadcast %cst : f32 to vector<256x128xf32>
    %8 = arith.maximumf %6, %7 : vector<256x128xf32>
    %c0_5 = arith.constant 0 : index
    %c0_6 = arith.constant 0 : index
    %9 = vector.load %arg4[%c0_5, %c0_6] : memref<256x128xf32, #tpu.memory_space<vmem>>, vector<256x128xf32>
    tpu.vector_store %arg4[%c0_5, %c0_6], %8 {strides = array<i32>} : memref<256x128xf32, #tpu.memory_space<vmem>>, vector<256x128xf32>,
    return
  }
  func.func @transform_0(%arg0: i32) -> (i32, i32) {
    %c0_i32 = arith.constant 0 : i32
    %c0_i32_0 = arith.constant 0 : i32
    return %arg0, %c0_i32 : i32, i32
  }
  func.func @transform_1(%arg0: i32) -> (i32, i32) {
    %c0_i32 = arith.constant 0 : i32
    %c0_i32_0 = arith.constant 0 : i32
    %c0_i32_1 = arith.constant 0 : i32
    return %c0_i32, %c0_i32_0 : i32, i32
  }
  func.func @transform_2(%arg0: i32) -> (i32, i32) {
    %c0_i32 = arith.constant 0 : i32
    %c0_i32_0 = arith.constant 0 : i32
    %c0_i32_1 = arith.constant 0 : i32
    return %c0_i32, %c0_i32_0 : i32, i32
  }
  func.func @transform_3(%arg0: i32) -> (i32, i32) {
    %c0_i32 = arith.constant 0 : i32
    %c0_i32_0 = arith.constant 0 : i32
    return %arg0, %c0_i32 : i32, i32
  }
}

module attributes {stable_mosaic.version = 11 : i64} {
  func.func @_mm_stats_kernel(%arg0: i32, %arg1: memref<256x128xf32, #tpu.memory_space<vmem>>, %arg2: memref<128x128xf32, #tpu.memory_space<vmem>>, %arg3: memref<256x128xf32, #tpu.memory_space<vmem>>, %arg4: memref<1x128xf32, #tpu.memory_space<vmem>>, %arg5: memref<1x128xf32, #tpu.memory_space<vmem>>) attributes {dimension_semantics = [#tpu.dimension_semantics<arbitrary>], iteration_bounds = array<i64: 2>, scalar_prefetch = 0 : i64, scratch_operands = 0 : i64, tpu.core_type = #tpu.core_type<tc>, window_params = [{transform_indices = @transform_0, window_bounds = array<i64: 256, 128>}, {pipeline_mode = #tpu.pipeline_mode<synchronous>, transform_indices = @transform_1, window_bounds = array<i64: 128, 128>}, {transform_indices = @transform_2, window_bounds = array<i64: 256, 128>}, {pipeline_mode = #tpu.pipeline_mode<synchronous>, transform_indices = @transform_3, window_bounds = array<i64: 1, 128>}, {pipeline_mode = #tpu.pipeline_mode<synchronous>, transform_indices = @transform_4, window_bounds = array<i64: 1, 128>}]} {
    %c0 = arith.constant 0 : index
    %c0_0 = arith.constant 0 : index
    %0 = vector.load %arg1[%c0, %c0_0] : memref<256x128xf32, #tpu.memory_space<vmem>>, vector<256x128xf32>
    %c0_1 = arith.constant 0 : index
    %c0_2 = arith.constant 0 : index
    %1 = vector.load %arg2[%c0_1, %c0_2] : memref<128x128xf32, #tpu.memory_space<vmem>>, vector<128x128xf32>
    %cst = arith.constant dense<0.000000e+00> : vector<256x128xf32>
    %2 = tpu.matmul %0, %1, %cst {dimension_numbers = #tpu.dot_dimension_numbers<[1], [0], [0], [1], [0, 0, 1, 1], [], []>} : vector<256x128xf32>, vector<128x128xf32>, vector<256x128xf32> -> vector<256x128xf32>
    %c0_3 = arith.constant 0 : index
    %c0_4 = arith.constant 0 : index
    %3 = vector.load %arg3[%c0_3, %c0_4] : memref<256x128xf32, #tpu.memory_space<vmem>>, vector<256x128xf32>
    tpu.vector_store %arg3[%c0_3, %c0_4], %2 {strides = array<i32>} : memref<256x128xf32, #tpu.memory_space<vmem>>, vector<256x128xf32>,
    %c0_i32 = arith.constant 0 : i32
    %4 = arith.cmpi eq, %arg0, %c0_i32 : i32
    %5 = arith.extui %4 : i1 to i32
    %c0_i32_5 = arith.constant 0 : i32
    %6 = arith.cmpi ne, %5, %c0_i32_5 : i32
    scf.if %6 {
      %cst_16 = arith.constant 0.000000e+00 : f32
      %18 = vector.broadcast %cst_16 : f32 to vector<1x128xf32>
      %c0_17 = arith.constant 0 : index
      %c0_18 = arith.constant 0 : index
      %19 = vector.load %arg4[%c0_17, %c0_18] : memref<1x128xf32, #tpu.memory_space<vmem>>, vector<1x128xf32>
      tpu.vector_store %arg4[%c0_17, %c0_18], %18 {strides = array<i32>} : memref<1x128xf32, #tpu.memory_space<vmem>>, vector<1x128xf32>,
      %cst_19 = arith.constant 0.000000e+00 : f32
      %20 = vector.broadcast %cst_19 : f32 to vector<1x128xf32>
      %c0_20 = arith.constant 0 : index
      %c0_21 = arith.constant 0 : index
      %21 = vector.load %arg5[%c0_20, %c0_21] : memref<1x128xf32, #tpu.memory_space<vmem>>, vector<1x128xf32>
      tpu.vector_store %arg5[%c0_20, %c0_21], %20 {strides = array<i32>} : memref<1x128xf32, #tpu.memory_space<vmem>>, vector<1x128xf32>,
    } else {
    }
    %c0_6 = arith.constant 0 : index
    %c0_7 = arith.constant 0 : index
    %7 = vector.load %arg4[%c0_6, %c0_7] : memref<1x128xf32, #tpu.memory_space<vmem>>, vector<1x128xf32>
    %cst_8 = arith.constant dense<0.000000e+00> : vector<128xf32>
    %8 = vector.multi_reduction <add>, %2, %cst_8 [0] : vector<256x128xf32> to vector<128xf32>
    %9 = vector.shape_cast %8 : vector<128xf32> to vector<1x128xf32>
    %10 = arith.addf %7, %9 : vector<1x128xf32>
    %c0_9 = arith.constant 0 : index
    %c0_10 = arith.constant 0 : index
    %11 = vector.load %arg4[%c0_9, %c0_10] : memref<1x128xf32, #tpu.memory_space<vmem>>, vector<1x128xf32>
    tpu.vector_store %arg4[%c0_9, %c0_10], %10 {strides = array<i32>} : memref<1x128xf32, #tpu.memory_space<vmem>>, vector<1x128xf32>,
    %c0_11 = arith.constant 0 : index
    %c0_12 = arith.constant 0 : index
    %12 = vector.load %arg5[%c0_11, %c0_12] : memref<1x128xf32, #tpu.memory_space<vmem>>, vector<1x128xf32>
    %13 = arith.mulf %2, %2 : vector<256x128xf32>
    %cst_13 = arith.constant dense<0.000000e+00> : vector<128xf32>
    %14 = vector.multi_reduction <add>, %13, %cst_13 [0] : vector<256x128xf32> to vector<128xf32>
    %15 = vector.shape_cast %14 : vector<128xf32> to vector<1x128xf32>
    %16 = arith.addf %12, %15 : vector<1x128xf32>
    %c0_14 = arith.constant 0 : index
    %c0_15 = arith.constant 0 : index
    %17 = vector.load %arg5[%c0_14, %c0_15] : memref<1x128xf32, #tpu.memory_space<vmem>>, vector<1x128xf32>
    tpu.vector_store %arg5[%c0_14, %c0_15], %16 {strides = array<i32>} : memref<1x128xf32, #tpu.memory_space<vmem>>, vector<1x128xf32>,
    return
  }
  func.func @transform_0(%arg0: i32) -> (i32, i32) {
    %c0_i32 = arith.constant 0 : i32
    %c0_i32_0 = arith.constant 0 : i32
    return %arg0, %c0_i32 : i32, i32
  }
  func.func @transform_1(%arg0: i32) -> (i32, i32) {
    %c0_i32 = arith.constant 0 : i32
    %c0_i32_0 = arith.constant 0 : i32
    %c0_i32_1 = arith.constant 0 : i32
    return %c0_i32, %c0_i32_0 : i32, i32
  }
  func.func @transform_2(%arg0: i32) -> (i32, i32) {
    %c0_i32 = arith.constant 0 : i32
    %c0_i32_0 = arith.constant 0 : i32
    return %arg0, %c0_i32 : i32, i32
  }
  func.func @transform_3(%arg0: i32) -> (i32, i32) {
    %c0_i32 = arith.constant 0 : i32
    %c0_i32_0 = arith.constant 0 : i32
    %c0_i32_1 = arith.constant 0 : i32
    return %c0_i32, %c0_i32_0 : i32, i32
  }
  func.func @transform_4(%arg0: i32) -> (i32, i32) {
    %c0_i32 = arith.constant 0 : i32
    %c0_i32_0 = arith.constant 0 : i32
    %c0_i32_1 = arith.constant 0 : i32
    return %c0_i32, %c0_i32_0 : i32, i32
  }
}

module attributes {stable_mosaic.version = 11 : i64} {
  func.func @_conv3x3_mm_stats_kernel(%arg0: i32, %arg1: memref<1x18x18x128xf32, #tpu.memory_space<vmem>>, %arg2: memref<9x128x128xf32, #tpu.memory_space<vmem>>, %arg3: memref<1x256x128xf32, #tpu.memory_space<vmem>>, %arg4: memref<1x128xf32, #tpu.memory_space<vmem>>, %arg5: memref<1x128xf32, #tpu.memory_space<vmem>>) attributes {dimension_semantics = [#tpu.dimension_semantics<arbitrary>], iteration_bounds = array<i64: 2>, scalar_prefetch = 0 : i64, scratch_operands = 0 : i64, tpu.core_type = #tpu.core_type<tc>, window_params = [{transform_indices = @transform_0, window_bounds = array<i64: 1, 18, 18, 128>}, {pipeline_mode = #tpu.pipeline_mode<synchronous>, transform_indices = @transform_1, window_bounds = array<i64: 9, 128, 128>}, {transform_indices = @transform_2, window_bounds = array<i64: 1, 256, 128>}, {pipeline_mode = #tpu.pipeline_mode<synchronous>, transform_indices = @transform_3, window_bounds = array<i64: 1, 128>}, {pipeline_mode = #tpu.pipeline_mode<synchronous>, transform_indices = @transform_4, window_bounds = array<i64: 1, 128>}]} {
    %cst = arith.constant 0.000000e+00 : f32
    %0 = vector.broadcast %cst : f32 to vector<256x128xf32>
    %c0 = arith.constant 0 : index
    %c0_0 = arith.constant 0 : index
    %c0_1 = arith.constant 0 : index
    %c0_2 = arith.constant 0 : index
    %1 = vector.load %arg1[%c0, %c0_0, %c0_1, %c0_2] : memref<1x18x18x128xf32, #tpu.memory_space<vmem>>, vector<1x16x16x128xf32>
    %2 = vector.shape_cast %1 : vector<1x16x16x128xf32> to vector<16x16x128xf32>
    %3 = vector.shape_cast %2 : vector<16x16x128xf32> to vector<256x128xf32>
    %c0_3 = arith.constant 0 : index
    %c0_4 = arith.constant 0 : index
    %c0_5 = arith.constant 0 : index
    %4 = vector.load %arg2[%c0_3, %c0_4, %c0_5] : memref<9x128x128xf32, #tpu.memory_space<vmem>>, vector<1x128x128xf32>
    %5 = vector.shape_cast %4 : vector<1x128x128xf32> to vector<128x128xf32>
    %cst_6 = arith.constant dense<0.000000e+00> : vector<256x128xf32>
    %6 = tpu.matmul %3, %5, %cst_6 {dimension_numbers = #tpu.dot_dimension_numbers<[1], [0], [0], [1], [0, 0, 1, 1], [], []>} : vector<256x128xf32>, vector<128x128xf32>, vector<256x128xf32> -> vector<256x128xf32>
    %7 = arith.addf %0, %6 : vector<256x128xf32>
    %c0_7 = arith.constant 0 : index
    %c0_8 = arith.constant 0 : index
    %c1 = arith.constant 1 : index
    %c0_9 = arith.constant 0 : index
    %8 = vector.load %arg1[%c0_7, %c0_8, %c1, %c0_9] : memref<1x18x18x128xf32, #tpu.memory_space<vmem>>, vector<1x16x16x128xf32>
    %9 = vector.shape_cast %8 : vector<1x16x16x128xf32> to vector<16x16x128xf32>
    %10 = vector.shape_cast %9 : vector<16x16x128xf32> to vector<256x128xf32>
    %c1_10 = arith.constant 1 : index
    %c0_11 = arith.constant 0 : index
    %c0_12 = arith.constant 0 : index
    %11 = vector.load %arg2[%c1_10, %c0_11, %c0_12] : memref<9x128x128xf32, #tpu.memory_space<vmem>>, vector<1x128x128xf32>
    %12 = vector.shape_cast %11 : vector<1x128x128xf32> to vector<128x128xf32>
    %cst_13 = arith.constant dense<0.000000e+00> : vector<256x128xf32>
    %13 = tpu.matmul %10, %12, %cst_13 {dimension_numbers = #tpu.dot_dimension_numbers<[1], [0], [0], [1], [0, 0, 1, 1], [], []>} : vector<256x128xf32>, vector<128x128xf32>, vector<256x128xf32> -> vector<256x128xf32>
    %14 = arith.addf %7, %13 : vector<256x128xf32>
    %c0_14 = arith.constant 0 : index
    %c0_15 = arith.constant 0 : index
    %c2 = arith.constant 2 : index
    %c0_16 = arith.constant 0 : index
    %15 = vector.load %arg1[%c0_14, %c0_15, %c2, %c0_16] : memref<1x18x18x128xf32, #tpu.memory_space<vmem>>, vector<1x16x16x128xf32>
    %16 = vector.shape_cast %15 : vector<1x16x16x128xf32> to vector<16x16x128xf32>
    %17 = vector.shape_cast %16 : vector<16x16x128xf32> to vector<256x128xf32>
    %c2_17 = arith.constant 2 : index
    %c0_18 = arith.constant 0 : index
    %c0_19 = arith.constant 0 : index
    %18 = vector.load %arg2[%c2_17, %c0_18, %c0_19] : memref<9x128x128xf32, #tpu.memory_space<vmem>>, vector<1x128x128xf32>
    %19 = vector.shape_cast %18 : vector<1x128x128xf32> to vector<128x128xf32>
    %cst_20 = arith.constant dense<0.000000e+00> : vector<256x128xf32>
    %20 = tpu.matmul %17, %19, %cst_20 {dimension_numbers = #tpu.dot_dimension_numbers<[1], [0], [0], [1], [0, 0, 1, 1], [], []>} : vector<256x128xf32>, vector<128x128xf32>, vector<256x128xf32> -> vector<256x128xf32>
    %21 = arith.addf %14, %20 : vector<256x128xf32>
    %c0_21 = arith.constant 0 : index
    %c1_22 = arith.constant 1 : index
    %c0_23 = arith.constant 0 : index
    %c0_24 = arith.constant 0 : index
    %22 = vector.load %arg1[%c0_21, %c1_22, %c0_23, %c0_24] : memref<1x18x18x128xf32, #tpu.memory_space<vmem>>, vector<1x16x16x128xf32>
    %23 = vector.shape_cast %22 : vector<1x16x16x128xf32> to vector<16x16x128xf32>
    %24 = vector.shape_cast %23 : vector<16x16x128xf32> to vector<256x128xf32>
    %c3 = arith.constant 3 : index
    %c0_25 = arith.constant 0 : index
    %c0_26 = arith.constant 0 : index
    %25 = vector.load %arg2[%c3, %c0_25, %c0_26] : memref<9x128x128xf32, #tpu.memory_space<vmem>>, vector<1x128x128xf32>
    %26 = vector.shape_cast %25 : vector<1x128x128xf32> to vector<128x128xf32>
    %cst_27 = arith.constant dense<0.000000e+00> : vector<256x128xf32>
    %27 = tpu.matmul %24, %26, %cst_27 {dimension_numbers = #tpu.dot_dimension_numbers<[1], [0], [0], [1], [0, 0, 1, 1], [], []>} : vector<256x128xf32>, vector<128x128xf32>, vector<256x128xf32> -> vector<256x128xf32>
    %28 = arith.addf %21, %27 : vector<256x128xf32>
    %c0_28 = arith.constant 0 : index
    %c1_29 = arith.constant 1 : index
    %c1_30 = arith.constant 1 : index
    %c0_31 = arith.constant 0 : index
    %29 = vector.load %arg1[%c0_28, %c1_29, %c1_30, %c0_31] : memref<1x18x18x128xf32, #tpu.memory_space<vmem>>, vector<1x16x16x128xf32>
    %30 = vector.shape_cast %29 : vector<1x16x16x128xf32> to vector<16x16x128xf32>
    %31 = vector.shape_cast %30 : vector<16x16x128xf32> to vector<256x128xf32>
    %c4 = arith.constant 4 : index
    %c0_32 = arith.constant 0 : index
    %c0_33 = arith.constant 0 : index
    %32 = vector.load %arg2[%c4, %c0_32, %c0_33] : memref<9x128x128xf32, #tpu.memory_space<vmem>>, vector<1x128x128xf32>
    %33 = vector.shape_cast %32 : vector<1x128x128xf32> to vector<128x128xf32>
    %cst_34 = arith.constant dense<0.000000e+00> : vector<256x128xf32>
    %34 = tpu.matmul %31, %33, %cst_34 {dimension_numbers = #tpu.dot_dimension_numbers<[1], [0], [0], [1], [0, 0, 1, 1], [], []>} : vector<256x128xf32>, vector<128x128xf32>, vector<256x128xf32> -> vector<256x128xf32>
    %35 = arith.addf %28, %34 : vector<256x128xf32>
    %c0_35 = arith.constant 0 : index
    %c1_36 = arith.constant 1 : index
    %c2_37 = arith.constant 2 : index
    %c0_38 = arith.constant 0 : index
    %36 = vector.load %arg1[%c0_35, %c1_36, %c2_37, %c0_38] : memref<1x18x18x128xf32, #tpu.memory_space<vmem>>, vector<1x16x16x128xf32>
    %37 = vector.shape_cast %36 : vector<1x16x16x128xf32> to vector<16x16x128xf32>
    %38 = vector.shape_cast %37 : vector<16x16x128xf32> to vector<256x128xf32>
    %c5 = arith.constant 5 : index
    %c0_39 = arith.constant 0 : index
    %c0_40 = arith.constant 0 : index
    %39 = vector.load %arg2[%c5, %c0_39, %c0_40] : memref<9x128x128xf32, #tpu.memory_space<vmem>>, vector<1x128x128xf32>
    %40 = vector.shape_cast %39 : vector<1x128x128xf32> to vector<128x128xf32>
    %cst_41 = arith.constant dense<0.000000e+00> : vector<256x128xf32>
    %41 = tpu.matmul %38, %40, %cst_41 {dimension_numbers = #tpu.dot_dimension_numbers<[1], [0], [0], [1], [0, 0, 1, 1], [], []>} : vector<256x128xf32>, vector<128x128xf32>, vector<256x128xf32> -> vector<256x128xf32>
    %42 = arith.addf %35, %41 : vector<256x128xf32>
    %c0_42 = arith.constant 0 : index
    %c2_43 = arith.constant 2 : index
    %c0_44 = arith.constant 0 : index
    %c0_45 = arith.constant 0 : index
    %43 = vector.load %arg1[%c0_42, %c2_43, %c0_44, %c0_45] : memref<1x18x18x128xf32, #tpu.memory_space<vmem>>, vector<1x16x16x128xf32>
    %44 = vector.shape_cast %43 : vector<1x16x16x128xf32> to vector<16x16x128xf32>
    %45 = vector.shape_cast %44 : vector<16x16x128xf32> to vector<256x128xf32>
    %c6 = arith.constant 6 : index
    %c0_46 = arith.constant 0 : index
    %c0_47 = arith.constant 0 : index
    %46 = vector.load %arg2[%c6, %c0_46, %c0_47] : memref<9x128x128xf32, #tpu.memory_space<vmem>>, vector<1x128x128xf32>
    %47 = vector.shape_cast %46 : vector<1x128x128xf32> to vector<128x128xf32>
    %cst_48 = arith.constant dense<0.000000e+00> : vector<256x128xf32>
    %48 = tpu.matmul %45, %47, %cst_48 {dimension_numbers = #tpu.dot_dimension_numbers<[1], [0], [0], [1], [0, 0, 1, 1], [], []>} : vector<256x128xf32>, vector<128x128xf32>, vector<256x128xf32> -> vector<256x128xf32>
    %49 = arith.addf %42, %48 : vector<256x128xf32>
    %c0_49 = arith.constant 0 : index
    %c2_50 = arith.constant 2 : index
    %c1_51 = arith.constant 1 : index
    %c0_52 = arith.constant 0 : index
    %50 = vector.load %arg1[%c0_49, %c2_50, %c1_51, %c0_52] : memref<1x18x18x128xf32, #tpu.memory_space<vmem>>, vector<1x16x16x128xf32>
    %51 = vector.shape_cast %50 : vector<1x16x16x128xf32> to vector<16x16x128xf32>
    %52 = vector.shape_cast %51 : vector<16x16x128xf32> to vector<256x128xf32>
    %c7 = arith.constant 7 : index
    %c0_53 = arith.constant 0 : index
    %c0_54 = arith.constant 0 : index
    %53 = vector.load %arg2[%c7, %c0_53, %c0_54] : memref<9x128x128xf32, #tpu.memory_space<vmem>>, vector<1x128x128xf32>
    %54 = vector.shape_cast %53 : vector<1x128x128xf32> to vector<128x128xf32>
    %cst_55 = arith.constant dense<0.000000e+00> : vector<256x128xf32>
    %55 = tpu.matmul %52, %54, %cst_55 {dimension_numbers = #tpu.dot_dimension_numbers<[1], [0], [0], [1], [0, 0, 1, 1], [], []>} : vector<256x128xf32>, vector<128x128xf32>, vector<256x128xf32> -> vector<256x128xf32>
    %56 = arith.addf %49, %55 : vector<256x128xf32>
    %c0_56 = arith.constant 0 : index
    %c2_57 = arith.constant 2 : index
    %c2_58 = arith.constant 2 : index
    %c0_59 = arith.constant 0 : index
    %57 = vector.load %arg1[%c0_56, %c2_57, %c2_58, %c0_59] : memref<1x18x18x128xf32, #tpu.memory_space<vmem>>, vector<1x16x16x128xf32>
    %58 = vector.shape_cast %57 : vector<1x16x16x128xf32> to vector<16x16x128xf32>
    %59 = vector.shape_cast %58 : vector<16x16x128xf32> to vector<256x128xf32>
    %c8 = arith.constant 8 : index
    %c0_60 = arith.constant 0 : index
    %c0_61 = arith.constant 0 : index
    %60 = vector.load %arg2[%c8, %c0_60, %c0_61] : memref<9x128x128xf32, #tpu.memory_space<vmem>>, vector<1x128x128xf32>
    %61 = vector.shape_cast %60 : vector<1x128x128xf32> to vector<128x128xf32>
    %cst_62 = arith.constant dense<0.000000e+00> : vector<256x128xf32>
    %62 = tpu.matmul %59, %61, %cst_62 {dimension_numbers = #tpu.dot_dimension_numbers<[1], [0], [0], [1], [0, 0, 1, 1], [], []>} : vector<256x128xf32>, vector<128x128xf32>, vector<256x128xf32> -> vector<256x128xf32>
    %63 = arith.addf %56, %62 : vector<256x128xf32>
    %c0_63 = arith.constant 0 : index
    %c0_64 = arith.constant 0 : index
    %c0_65 = arith.constant 0 : index
    %64 = vector.load %arg3[%c0_63, %c0_64, %c0_65] : memref<1x256x128xf32, #tpu.memory_space<vmem>>, vector<1x256x128xf32>
    %65 = vector.shape_cast %64 : vector<1x256x128xf32> to vector<256x128xf32>
    %66 = vector.shape_cast %63 : vector<256x128xf32> to vector<1x256x128xf32>
    tpu.vector_store %arg3[%c0_63, %c0_64, %c0_65], %66 {strides = array<i32>} : memref<1x256x128xf32, #tpu.memory_space<vmem>>, vector<1x256x128xf32>,
    %c0_i32 = arith.constant 0 : i32
    %67 = arith.cmpi eq, %arg0, %c0_i32 : i32
    %68 = arith.extui %67 : i1 to i32
    %c0_i32_66 = arith.constant 0 : i32
    %69 = arith.cmpi ne, %68, %c0_i32_66 : i32
    scf.if %69 {
      %cst_77 = arith.constant 0.000000e+00 : f32
      %81 = vector.broadcast %cst_77 : f32 to vector<1x128xf32>
      %c0_78 = arith.constant 0 : index
      %c0_79 = arith.constant 0 : index
      %82 = vector.load %arg4[%c0_78, %c0_79] : memref<1x128xf32, #tpu.memory_space<vmem>>, vector<1x128xf32>
      tpu.vector_store %arg4[%c0_78, %c0_79], %81 {strides = array<i32>} : memref<1x128xf32, #tpu.memory_space<vmem>>, vector<1x128xf32>,
      %cst_80 = arith.constant 0.000000e+00 : f32
      %83 = vector.broadcast %cst_80 : f32 to vector<1x128xf32>
      %c0_81 = arith.constant 0 : index
      %c0_82 = arith.constant 0 : index
      %84 = vector.load %arg5[%c0_81, %c0_82] : memref<1x128xf32, #tpu.memory_space<vmem>>, vector<1x128xf32>
      tpu.vector_store %arg5[%c0_81, %c0_82], %83 {strides = array<i32>} : memref<1x128xf32, #tpu.memory_space<vmem>>, vector<1x128xf32>,
    } else {
    }
    %c0_67 = arith.constant 0 : index
    %c0_68 = arith.constant 0 : index
    %70 = vector.load %arg4[%c0_67, %c0_68] : memref<1x128xf32, #tpu.memory_space<vmem>>, vector<1x128xf32>
    %cst_69 = arith.constant dense<0.000000e+00> : vector<128xf32>
    %71 = vector.multi_reduction <add>, %63, %cst_69 [0] : vector<256x128xf32> to vector<128xf32>
    %72 = vector.shape_cast %71 : vector<128xf32> to vector<1x128xf32>
    %73 = arith.addf %70, %72 : vector<1x128xf32>
    %c0_70 = arith.constant 0 : index
    %c0_71 = arith.constant 0 : index
    %74 = vector.load %arg4[%c0_70, %c0_71] : memref<1x128xf32, #tpu.memory_space<vmem>>, vector<1x128xf32>
    tpu.vector_store %arg4[%c0_70, %c0_71], %73 {strides = array<i32>} : memref<1x128xf32, #tpu.memory_space<vmem>>, vector<1x128xf32>,
    %c0_72 = arith.constant 0 : index
    %c0_73 = arith.constant 0 : index
    %75 = vector.load %arg5[%c0_72, %c0_73] : memref<1x128xf32, #tpu.memory_space<vmem>>, vector<1x128xf32>
    %76 = arith.mulf %63, %63 : vector<256x128xf32>
    %cst_74 = arith.constant dense<0.000000e+00> : vector<128xf32>
    %77 = vector.multi_reduction <add>, %76, %cst_74 [0] : vector<256x128xf32> to vector<128xf32>
    %78 = vector.shape_cast %77 : vector<128xf32> to vector<1x128xf32>
    %79 = arith.addf %75, %78 : vector<1x128xf32>
    %c0_75 = arith.constant 0 : index
    %c0_76 = arith.constant 0 : index
    %80 = vector.load %arg5[%c0_75, %c0_76] : memref<1x128xf32, #tpu.memory_space<vmem>>, vector<1x128xf32>
    tpu.vector_store %arg5[%c0_75, %c0_76], %79 {strides = array<i32>} : memref<1x128xf32, #tpu.memory_space<vmem>>, vector<1x128xf32>,
    return
  }
  func.func @transform_0(%arg0: i32) -> (i32, i32, i32, i32) {
    %c0_i32 = arith.constant 0 : i32
    %c0_i32_0 = arith.constant 0 : i32
    %c0_i32_1 = arith.constant 0 : i32
    %c0_i32_2 = arith.constant 0 : i32
    return %arg0, %c0_i32, %c0_i32_0, %c0_i32_1 : i32, i32, i32, i32
  }
  func.func @transform_1(%arg0: i32) -> (i32, i32, i32) {
    %c0_i32 = arith.constant 0 : i32
    %c0_i32_0 = arith.constant 0 : i32
    %c0_i32_1 = arith.constant 0 : i32
    %c0_i32_2 = arith.constant 0 : i32
    return %c0_i32, %c0_i32_0, %c0_i32_1 : i32, i32, i32
  }
  func.func @transform_2(%arg0: i32) -> (i32, i32, i32) {
    %c0_i32 = arith.constant 0 : i32
    %c0_i32_0 = arith.constant 0 : i32
    %c0_i32_1 = arith.constant 0 : i32
    return %arg0, %c0_i32, %c0_i32_0 : i32, i32, i32
  }
  func.func @transform_3(%arg0: i32) -> (i32, i32) {
    %c0_i32 = arith.constant 0 : i32
    %c0_i32_0 = arith.constant 0 : i32
    %c0_i32_1 = arith.constant 0 : i32
    return %c0_i32, %c0_i32_0 : i32, i32
  }
  func.func @transform_4(%arg0: i32) -> (i32, i32) {
    %c0_i32 = arith.constant 0 : i32
    %c0_i32_0 = arith.constant 0 : i32
    %c0_i32_1 = arith.constant 0 : i32
    return %c0_i32, %c0_i32_0 : i32, i32
  }
}

module attributes {stable_mosaic.version = 11 : i64} {
  func.func @_bn_relu_mm_stats_kernel(%arg0: i32, %arg1: memref<256x128xf32, #tpu.memory_space<vmem>>, %arg2: memref<1x128xf32, #tpu.memory_space<vmem>>, %arg3: memref<1x128xf32, #tpu.memory_space<vmem>>, %arg4: memref<128x128xf32, #tpu.memory_space<vmem>>, %arg5: memref<256x128xf32, #tpu.memory_space<vmem>>, %arg6: memref<1x128xf32, #tpu.memory_space<vmem>>, %arg7: memref<1x128xf32, #tpu.memory_space<vmem>>) attributes {dimension_semantics = [#tpu.dimension_semantics<arbitrary>], iteration_bounds = array<i64: 2>, scalar_prefetch = 0 : i64, scratch_operands = 0 : i64, tpu.core_type = #tpu.core_type<tc>, window_params = [{transform_indices = @transform_0, window_bounds = array<i64: 256, 128>}, {pipeline_mode = #tpu.pipeline_mode<synchronous>, transform_indices = @transform_1, window_bounds = array<i64: 1, 128>}, {pipeline_mode = #tpu.pipeline_mode<synchronous>, transform_indices = @transform_2, window_bounds = array<i64: 1, 128>}, {pipeline_mode = #tpu.pipeline_mode<synchronous>, transform_indices = @transform_3, window_bounds = array<i64: 128, 128>}, {transform_indices = @transform_4, window_bounds = array<i64: 256, 128>}, {pipeline_mode = #tpu.pipeline_mode<synchronous>, transform_indices = @transform_5, window_bounds = array<i64: 1, 128>}, {pipeline_mode = #tpu.pipeline_mode<synchronous>, transform_indices = @transform_6, window_bounds = array<i64: 1, 128>}]} {
    %c0 = arith.constant 0 : index
    %c0_0 = arith.constant 0 : index
    %0 = vector.load %arg1[%c0, %c0_0] : memref<256x128xf32, #tpu.memory_space<vmem>>, vector<256x128xf32>
    %c0_1 = arith.constant 0 : index
    %c0_2 = arith.constant 0 : index
    %1 = vector.load %arg2[%c0_1, %c0_2] : memref<1x128xf32, #tpu.memory_space<vmem>>, vector<1x128xf32>
    %2 = vector.broadcast %1 : vector<1x128xf32> to vector<256x128xf32>
    %3 = arith.mulf %0, %2 : vector<256x128xf32>
    %c0_3 = arith.constant 0 : index
    %c0_4 = arith.constant 0 : index
    %4 = vector.load %arg3[%c0_3, %c0_4] : memref<1x128xf32, #tpu.memory_space<vmem>>, vector<1x128xf32>
    %5 = vector.broadcast %4 : vector<1x128xf32> to vector<256x128xf32>
    %6 = arith.addf %3, %5 : vector<256x128xf32>
    %cst = arith.constant 0.000000e+00 : f32
    %7 = vector.broadcast %cst : f32 to vector<256x128xf32>
    %8 = arith.maximumf %6, %7 : vector<256x128xf32>
    %c0_5 = arith.constant 0 : index
    %c0_6 = arith.constant 0 : index
    %9 = vector.load %arg4[%c0_5, %c0_6] : memref<128x128xf32, #tpu.memory_space<vmem>>, vector<128x128xf32>
    %cst_7 = arith.constant dense<0.000000e+00> : vector<256x128xf32>
    %10 = tpu.matmul %8, %9, %cst_7 {dimension_numbers = #tpu.dot_dimension_numbers<[1], [0], [0], [1], [0, 0, 1, 1], [], []>} : vector<256x128xf32>, vector<128x128xf32>, vector<256x128xf32> -> vector<256x128xf32>
    %c0_8 = arith.constant 0 : index
    %c0_9 = arith.constant 0 : index
    %11 = vector.load %arg5[%c0_8, %c0_9] : memref<256x128xf32, #tpu.memory_space<vmem>>, vector<256x128xf32>
    tpu.vector_store %arg5[%c0_8, %c0_9], %10 {strides = array<i32>} : memref<256x128xf32, #tpu.memory_space<vmem>>, vector<256x128xf32>,
    %c0_i32 = arith.constant 0 : i32
    %12 = arith.cmpi eq, %arg0, %c0_i32 : i32
    %13 = arith.extui %12 : i1 to i32
    %c0_i32_10 = arith.constant 0 : i32
    %14 = arith.cmpi ne, %13, %c0_i32_10 : i32
    scf.if %14 {
      %cst_21 = arith.constant 0.000000e+00 : f32
      %26 = vector.broadcast %cst_21 : f32 to vector<1x128xf32>
      %c0_22 = arith.constant 0 : index
      %c0_23 = arith.constant 0 : index
      %27 = vector.load %arg6[%c0_22, %c0_23] : memref<1x128xf32, #tpu.memory_space<vmem>>, vector<1x128xf32>
      tpu.vector_store %arg6[%c0_22, %c0_23], %26 {strides = array<i32>} : memref<1x128xf32, #tpu.memory_space<vmem>>, vector<1x128xf32>,
      %cst_24 = arith.constant 0.000000e+00 : f32
      %28 = vector.broadcast %cst_24 : f32 to vector<1x128xf32>
      %c0_25 = arith.constant 0 : index
      %c0_26 = arith.constant 0 : index
      %29 = vector.load %arg7[%c0_25, %c0_26] : memref<1x128xf32, #tpu.memory_space<vmem>>, vector<1x128xf32>
      tpu.vector_store %arg7[%c0_25, %c0_26], %28 {strides = array<i32>} : memref<1x128xf32, #tpu.memory_space<vmem>>, vector<1x128xf32>,
    } else {
    }
    %c0_11 = arith.constant 0 : index
    %c0_12 = arith.constant 0 : index
    %15 = vector.load %arg6[%c0_11, %c0_12] : memref<1x128xf32, #tpu.memory_space<vmem>>, vector<1x128xf32>
    %cst_13 = arith.constant dense<0.000000e+00> : vector<128xf32>
    %16 = vector.multi_reduction <add>, %10, %cst_13 [0] : vector<256x128xf32> to vector<128xf32>
    %17 = vector.shape_cast %16 : vector<128xf32> to vector<1x128xf32>
    %18 = arith.addf %15, %17 : vector<1x128xf32>
    %c0_14 = arith.constant 0 : index
    %c0_15 = arith.constant 0 : index
    %19 = vector.load %arg6[%c0_14, %c0_15] : memref<1x128xf32, #tpu.memory_space<vmem>>, vector<1x128xf32>
    tpu.vector_store %arg6[%c0_14, %c0_15], %18 {strides = array<i32>} : memref<1x128xf32, #tpu.memory_space<vmem>>, vector<1x128xf32>,
    %c0_16 = arith.constant 0 : index
    %c0_17 = arith.constant 0 : index
    %20 = vector.load %arg7[%c0_16, %c0_17] : memref<1x128xf32, #tpu.memory_space<vmem>>, vector<1x128xf32>
    %21 = arith.mulf %10, %10 : vector<256x128xf32>
    %cst_18 = arith.constant dense<0.000000e+00> : vector<128xf32>
    %22 = vector.multi_reduction <add>, %21, %cst_18 [0] : vector<256x128xf32> to vector<128xf32>
    %23 = vector.shape_cast %22 : vector<128xf32> to vector<1x128xf32>
    %24 = arith.addf %20, %23 : vector<1x128xf32>
    %c0_19 = arith.constant 0 : index
    %c0_20 = arith.constant 0 : index
    %25 = vector.load %arg7[%c0_19, %c0_20] : memref<1x128xf32, #tpu.memory_space<vmem>>, vector<1x128xf32>
    tpu.vector_store %arg7[%c0_19, %c0_20], %24 {strides = array<i32>} : memref<1x128xf32, #tpu.memory_space<vmem>>, vector<1x128xf32>,
    return
  }
  func.func @transform_0(%arg0: i32) -> (i32, i32) {
    %c0_i32 = arith.constant 0 : i32
    %c0_i32_0 = arith.constant 0 : i32
    return %arg0, %c0_i32 : i32, i32
  }
  func.func @transform_1(%arg0: i32) -> (i32, i32) {
    %c0_i32 = arith.constant 0 : i32
    %c0_i32_0 = arith.constant 0 : i32
    %c0_i32_1 = arith.constant 0 : i32
    return %c0_i32, %c0_i32_0 : i32, i32
  }
  func.func @transform_2(%arg0: i32) -> (i32, i32) {
    %c0_i32 = arith.constant 0 : i32
    %c0_i32_0 = arith.constant 0 : i32
    %c0_i32_1 = arith.constant 0 : i32
    return %c0_i32, %c0_i32_0 : i32, i32
  }
  func.func @transform_3(%arg0: i32) -> (i32, i32) {
    %c0_i32 = arith.constant 0 : i32
    %c0_i32_0 = arith.constant 0 : i32
    %c0_i32_1 = arith.constant 0 : i32
    return %c0_i32, %c0_i32_0 : i32, i32
  }
  func.func @transform_4(%arg0: i32) -> (i32, i32) {
    %c0_i32 = arith.constant 0 : i32
    %c0_i32_0 = arith.constant 0 : i32
    return %arg0, %c0_i32 : i32, i32
  }
  func.func @transform_5(%arg0: i32) -> (i32, i32) {
    %c0_i32 = arith.constant 0 : i32
    %c0_i32_0 = arith.constant 0 : i32
    %c0_i32_1 = arith.constant 0 : i32
    return %c0_i32, %c0_i32_0 : i32, i32
  }
  func.func @transform_6(%arg0: i32) -> (i32, i32) {
    %c0_i32 = arith.constant 0 : i32
    %c0_i32_0 = arith.constant 0 : i32
    %c0_i32_1 = arith.constant 0 : i32
    return %c0_i32, %c0_i32_0 : i32, i32
  }
}

module attributes {stable_mosaic.version = 11 : i64} {
  func.func @_bn_add_relu_kernel(%arg0: i32, %arg1: memref<256x128xf32, #tpu.memory_space<vmem>>, %arg2: memref<1x128xf32, #tpu.memory_space<vmem>>, %arg3: memref<1x128xf32, #tpu.memory_space<vmem>>, %arg4: memref<256x128xf32, #tpu.memory_space<vmem>>, %arg5: memref<256x128xf32, #tpu.memory_space<vmem>>) attributes {dimension_semantics = [#tpu.dimension_semantics<parallel>], iteration_bounds = array<i64: 2>, scalar_prefetch = 0 : i64, scratch_operands = 0 : i64, tpu.core_type = #tpu.core_type<tc>, window_params = [{transform_indices = @transform_0, window_bounds = array<i64: 256, 128>}, {pipeline_mode = #tpu.pipeline_mode<synchronous>, transform_indices = @transform_1, window_bounds = array<i64: 1, 128>}, {pipeline_mode = #tpu.pipeline_mode<synchronous>, transform_indices = @transform_2, window_bounds = array<i64: 1, 128>}, {transform_indices = @transform_3, window_bounds = array<i64: 256, 128>}, {transform_indices = @transform_4, window_bounds = array<i64: 256, 128>}]} {
    %c0 = arith.constant 0 : index
    %c0_0 = arith.constant 0 : index
    %0 = vector.load %arg1[%c0, %c0_0] : memref<256x128xf32, #tpu.memory_space<vmem>>, vector<256x128xf32>
    %c0_1 = arith.constant 0 : index
    %c0_2 = arith.constant 0 : index
    %1 = vector.load %arg2[%c0_1, %c0_2] : memref<1x128xf32, #tpu.memory_space<vmem>>, vector<1x128xf32>
    %2 = vector.broadcast %1 : vector<1x128xf32> to vector<256x128xf32>
    %3 = arith.mulf %0, %2 : vector<256x128xf32>
    %c0_3 = arith.constant 0 : index
    %c0_4 = arith.constant 0 : index
    %4 = vector.load %arg3[%c0_3, %c0_4] : memref<1x128xf32, #tpu.memory_space<vmem>>, vector<1x128xf32>
    %5 = vector.broadcast %4 : vector<1x128xf32> to vector<256x128xf32>
    %6 = arith.addf %3, %5 : vector<256x128xf32>
    %c0_5 = arith.constant 0 : index
    %c0_6 = arith.constant 0 : index
    %7 = vector.load %arg4[%c0_5, %c0_6] : memref<256x128xf32, #tpu.memory_space<vmem>>, vector<256x128xf32>
    %8 = arith.addf %6, %7 : vector<256x128xf32>
    %cst = arith.constant 0.000000e+00 : f32
    %9 = vector.broadcast %cst : f32 to vector<256x128xf32>
    %10 = arith.maximumf %8, %9 : vector<256x128xf32>
    %c0_7 = arith.constant 0 : index
    %c0_8 = arith.constant 0 : index
    %11 = vector.load %arg5[%c0_7, %c0_8] : memref<256x128xf32, #tpu.memory_space<vmem>>, vector<256x128xf32>
    tpu.vector_store %arg5[%c0_7, %c0_8], %10 {strides = array<i32>} : memref<256x128xf32, #tpu.memory_space<vmem>>, vector<256x128xf32>,
    return
  }
  func.func @transform_0(%arg0: i32) -> (i32, i32) {
    %c0_i32 = arith.constant 0 : i32
    %c0_i32_0 = arith.constant 0 : i32
    return %arg0, %c0_i32 : i32, i32
  }
  func.func @transform_1(%arg0: i32) -> (i32, i32) {
    %c0_i32 = arith.constant 0 : i32
    %c0_i32_0 = arith.constant 0 : i32
    %c0_i32_1 = arith.constant 0 : i32
    return %c0_i32, %c0_i32_0 : i32, i32
  }
  func.func @transform_2(%arg0: i32) -> (i32, i32) {
    %c0_i32 = arith.constant 0 : i32
    %c0_i32_0 = arith.constant 0 : i32
    %c0_i32_1 = arith.constant 0 : i32
    return %c0_i32, %c0_i32_0 : i32, i32
  }
  func.func @transform_3(%arg0: i32) -> (i32, i32) {
    %c0_i32 = arith.constant 0 : i32
    %c0_i32_0 = arith.constant 0 : i32
    return %arg0, %c0_i32 : i32, i32
  }
  func.func @transform_4(%arg0: i32) -> (i32, i32) {
    %c0_i32 = arith.constant 0 : i32
    %c0_i32_0 = arith.constant 0 : i32
    return %arg0, %c0_i32 : i32, i32
  }
}

</mosaic_0001>

<bundles_post_ra>
// kernel: bottleneck_forward.6
= control target key start
LH: loop header
LB: loop body
LE: loop exit
PB: predicated region body
PF: predicated region fallthrough
CT: control target
= control target key end

     0   :  { %s453_s12 = smov 0   ;;  %s612_s0 = inlined_call_operand.vmem [shape: f32[512,128], index: 0, kind: input, shape index: {}]   ;;  %s613_s1 = inlined_call_operand.vmem [shape: f32[1,128], index: 1, kind: input, shape index: {}]   ;;  %s614_s2 = inlined_call_operand.vmem [shape: f32[1,128], index: 2, kind: input, shape index: {}]   ;;  %s615_s3 = inlined_call_operand.vmem [shape: f32[512,128], index: 3, kind: output, shape index: {}]  }
   0x1 LB: > { %s404_s13 = sadd.s32 4294967295, %s431_s12   ;;  %p408_p0 = scmp.ge.s32.totalorder %s431_s12, 1  ;;  %s431_s12 = sphi %s453_s12, %s13_s12  }
   0x2   : > { %p138_p1 = scmp.lt.s32.totalorder %s431_s12, 3 }
   0x4   : > { %p139_p2 = pnand %p408_p0, %p138_p1 }
   0x5   : > { %s409_s14 = sshll.u32 (!%p139_p2), %s404_s13, 5  ;;  %v464_v0 = vld [vmem:[%s613_s1] ss:$0 sm:$0xff] (!%p139_p2) }
   0x6   : > { %142 = sbr.rel (%p139_p2) target bundleno = 46 (0x2e), region = 32  ;;  %p163_p3 = scmp.lt.s32.totalorder (!%p139_p2), %s409_s14, 63  ;;  %v474_v1 = vld [vmem:[%s614_s2] ss:$0 sm:$0xff] (!%p139_p2) }
   0xd   : > { %s617_s14 = smov (!%p163_p3, %s409_s14), 63 }
   0xe   : > { %s410_s15 = sshll.u32 %s617_s14, 3 }
   0xf   : > { %s469_s20 = scalar_lea.vmem %s612_s0, %s410_s15  ;;  %s497_s25 = scalar_lea.vmem %s615_s3, %s410_s15 }
  0x10   : > { %v174_v2 = vld [vmem:[%s469_s20] sm:$0xff]  ;;  %v175_v3 = vld [vmem:[%s469_s20 + $0x8] sm:$0xff]  ;;  %v176_v4 = vld [vmem:[%s469_s20 + $0x10] sm:$0xff] }
  0x11   : > { %v213_v5 = vmul.f32 %v464_v0, %v174_v2  ;;  %v214_v6 = vmul.f32 %v464_v0, %v175_v3  ;;  %v215_v7 = vmul.f32 %v464_v0, %v176_v4  ;;  %v177_v8 = vld [vmem:[%s469_s20 + $0x18] sm:$0xff]  ;;  %v178_v9 = vld [vmem:[%s469_s20 + $0x20] sm:$0xff]  ;;  %v179_v10 = vld [vmem:[%s469_s20 + $0x28] sm:$0xff] }
  0x12   : > { %v216_v11 = vmul.f32 %v464_v0, %v177_v8  ;;  %v217_v12 = vmul.f32 %v464_v0, %v178_v9  ;;  %v218_v13 = vmul.f32 %v464_v0, %v179_v10  ;;  %v180_v14 = vld [vmem:[%s469_s20 + $0x30] sm:$0xff]  ;;  %v181_v15 = vld [vmem:[%s469_s20 + $0x38] sm:$0xff]  ;;  %v182_v24 = vld [vmem:[%s469_s20 + $0x40] sm:$0xff] }
  0x13   : > { %v252_v16 = vadd.f32 %v474_v1, %v213_v5  ;;  %v253_v17 = vadd.f32 %v474_v1, %v214_v6  ;;  %v254_v18 = vadd.f32 %v474_v1, %v215_v7  ;;  %v219_v19 = vmul.f32 %v464_v0, %v180_v14  ;;  %v183_v25 = vld [vmem:[%s469_s20 + $0x48] sm:$0xff]  ;;  %v184_v26 = vld [vmem:[%s469_s20 + $0x50] sm:$0xff]  ;;  %v185_v31 = vld [vmem:[%s469_s20 + $0x58] sm:$0xff] }
  0x14   : > { %v255_v20 = vadd.f32 %v474_v1, %v216_v11  ;;  %v256_v21 = vadd.f32 %v474_v1, %v217_v12  ;;  %v257_v22 = vadd.f32 %v474_v1, %v218_v13  ;;  %v220_v23 = vmul.f32 %v464_v0, %v181_v15  ;;  %v186_v32 = vld [vmem:[%s469_s20 + $0x60] sm:$0xff]  ;;  %v187_v33 = vld [vmem:[%s469_s20 + $0x68] sm:$0xff]  ;;  %v188_v38 = vld [vmem:[%s469_s20 + $0x70] sm:$0xff] }
  0x15   : > { %v284_v27 = vmax.f32 %v252_v16, 0.0  ;;  %v285_v28 = vmax.f32 %v253_v17, 0.0  ;;  %v286_v29 = vmax.f32 %v254_v18, 0.0  ;;  %v258_v30 = vadd.f32 %v474_v1, %v219_v19  ;;  %v189_v43 = vld [vmem:[%s469_s20 + $0x78] sm:$0xff]  ;;  %v190_v56 = vld [vmem:[%s469_s20 + $0x80] sm:$0xff]  ;;  %v191_v57 = vld [vmem:[%s469_s20 + $0x88] sm:$0xff] }
  0x16   : > { %v287_v34 = vmax.f32 %v255_v20, 0.0  ;;  %v288_v35 = vmax.f32 %v256_v21, 0.0  ;;  %v289_v36 = vmax.f32 %v257_v22, 0.0  ;;  %v259_v37 = vadd.f32 %v474_v1, %v220_v23  ;;  %v192_v58 = vld [vmem:[%s469_s20 + $0x90] sm:$0xff]  ;;  %v193_v63 = vld [vmem:[%s469_s20 + $0x98] sm:$0xff]  ;;  %v194_v2 = vld [vmem:[%s469_s20 + $0xa0] sm:$0xff] }
  0x17   : > { %316 = vst [vmem:[%s497_s25] sm:$0xff] %v284_v27  ;;  %317 = vst [vmem:[%s497_s25 + $0x8] sm:$0xff] %v285_v28  ;;  %v290_v39 = vmax.f32 %v258_v30, 0.0  ;;  %v221_v40 = vmul.f32 %v464_v0, %v182_v24  ;;  %v222_v41 = vmul.f32 %v464_v0, %v183_v25  ;;  %v223_v42 = vmul.f32 %v464_v0, %v184_v26  ;;  %v195_v3 = vld [vmem:[%s469_s20 + $0xa8] sm:$0xff]  ;;  %v196_v8 = vld [vmem:[%s469_s20 + $0xb0] sm:$0xff] }
  0x18   : > { %318 = vst [vmem:[%s497_s25 + $0x10] sm:$0xff] %v286_v29  ;;  %319 = vst [vmem:[%s497_s25 + $0x18] sm:$0xff] %v287_v34  ;;  %v291_v44 = vmax.f32 %v259_v37, 0.0  ;;  %v224_v45 = vmul.f32 %v464_v0, %v185_v31  ;;  %v225_v46 = vmul.f32 %v464_v0, %v186_v32  ;;  %v226_v47 = vmul.f32 %v464_v0, %v187_v33  ;;  %v197_v13 = vld [vmem:[%s469_s20 + $0xb8] sm:$0xff]  ;;  %v198_v26 = vld [vmem:[%s469_s20 + $0xc0] sm:$0xff] }
  0x19   : > { %320 = vst [vmem:[%s497_s25 + $0x20] sm:$0xff] %v288_v35  ;;  %321 = vst [vmem:[%s497_s25 + $0x28] sm:$0xff] %v289_v36  ;;  %v260_v48 = vadd.f32 %v474_v1, %v221_v40  ;;  %v261_v49 = vadd.f32 %v474_v1, %v222_v41  ;;  %v262_v50 = vadd.f32 %v474_v1, %v223_v42  ;;  %v199_v27 = vld [vmem:[%s469_s20 + $0xc8] sm:$0xff]  ;;  %v200_v28 = vld [vmem:[%s469_s20 + $0xd0] sm:$0xff] }
  0x1a   : > { %322 = vst [vmem:[%s497_s25 + $0x30] sm:$0xff] %v290_v39  ;;  %v227_v51 = vmul.f32 %v464_v0, %v188_v38  ;;  %323 = vst [vmem:[%s497_s25 + $0x38] sm:$0xff] %v291_v44  ;;  %v263_v52 = vadd.f32 %v474_v1, %v224_v45  ;;  %v264_v53 = vadd.f32 %v474_v1, %v225_v46  ;;  %v201_v33 = vld [vmem:[%s469_s20 + $0xd8] sm:$0xff]  ;;  %v202_v34 = vld [vmem:[%s469_s20 + $0xe0] sm:$0xff] }
  0x1b   : > { %v265_v54 = vadd.f32 %v474_v1, %v226_v47  ;;  %v228_v55 = vmul.f32 %v464_v0, %v189_v43  ;;  %v292_v59 = vmax.f32 %v260_v48, 0.0  ;;  %v293_v60 = vmax.f32 %v261_v49, 0.0  ;;  %v203_v35 = vld [vmem:[%s469_s20 + $0xe8] sm:$0xff]  ;;  %v204_v40 = vld [vmem:[%s469_s20 + $0xf0] sm:$0xff]  ;;  %v205_v45 = vld [vmem:[%s469_s20 + $0xf8] sm:$0xff] }
  0x1c   : > { %v294_v61 = vmax.f32 %v262_v50, 0.0  ;;  %v266_v62 = vadd.f32 %v474_v1, %v227_v51  ;;  %v295_v4 = vmax.f32 %v263_v52, 0.0  ;;  %v296_v5 = vmax.f32 %v264_v53, 0.0 }
  0x1d   : > { %v297_v6 = vmax.f32 %v265_v54, 0.0  ;;  %v267_v7 = vadd.f32 %v474_v1, %v228_v55  ;;  %324 = vst [vmem:[%s497_s25 + $0x40] sm:$0xff] %v292_v59  ;;  %325 = vst [vmem:[%s497_s25 + $0x48] sm:$0xff] %v293_v60  ;;  %v229_v10 = vmul.f32 %v464_v0, %v190_v56  ;;  %v230_v11 = vmul.f32 %v464_v0, %v191_v57 }
  0x1e   : > { %326 = vst [vmem:[%s497_s25 + $0x50] sm:$0xff] %v294_v61  ;;  %v298_v9 = vmax.f32 %v266_v62, 0.0  ;;  %v231_v12 = vmul.f32 %v464_v0, %v192_v58  ;;  %327 = vst [vmem:[%s497_s25 + $0x58] sm:$0xff] %v295_v4  ;;  %v232_v15 = vmul.f32 %v464_v0, %v193_v63  ;;  %v233_v16 = vmul.f32 %v464_v0, %v194_v2 }
  0x1f   : > { %328 = vst [vmem:[%s497_s25 + $0x60] sm:$0xff] %v296_v5  ;;  %329 = vst [vmem:[%s497_s25 + $0x68] sm:$0xff] %v297_v6  ;;  %v299_v14 = vmax.f32 %v267_v7, 0.0  ;;  %v234_v17 = vmul.f32 %v464_v0, %v195_v3  ;;  %v268_v18 = vadd.f32 %v474_v1, %v229_v10  ;;  %v269_v19 = vadd.f32 %v474_v1, %v230_v11 }
  0x20   : > { %330 = vst [vmem:[%s497_s25 + $0x70] sm:$0xff] %v298_v9  ;;  %v270_v20 = vadd.f32 %v474_v1, %v231_v12  ;;  %v235_v21 = vmul.f32 %v464_v0, %v196_v8  ;;  %v271_v22 = vadd.f32 %v474_v1, %v232_v15  ;;  %v272_v23 = vadd.f32 %v474_v1, %v233_v16 }
  0x21   : > { %331 = vst [vmem:[%s497_s25 + $0x78] sm:$0xff] %v299_v14  ;;  %v273_v24 = vadd.f32 %v474_v1, %v234_v17  ;;  %v236_v25 = vmul.f32 %v464_v0, %v197_v13  ;;  %v300_v29 = vmax.f32 %v268_v18, 0.0  ;;  %v301_v30 = vmax.f32 %v269_v19, 0.0 }
  0x22   : > { %v302_v31 = vmax.f32 %v270_v20, 0.0  ;;  %v274_v32 = vadd.f32 %v474_v1, %v235_v21  ;;  %v303_v36 = vmax.f32 %v271_v22, 0.0  ;;  %v304_v37 = vmax.f32 %v272_v23, 0.0 }
  0x23   : > { %v305_v38 = vmax.f32 %v273_v24, 0.0  ;;  %v275_v39 = vadd.f32 %v474_v1, %v236_v25  ;;  %332 = vst [vmem:[%s497_s25 + $0x80] sm:$0xff] %v300_v29  ;;  %333 = vst [vmem:[%s497_s25 + $0x88] sm:$0xff] %v301_v30  ;;  %v237_v42 = vmul.f32 %v464_v0, %v198_v26  ;;  %v238_v43 = vmul.f32 %v464_v0, %v199_v27 }
  0x24   : > { %334 = vst [vmem:[%s497_s25 + $0x90] sm:$0xff] %v302_v31  ;;  %v306_v41 = vmax.f32 %v274_v32, 0.0  ;;  %v239_v44 = vmul.f32 %v464_v0, %v200_v28  ;;  %335 = vst [vmem:[%s497_s25 + $0x98] sm:$0xff] %v303_v36  ;;  %v240_v47 = vmul.f32 %v464_v0, %v201_v33  ;;  %v241_v48 = vmul.f32 %v464_v0, %v202_v34 }
  0x25   : > { %336 = vst [vmem:[%s497_s25 + $0xa0] sm:$0xff] %v304_v37  ;;  %337 = vst [vmem:[%s497_s25 + $0xa8] sm:$0xff] %v305_v38  ;;  %v307_v46 = vmax.f32 %v275_v39, 0.0  ;;  %v242_v49 = vmul.f32 %v464_v0, %v203_v35  ;;  %v276_v50 = vadd.f32 %v474_v1, %v237_v42  ;;  %v277_v51 = vadd.f32 %v474_v1, %v238_v43 }
  0x26   : > { %338 = vst [vmem:[%s497_s25 + $0xb0] sm:$0xff] %v306_v41  ;;  %v278_v52 = vadd.f32 %v474_v1, %v239_v44  ;;  %v243_v53 = vmul.f32 %v464_v0, %v204_v40  ;;  %v279_v54 = vadd.f32 %v474_v1, %v240_v47  ;;  %v280_v55 = vadd.f32 %v474_v1, %v241_v48 }
  0x27   : > { %339 = vst [vmem:[%s497_s25 + $0xb8] sm:$0xff] %v307_v46  ;;  %v281_v56 = vadd.f32 %v474_v1, %v242_v49  ;;  %v244_v57 = vmul.f32 %v464_v0, %v205_v45  ;;  %v308_v58 = vmax.f32 %v276_v50, 0.0  ;;  %v309_v59 = vmax.f32 %v277_v51, 0.0 }
  0x28   : > { %v310_v60 = vmax.f32 %v278_v52, 0.0  ;;  %v282_v61 = vadd.f32 %v474_v1, %v243_v53  ;;  %v311_v62 = vmax.f32 %v279_v54, 0.0  ;;  %v312_v63 = vmax.f32 %v280_v55, 0.0 }
  0x29   : > { %v313_v2 = vmax.f32 %v281_v56, 0.0  ;;  %v283_v3 = vadd.f32 %v474_v1, %v244_v57  ;;  %340 = vst [vmem:[%s497_s25 + $0xc0] sm:$0xff] %v308_v58  ;;  %341 = vst [vmem:[%s497_s25 + $0xc8] sm:$0xff] %v309_v59 }
  0x2a   : > { %342 = vst [vmem:[%s497_s25 + $0xd0] sm:$0xff] %v310_v60  ;;  %v314_v4 = vmax.f32 %v282_v61, 0.0  ;;  %343 = vst [vmem:[%s497_s25 + $0xd8] sm:$0xff] %v311_v62 }
  0x2b   : > { %344 = vst [vmem:[%s497_s25 + $0xe0] sm:$0xff] %v312_v63  ;;  %345 = vst [vmem:[%s497_s25 + $0xe8] sm:$0xff] %v313_v2  ;;  %v315_v0 = vmax.f32 %v283_v3, 0.0 }
  0x2c   : > { %346 = vst [vmem:[%s497_s25 + $0xf0] sm:$0xff] %v314_v4 }
  0x2d   : > { %347 = vst [vmem:[%s497_s25 + $0xf8] sm:$0xff] %v315_v0 }
  0x2e PF: > { %s13_s12 = sadd.s32 1, %s431_s12  }
  0x2f   : > { %p10_p4 = scmp.ge.s32.totalorder %s13_s12, 4  }
  0x31   :  { %12 = sbr.rel (!%p10_p4) target bundleno = 1 (0x1), region = 62 }

// kernel: bottleneck_forward.5
= control target key start
LH: loop header
LB: loop body
LE: loop exit
PB: predicated region body
PF: predicated region fallthrough
CT: control target
= control target key end

     0   :  { %s918_s15 = smov 0   ;;  %s1218_s0 = inlined_call_operand.vmem [shape: f32[512,128], index: 0, kind: input, shape index: {}]   ;;  %s1219_s1 = inlined_call_operand.vmem [shape: f32[128,128], index: 1, kind: input, shape index: {}]   ;;  %s1220_s2 = inlined_call_operand.vmem [shape: f32[512,128], index: 2, kind: output, shape index: {0}]   ;;  %s1221_s3 = inlined_call_operand.vmem [shape: f32[1,128], index: 3, kind: output, shape index: {1}]   ;;  %s1222_s4 = inlined_call_operand.vmem [shape: f32[1,128], index: 4, kind: output, shape index: {2}]  }
   0x1 LB: > { %s687_s16 = sadd.s32 4294967295, %s890_s15   ;;  %p691_p0 = scmp.ge.s32.totalorder %s890_s15, 1  ;;  %s890_s15 = sphi %s918_s15, %s15_s15  }
   0x2   : > { %p158_p1 = scmp.lt.s32.totalorder %s890_s15, 3 }
   0x4   : > { %p159_p2 = pnand %p691_p0, %p158_p1 }
   0x5   : > { %v228_v0 = vld [vmem:[%s1219_s1] sm:$0xff] (!%p159_p2)  ;;  %v229_v1 = vld [vmem:[%s1219_s1 + $0x8] sm:$0xff] (!%p159_p2)  ;;  %v230_v2 = vld [vmem:[%s1219_s1 + $0x10] sm:$0xff] (!%p159_p2)  ;;  %s692_s23 = sshll.u32 (!%p159_p2), %s687_s16, 5  ;;  %p696_p4 = scmp.ne.s32.totalorder (!%p159_p2), %s687_s16, 0 }
   0x6   : > { %162 = sbr.rel (%p159_p2) target bundleno = 362 (0x16a), region = 28  ;;  %v827_v3 = vpack.c.bf16 (!%p159_p2), %v229_v1, %v228_v0  ;;  %v231_v4 = vld [vmem:[%s1219_s1 + $0x18] sm:$0xff] (!%p159_p2)  ;;  %p185_p3 = scmp.lt.s32.totalorder (!%p159_p2), %s692_s23, 63  ;;  %v232_v6 = vld [vmem:[%s1219_s1 + $0x20] sm:$0xff] (!%p159_p2)  ;;  %v233_v7 = vld [vmem:[%s1219_s1 + $0x28] sm:$0xff] (!%p159_p2) }
   0x7   : > { %v831_v5 = vpack.c.bf16 (!%p159_p2), %v231_v4, %v230_v2  ;;  %v835_v8 = vpack.c.bf16 (!%p159_p2), %v233_v7, %v232_v6  ;;  %v234_v9 = vld [vmem:[%s1219_s1 + $0x30] sm:$0xff] (!%p159_p2)  ;;  %v235_v10 = vld [vmem:[%s1219_s1 + $0x38] sm:$0xff] (!%p159_p2)  ;;  %v236_v14 = vld [vmem:[%s1219_s1 + $0x40] sm:$0xff] (!%p159_p2) }
   0x8   : > { %828 = vmatprep.subr.bf16.mxu0 (!%p159_p2), %v827_v3  ;;  %859 = vmatprep.subr.bf16.mxu1 (!%p159_p2), %v827_v3  ;;  %v839_v13 = vpack.c.bf16 (!%p159_p2), %v235_v10, %v234_v9  ;;  %v237_v15 = vld [vmem:[%s1219_s1 + $0x48] sm:$0xff] (!%p159_p2)  ;;  %v238_v17 = vld [vmem:[%s1219_s1 + $0x50] sm:$0xff] (!%p159_p2)  ;;  %v239_v18 = vld [vmem:[%s1219_s1 + $0x58] sm:$0xff] (!%p159_p2) }
   0x9   : > { %830 = vmatpush3.bf16.msra.mxu0 (!%p159_p2), %v827_v3  ;;  %867 = vmatpush3.bf16.msra.mxu1 (!%p159_p2), %v827_v3  ;;  %v843_v16 = vpack.c.bf16 (!%p159_p2), %v237_v15, %v236_v14  ;;  %v847_v19 = vpack.c.bf16 (!%p159_p2), %v239_v18, %v238_v17  ;;  %v240_v20 = vld [vmem:[%s1219_s1 + $0x60] sm:$0xff] (!%p159_p2)  ;;  %v241_v21 = vld [vmem:[%s1219_s1 + $0x68] sm:$0xff] (!%p159_p2)  ;;  %v242_v23 = vld [vmem:[%s1219_s1 + $0x70] sm:$0xff] (!%p159_p2) }
   0xa   : > { %832 = vmatprep.subr.bf16.mxu0 (!%p159_p2), %v831_v5  ;;  %860 = vmatprep.subr.bf16.mxu1 (!%p159_p2), %v831_v5  ;;  %v851_v22 = vpack.c.bf16 (!%p159_p2), %v241_v21, %v240_v20  ;;  %v243_v24 = vld [vmem:[%s1219_s1 + $0x78] sm:$0xff] (!%p159_p2) }
   0xb   : > { %v855_v25 = vpack.c.bf16 (!%p159_p2), %v243_v24, %v242_v23 }
   0xd   : > { %s1224_s23 = smov (!%p185_p3, %s692_s23), 63  ;;  %834 = vmatpush3.bf16.msra.mxu0 %v831_v5  ;;  %868 = vmatpush3.bf16.msra.mxu1 %v831_v5  ;;  %v892_v24 = vmov (!%p696_p4), 0.0  }
   0xe   : > { %s693_s30 = sshll.u32 %s1224_s23, 3  ;;  %836 = vmatprep.subr.bf16.mxu0 %v835_v8  ;;  %861 = vmatprep.subr.bf16.mxu1 %v835_v8  ;;  %505 = vst [vmem:[%s1221_s3] sm:$0x1] (!%p696_p4), %v892_v24  ;;  %506 = vst [vmem:[%s1222_s4] sm:$0x1] (!%p696_p4), %v892_v24 }
   0xf   : > { %s960_s11 = scalar_lea.vmem %s1218_s0, %s693_s30  ;;  %s1023_s8 = scalar_lea.vmem %s1220_s2, %s693_s30 }
  0x10   : > { %v196_v11 = vld [vmem:[%s960_s11] sm:$0xff]  ;;  %v197_v26 = vld [vmem:[%s960_s11 + $0x8] sm:$0xff]  ;;  %v198_v28 = vld [vmem:[%s960_s11 + $0x10] sm:$0xff] }
  0x11   : > { %v212_v12 = vld [vmem:[%s960_s11 + $0x80] sm:$0xff]  ;;  %779 = vmatprep.mubr.f32.mxu0 %v196_v11  ;;  %838 = vmatpush3.bf16.msra.mxu0 %v835_v8  ;;  %v213_v27 = vld [vmem:[%s960_s11 + $0x88] sm:$0xff]  ;;  %v214_v29 = vld [vmem:[%s960_s11 + $0x90] sm:$0xff] }
  0x12   : > { %803 = vmatprep.mubr.f32.mxu1 %v212_v12  ;;  %869 = vmatpush3.bf16.msra.mxu1 %v835_v8  ;;  %v199_v30 = vld [vmem:[%s960_s11 + $0x18] sm:$0xff]  ;;  %v200_v32 = vld [vmem:[%s960_s11 + $0x20] sm:$0xff]  ;;  %v201_v34 = vld [vmem:[%s960_s11 + $0x28] sm:$0xff] }
  0x13   : > { %840 = vmatprep.subr.bf16.mxu0 %v839_v13  ;;  %862 = vmatprep.subr.bf16.mxu1 %v839_v13  ;;  %v215_v31 = vld [vmem:[%s960_s11 + $0x98] sm:$0xff]  ;;  %v216_v33 = vld [vmem:[%s960_s11 + $0xa0] sm:$0xff]  ;;  %v217_v35 = vld [vmem:[%s960_s11 + $0xa8] sm:$0xff] }
  0x14   : > { %v202_v36 = vld [vmem:[%s960_s11 + $0x30] sm:$0xff]  ;;  %v203_v38 = vld [vmem:[%s960_s11 + $0x38] sm:$0xff]  ;;  %v204_v40 = vld [vmem:[%s960_s11 + $0x40] sm:$0xff] }
  0x15   : > { %842 = vmatpush3.bf16.msra.mxu0 %v839_v13  ;;  %v218_v37 = vld [vmem:[%s960_s11 + $0xb0] sm:$0xff]  ;;  %v219_v39 = vld [vmem:[%s960_s11 + $0xb8] sm:$0xff]  ;;  %v220_v41 = vld [vmem:[%s960_s11 + $0xc0] sm:$0xff] }
  0x16   : > { %870 = vmatpush3.bf16.msra.mxu1 %v839_v13  ;;  %844 = vmatprep.subr.bf16.mxu0 %v843_v16  ;;  %v205_v42 = vld [vmem:[%s960_s11 + $0x48] sm:$0xff]  ;;  %v206_v44 = vld [vmem:[%s960_s11 + $0x50] sm:$0xff]  ;;  %v207_v46 = vld [vmem:[%s960_s11 + $0x58] sm:$0xff] }
  0x17   : > { %863 = vmatprep.subr.bf16.mxu1 %v843_v16  ;;  %v221_v43 = vld [vmem:[%s960_s11 + $0xc8] sm:$0xff]  ;;  %v222_v45 = vld [vmem:[%s960_s11 + $0xd0] sm:$0xff]  ;;  %v223_v47 = vld [vmem:[%s960_s11 + $0xd8] sm:$0xff] }
  0x18   : > { %v208_v48 = vld [vmem:[%s960_s11 + $0x60] sm:$0xff]  ;;  %v209_v50 = vld [vmem:[%s960_s11 + $0x68] sm:$0xff]  ;;  %v210_v52 = vld [vmem:[%s960_s11 + $0x70] sm:$0xff] }
  0x19   : > { %846 = vmatpush3.bf16.msra.mxu0 %v843_v16  ;;  %v224_v49 = vld [vmem:[%s960_s11 + $0xe0] sm:$0xff]  ;;  %v225_v51 = vld [vmem:[%s960_s11 + $0xe8] sm:$0xff]  ;;  %v226_v53 = vld [vmem:[%s960_s11 + $0xf0] sm:$0xff] }
  0x1a   : > { %871 = vmatpush3.bf16.msra.mxu1 %v843_v16  ;;  %848 = vmatprep.subr.bf16.mxu0 %v847_v19  ;;  %v211_v54 = vld [vmem:[%s960_s11 + $0x78] sm:$0xff] }
  0x1b   : > { %864 = vmatprep.subr.bf16.mxu1 %v847_v19  ;;  %v227_v55 = vld [vmem:[%s960_s11 + $0xf8] sm:$0xff] }
  0x1d   : > { %850 = vmatpush3.bf16.msra.mxu0 %v847_v19 }
  0x1e   : > { %872 = vmatpush3.bf16.msra.mxu1 %v847_v19  ;;  %852 = vmatprep.subr.bf16.mxu0 %v851_v22 }
  0x1f   : > { %865 = vmatprep.subr.bf16.mxu1 %v851_v22 }
  0x21   : > { %854 = vmatpush3.bf16.msra.mxu0 %v851_v22 }
  0x22   : > { %873 = vmatpush3.bf16.msra.mxu1 %v851_v22  ;;  %856 = vmatprep.subr.bf16.mxu0 %v855_v25 }
  0x23   : > { %866 = vmatprep.subr.bf16.mxu1 %v855_v25 }
  0x25   : > { %858 = vmatpush3.bf16.msra.mxu0 %v855_v25 }
  0x26   : > { %874 = vmatpush3.bf16.msra.mxu1 %v855_v25 }
  0x28   : > { %780 = vmatmul.mubr.f32.vlgmr.msra.gmra.mrb[0].mxu0 %v197_v26 }
  0x29   : > { %804 = vmatmul.mubr.f32.vlgmr.msra.gmra.mrb[0].mxu1 %v213_v27  ;;  %782 = vmatprep.mubr.f32.mxu0 %v198_v28 }
  0x2a   : > { %806 = vmatprep.mubr.f32.mxu1 %v214_v29 }
  0x2c   : > { %783 = vmatmul.mubr.f32.gmra.mrb[2].mxu0 %v199_v30 }
  0x2d   : > { %807 = vmatmul.mubr.f32.gmra.mrb[2].mxu1 %v215_v31  ;;  %785 = vmatprep.mubr.f32.mxu0 %v200_v32 }
  0x2e   : > { %809 = vmatprep.mubr.f32.mxu1 %v216_v33 }
  0x30   : > { %786 = vmatmul.mubr.f32.gmra.mrb[4].mxu0 %v201_v34 }
  0x31   : > { %810 = vmatmul.mubr.f32.gmra.mrb[4].mxu1 %v217_v35  ;;  %788 = vmatprep.mubr.f32.mxu0 %v202_v36 }
  0x32   : > { %812 = vmatprep.mubr.f32.mxu1 %v218_v37 }
  0x34   : > { %789 = vmatmul.mubr.f32.gmra.mrb[6].mxu0 %v203_v38 }
  0x35   : > { %813 = vmatmul.mubr.f32.gmra.mrb[6].mxu1 %v219_v39  ;;  %791 = vmatprep.mubr.f32.mxu0 %v204_v40 }
  0x36   : > { %815 = vmatprep.mubr.f32.mxu1 %v220_v41 }
  0x38   : > { %792 = vmatmul.mubr.f32.gmra.mrb[8].mxu0 %v205_v42 }
  0x39   : > { %816 = vmatmul.mubr.f32.gmra.mrb[8].mxu1 %v221_v43  ;;  %794 = vmatprep.mubr.f32.mxu0 %v206_v44 }
  0x3a   : > { %818 = vmatprep.mubr.f32.mxu1 %v222_v45 }
  0x3c   : > { %795 = vmatmul.mubr.f32.gmra.mrb[10].mxu0 %v207_v46 }
  0x3d   : > { %819 = vmatmul.mubr.f32.gmra.mrb[10].mxu1 %v223_v47  ;;  %797 = vmatprep.mubr.f32.mxu0 %v208_v48 }
  0x3e   : > { %821 = vmatprep.mubr.f32.mxu1 %v224_v49 }
  0x40   : > { %798 = vmatmul.mubr.f32.gmra.mrb[12].mxu0 %v209_v50 }
  0x41   : > { %822 = vmatmul.mubr.f32.gmra.mrb[12].mxu1 %v225_v51  ;;  %800 = vmatprep.mubr.f32.mxu0 %v210_v52 }
  0x42   : > { %824 = vmatprep.mubr.f32.mxu1 %v226_v53 }
  0x44   : > { %801 = vmatmul.mubr.f32.gmra.mrb[14].mxu0 %v211_v54 }
  0x45   : > { %825 = vmatmul.mubr.f32.gmra.mrb[14].mxu1 %v227_v55 }
  0xfb   : > { %v1025_v56 = vpop.f32.mrb[0].mxu0 }
  0xfc   : > { %v1027_v57 = vpop.f32.mrb[0].mxu1  ;;  %470 = vst [vmem:[%s1023_s8 + $0x8] sm:$0xff] %v1025_v56  ;;  %v1033_v58 = vpop.f32.mrb[1].mxu0 }
  0xfd   : > { %486 = vst [vmem:[%s1023_s8 + $0x88] sm:$0xff] %v1027_v57  ;;  %v1035_v59 = vpop.f32.mrb[1].mxu1  ;;  %469 = vst [vmem:[%s1023_s8] sm:$0xff] %v1033_v58 }
  0xfe   : > { %485 = vst [vmem:[%s1023_s8 + $0x80] sm:$0xff] %v1035_v59 }
  0xff   : > { %v1041_v60 = vpop.f32.mrb[2].mxu0 }
 0x100   : > { %v1043_v61 = vpop.f32.mrb[2].mxu1  ;;  %472 = vst [vmem:[%s1023_s8 + $0x18] sm:$0xff] %v1041_v60  ;;  %v1049_v62 = vpop.f32.mrb[3].mxu0 }
 0x101   : > { %488 = vst [vmem:[%s1023_s8 + $0x98] sm:$0xff] %v1043_v61  ;;  %v1051_v63 = vpop.f32.mrb[3].mxu1  ;;  %471 = vst [vmem:[%s1023_s8 + $0x10] sm:$0xff] %v1049_v62 }
 0x102   : > { %487 = vst [vmem:[%s1023_s8 + $0x90] sm:$0xff] %v1051_v63 }
 0x103   : > { %v1057_v0 = vpop.f32.mrb[4].mxu0 }
 0x104   : > { %v1059_v1 = vpop.f32.mrb[4].mxu1  ;;  %474 = vst [vmem:[%s1023_s8 + $0x28] sm:$0xff] %v1057_v0  ;;  %v330_v2 = vpop.f32.mrb[5].mxu0 }
 0x105   : > { %490 = vst [vmem:[%s1023_s8 + $0xa8] sm:$0xff] %v1059_v1  ;;  %v1065_v3 = vpop.f32.mrb[5].mxu1  ;;  %473 = vst [vmem:[%s1023_s8 + $0x20] sm:$0xff] %v330_v2 }
 0x106   : > { %489 = vst [vmem:[%s1023_s8 + $0xa0] sm:$0xff] %v1065_v3 }
 0x107   : > { %v1070_v4 = vpop.f32.mrb[6].mxu0 }
 0x108   : > { %v1072_v5 = vpop.f32.mrb[6].mxu1  ;;  %476 = vst [vmem:[%s1023_s8 + $0x38] sm:$0xff] %v1070_v4  ;;  %v340_v6 = vpop.f32.mrb[7].mxu0 }
 0x109   : > { %492 = vst [vmem:[%s1023_s8 + $0xb8] sm:$0xff] %v1072_v5  ;;  %v1078_v7 = vpop.f32.mrb[7].mxu1  ;;  %475 = vst [vmem:[%s1023_s8 + $0x30] sm:$0xff] %v340_v6 }
 0x10a   : > { %491 = vst [vmem:[%s1023_s8 + $0xb0] sm:$0xff] %v1078_v7 }
 0x10b   : > { %v1083_v8 = vpop.f32.mrb[8].mxu0 }
 0x10c   : > { %v1085_v9 = vpop.f32.mrb[8].mxu1  ;;  %478 = vst [vmem:[%s1023_s8 + $0x48] sm:$0xff] %v1083_v8  ;;  %v350_v10 = vpop.f32.mrb[9].mxu0 }
 0x10d   : > { %494 = vst [vmem:[%s1023_s8 + $0xc8] sm:$0xff] %v1085_v9  ;;  %v1091_v11 = vpop.f32.mrb[9].mxu1  ;;  %477 = vst [vmem:[%s1023_s8 + $0x40] sm:$0xff] %v350_v10 }
 0x10e   : > { %493 = vst [vmem:[%s1023_s8 + $0xc0] sm:$0xff] %v1091_v11 }
 0x10f   : > { %v796_v12 = vpop.f32.mrb[10].mxu0 }
 0x110   : > { %v1096_v13 = vpop.f32.mrb[10].mxu1  ;;  %480 = vst [vmem:[%s1023_s8 + $0x58] sm:$0xff] %v796_v12  ;;  %v360_v14 = vpop.f32.mrb[11].mxu0 }
 0x111   : > { %496 = vst [vmem:[%s1023_s8 + $0xd8] sm:$0xff] %v1096_v13  ;;  %v1101_v15 = vpop.f32.mrb[11].mxu1  ;;  %479 = vst [vmem:[%s1023_s8 + $0x50] sm:$0xff] %v360_v14 }
 0x112   : > { %495 = vst [vmem:[%s1023_s8 + $0xd0] sm:$0xff] %v1101_v15 }
 0x113   : > { %v799_v16 = vpop.f32.mrb[12].mxu0 }
 0x114   : > { %v1106_v17 = vpop.f32.mrb[12].mxu1  ;;  %482 = vst [vmem:[%s1023_s8 + $0x68] sm:$0xff] %v799_v16  ;;  %v370_v18 = vpop.f32.mrb[13].mxu0  ;;  %504 = sbr.rel (%p696_p4) target bundleno = 283 (0x11b), region = 32 }
 0x115   : > { %498 = vst [vmem:[%s1023_s8 + $0xe8] sm:$0xff] %v1106_v17  ;;  %v1111_v19 = vpop.f32.mrb[13].mxu1  ;;  %481 = vst [vmem:[%s1023_s8 + $0x60] sm:$0xff] %v370_v18 }
 0x116   : > { %497 = vst [vmem:[%s1023_s8 + $0xe0] sm:$0xff] %v1111_v19 }
 0x117   : > { %v802_v20 = vpop.f32.mrb[14].mxu0 }
 0x118   : > { %v1116_v21 = vpop.f32.mrb[14].mxu1  ;;  %484 = vst [vmem:[%s1023_s8 + $0x78] sm:$0xff] %v802_v20  ;;  %v380_v22 = vpop.f32.mrb[15].mxu0 }
 0x119   : > { %500 = vst [vmem:[%s1023_s8 + $0xf8] sm:$0xff] %v1116_v21  ;;  %v1121_v23 = vpop.f32.mrb[15].mxu1  ;;  %483 = vst [vmem:[%s1023_s8 + $0x70] sm:$0xff] %v380_v22 }
 0x11a   : > { %499 = vst [vmem:[%s1023_s8 + $0xf0] sm:$0xff] %v1121_v23 }
 0x11b PF: > { %v508_v25 = vadd.f32 %v1025_v56, %v1033_v58  ;;  %v548_v28 = vmul.f32 %v1033_v58, %v1033_v58  ;;  %v549_v29 = vmul.f32 %v1025_v56, %v1025_v56  ;;  %v550_v31 = vmul.f32 %v1049_v62, %v1049_v62 }
 0x11c   : > { %v551_v33 = vmul.f32 %v1041_v60, %v1041_v60  ;;  %v552_v36 = vmul.f32 %v330_v2, %v330_v2  ;;  %v553_v39 = vmul.f32 %v1057_v0, %v1057_v0  ;;  %v554_v42 = vmul.f32 %v340_v6, %v340_v6 }
 0x11d   : > { %v509_v26 = vadd.f32 %v508_v25, %v1049_v62  ;;  %v580_v34 = vadd.f32 %v549_v29, %v548_v28  ;;  %v555_v45 = vmul.f32 %v1070_v4, %v1070_v4  ;;  %v556_v48 = vmul.f32 %v350_v10, %v350_v10 }
 0x11e   : > { %v557_v51 = vmul.f32 %v1083_v8, %v1083_v8  ;;  %v558_v54 = vmul.f32 %v360_v14, %v360_v14  ;;  %v559_v58 = vmul.f32 %v796_v12, %v796_v12  ;;  %v562_v25 = vmul.f32 %v380_v22, %v380_v22 }
 0x11f   : > { %v510_v27 = vadd.f32 %v1041_v60, %v509_v26  ;;  %v581_v37 = vadd.f32 %v580_v34, %v550_v31 }
 0x121   : > { %v511_v30 = vadd.f32 %v510_v27, %v330_v2  ;;  %v582_v40 = vadd.f32 %v581_v37, %v551_v33  ;;  %v567_v33 = vmul.f32 %v1043_v61, %v1043_v61  ;;  %v569_v37 = vmul.f32 %v1059_v1, %v1059_v1 }
 0x123   : > { %v512_v32 = vadd.f32 %v1057_v0, %v511_v30  ;;  %v583_v43 = vadd.f32 %v582_v40, %v552_v36  ;;  %v560_v0 = vmul.f32 %v370_v18, %v370_v18 }
 0x125   : > { %v513_v35 = vadd.f32 %v512_v32, %v340_v6  ;;  %v584_v46 = vadd.f32 %v583_v43, %v553_v39  ;;  %v570_v39 = vmul.f32 %v1078_v7, %v1078_v7  ;;  %v572_v43 = vmul.f32 %v1091_v11, %v1091_v11 }
 0x127   : > { %v514_v38 = vadd.f32 %v1070_v4, %v513_v35  ;;  %v585_v49 = vadd.f32 %v584_v46, %v554_v42  ;;  %v561_v4 = vmul.f32 %v799_v16, %v799_v16  ;;  %v568_v35 = vmul.f32 %v1065_v3, %v1065_v3 }
 0x129   : > { %v515_v41 = vadd.f32 %v514_v38, %v350_v10  ;;  %v586_v52 = vadd.f32 %v585_v49, %v555_v45  ;;  %v573_v45 = vmul.f32 %v1085_v9, %v1085_v9  ;;  %v575_v49 = vmul.f32 %v1096_v13, %v1096_v13 }
 0x12b   : > { %v516_v44 = vadd.f32 %v1083_v8, %v515_v41  ;;  %v587_v55 = vadd.f32 %v586_v52, %v556_v48  ;;  %v563_v8 = vmul.f32 %v802_v20, %v802_v20  ;;  %v571_v41 = vmul.f32 %v1072_v5, %v1072_v5 }
 0x12d   : > { %v517_v47 = vadd.f32 %v516_v44, %v360_v14  ;;  %v588_v60 = vadd.f32 %v587_v55, %v557_v51  ;;  %v576_v51 = vmul.f32 %v1111_v19, %v1111_v19  ;;  %v578_v55 = vmul.f32 %v1121_v23, %v1121_v23 }
 0x12f   : > { %v518_v50 = vadd.f32 %v796_v12, %v517_v47  ;;  %v589_v2 = vadd.f32 %v588_v60, %v558_v54  ;;  %v564_v12 = vmul.f32 %v1035_v59, %v1035_v59  ;;  %v574_v47 = vmul.f32 %v1101_v15, %v1101_v15 }
 0x131   : > { %v519_v53 = vadd.f32 %v518_v50, %v370_v18  ;;  %v590_v24 = vadd.f32 %v589_v2, %v559_v58 }
 0x133   : > { %v520_v56 = vadd.f32 %v799_v16, %v519_v53  ;;  %v591_v26 = vadd.f32 %v590_v24, %v560_v0  ;;  %v565_v16 = vmul.f32 %v1027_v57, %v1027_v57  ;;  %v577_v53 = vmul.f32 %v1106_v17, %v1106_v17 }
 0x135   : > { %v521_v62 = vadd.f32 %v520_v56, %v380_v22  ;;  %v592_v28 = vadd.f32 %v591_v26, %v561_v4  ;;  %v566_v22 = vmul.f32 %v1051_v63, %v1051_v63 }
 0x137   : > { %v522_v6 = vadd.f32 %v802_v20, %v521_v62  ;;  %v593_v29 = vadd.f32 %v592_v28, %v562_v25 }
 0x139   : > { %v523_v10 = vadd.f32 %v522_v6, %v1035_v59  ;;  %v594_v30 = vadd.f32 %v593_v29, %v563_v8 }
 0x13b   : > { %v524_v27 = vadd.f32 %v1027_v57, %v523_v10  ;;  %v595_v32 = vadd.f32 %v594_v30, %v564_v12 }
 0x13d   : > { %v525_v14 = vadd.f32 %v524_v27, %v1051_v63  ;;  %v596_v34 = vadd.f32 %v595_v32, %v565_v16  ;;  %v547_v27 = vld [vmem:[%s1222_s4] sm:$0x1] }
 0x13f   : > { %v526_v18 = vadd.f32 %v1043_v61, %v525_v14  ;;  %v597_v36 = vadd.f32 %v596_v34, %v566_v22 }
 0x141   : > { %v527_v31 = vadd.f32 %v526_v18, %v1065_v3  ;;  %v598_v38 = vadd.f32 %v597_v36, %v567_v33 }
 0x143   : > { %v528_v20 = vadd.f32 %v1059_v1, %v527_v31  ;;  %v599_v40 = vadd.f32 %v598_v38, %v568_v35 }
 0x145   : > { %v529_v59 = vadd.f32 %v528_v20, %v1078_v7  ;;  %v600_v42 = vadd.f32 %v599_v40, %v569_v37 }
 0x147   : > { %v530_v57 = vadd.f32 %v1072_v5, %v529_v59  ;;  %v601_v44 = vadd.f32 %v600_v42, %v570_v39 }
 0x149   : > { %v531_v63 = vadd.f32 %v530_v57, %v1091_v11  ;;  %v602_v46 = vadd.f32 %v601_v44, %v571_v41 }
 0x14b   : > { %v532_v61 = vadd.f32 %v1085_v9, %v531_v63  ;;  %v603_v48 = vadd.f32 %v602_v46, %v572_v43 }
 0x14d   : > { %v533_v3 = vadd.f32 %v532_v61, %v1101_v15  ;;  %v604_v50 = vadd.f32 %v603_v48, %v573_v45 }
 0x14f   : > { %v534_v1 = vadd.f32 %v1096_v13, %v533_v3  ;;  %v605_v52 = vadd.f32 %v604_v50, %v574_v47  ;;  %v579_v13 = vmul.f32 %v1116_v21, %v1116_v21 }
 0x151   : > { %v535_v7 = vadd.f32 %v534_v1, %v1111_v19  ;;  %v606_v54 = vadd.f32 %v605_v52, %v575_v49 }
 0x153   : > { %v536_v5 = vadd.f32 %v1106_v17, %v535_v7  ;;  %v607_v56 = vadd.f32 %v606_v54, %v576_v51  ;;  %v507_v17 = vld [vmem:[%s1221_s3] sm:$0x1] }
 0x155   : > { %v537_v11 = vadd.f32 %v536_v5, %v1121_v23  ;;  %v608_v60 = vadd.f32 %v607_v56, %v577_v53 }
 0x157   : > { %v538_v9 = vadd.f32 %v1116_v21, %v537_v11  ;;  %v609_v0 = vadd.f32 %v608_v60, %v578_v55 }
 0x159   : > { %v539_v15 = vrot.slane %v538_v9, 4  ;;  %v610_v2 = vadd.f32 %v609_v0, %v579_v13 }
 0x15b   : > { %v540_v58 = vadd.f32 %v539_v15, %v538_v9  ;;  %v611_v4 = vrot.slane %v610_v2, 4 }
 0x15d   : > { %v541_v62 = vrot.slane %v540_v58, 2  ;;  %v612_v10 = vadd.f32 %v611_v4, %v610_v2 }
 0x15f   : > { %v542_v19 = vadd.f32 %v541_v62, %v540_v58  ;;  %v613_v23 = vrot.slane %v612_v10, 2 }
 0x161   : > { %v543_v6 = vrot.slane %v542_v19, 1  ;;  %v614_v21 = vadd.f32 %v613_v23, %v612_v10 }
 0x163   : > { %v544_v24 = vadd.f32 %v543_v6, %v542_v19  ;;  %v615_v26 = vrot.slane %v614_v21, 1 }
 0x165   : > { %v545_v25 = vadd.f32 %v544_v24, %v507_v17  ;;  %v616_v8 = vadd.f32 %v615_v26, %v614_v21 }
 0x167   : > { %546 = vst [vmem:[%s1221_s3] sm:$0x1] %v545_v25  ;;  %v617_v28 = vadd.f32 %v616_v8, %v547_v27 }
 0x169   : > { %618 = vst [vmem:[%s1222_s4] sm:$0x1] %v617_v28 }
 0x16a PF: > { %s15_s15 = sadd.s32 1, %s890_s15  }
 0x16b   : > { %p12_p5 = scmp.ge.s32.totalorder %s15_s15, 4  }
 0x16d   :  { %14 = sbr.rel (!%p12_p5) target bundleno = 1 (0x1), region = 78 }

// kernel: bottleneck_forward.8
= control target key start
LH: loop header
LB: loop body
LE: loop exit
PB: predicated region body
PF: predicated region fallthrough
CT: control target
= control target key end

     0   :  { %s1094_s21 = smov 0   ;;  %s1468_s0 = inlined_call_operand.vmem [shape: f32[512,128], index: 0, kind: input, shape index: {}]   ;;  %s1469_s1 = inlined_call_operand.vmem [shape: f32[1,128], index: 1, kind: input, shape index: {}]   ;;  %s1470_s2 = inlined_call_operand.vmem [shape: f32[1,128], index: 2, kind: input, shape index: {}]   ;;  %s1471_s3 = inlined_call_operand.vmem [shape: f32[128,128], index: 3, kind: input, shape index: {}]   ;;  %s1472_s4 = inlined_call_operand.vmem [shape: f32[512,128], index: 4, kind: output, shape index: {0}]   ;;  %s1473_s5 = inlined_call_operand.vmem [shape: f32[1,128], index: 5, kind: output, shape index: {1}]   ;;  %s1474_s6 = inlined_call_operand.vmem [shape: f32[1,128], index: 6, kind: output, shape index: {2}]  }
   0x1 LB: > { %s851_s22 = sadd.s32 4294967295, %s1056_s21   ;;  %p855_p0 = scmp.ge.s32.totalorder %s1056_s21, 1  ;;  %s1056_s21 = sphi %s1094_s21, %s17_s21  }
   0x2   : > { %p208_p1 = scmp.lt.s32.totalorder %s1056_s21, 3 }
   0x4   : > { %p209_p2 = pnand %p855_p0, %p208_p1 }
   0x5   : > { %v392_v0 = vld [vmem:[%s1471_s3] sm:$0xff] (!%p209_p2)  ;;  %v393_v1 = vld [vmem:[%s1471_s3 + $0x8] sm:$0xff] (!%p209_p2)  ;;  %v394_v2 = vld [vmem:[%s1471_s3 + $0x10] sm:$0xff] (!%p209_p2)  ;;  %s856_s29 = sshll.u32 (!%p209_p2), %s851_s22, 5  ;;  %p862_p4 = scmp.ne.s32.totalorder (!%p209_p2), %s851_s22, 0 }
   0x6   : > { %212 = sbr.rel (%p209_p2) target bundleno = 361 (0x169), region = 36  ;;  %v993_v3 = vpack.c.bf16 (!%p209_p2), %v393_v1, %v392_v0  ;;  %v395_v4 = vld [vmem:[%s1471_s3 + $0x18] sm:$0xff] (!%p209_p2)  ;;  %p239_p3 = scmp.lt.s32.totalorder (!%p209_p2), %s856_s29, 63  ;;  %v396_v6 = vld [vmem:[%s1471_s3 + $0x20] sm:$0xff] (!%p209_p2)  ;;  %v397_v7 = vld [vmem:[%s1471_s3 + $0x28] sm:$0xff] (!%p209_p2) }
   0x7   : > { %v997_v5 = vpack.c.bf16 (!%p209_p2), %v395_v4, %v394_v2  ;;  %v1001_v8 = vpack.c.bf16 (!%p209_p2), %v397_v7, %v396_v6  ;;  %v1128_v9 = vld [vmem:[%s1469_s1] ss:$0 sm:$0xff] (!%p209_p2)  ;;  %v398_v10 = vld [vmem:[%s1471_s3 + $0x30] sm:$0xff] (!%p209_p2)  ;;  %v399_v11 = vld [vmem:[%s1471_s3 + $0x38] sm:$0xff] (!%p209_p2) }
   0x8   : > { %994 = vmatprep.subr.bf16.mxu0 (!%p209_p2), %v993_v3  ;;  %1025 = vmatprep.subr.bf16.mxu1 (!%p209_p2), %v993_v3  ;;  %v1147_v13 = vld [vmem:[%s1470_s2] ss:$0 sm:$0xff] (!%p209_p2)  ;;  %v1005_v17 = vpack.c.bf16 (!%p209_p2), %v399_v11, %v398_v10  ;;  %v401_v19 = vld [vmem:[%s1471_s3 + $0x48] sm:$0xff] (!%p209_p2)  ;;  %v402_v25 = vld [vmem:[%s1471_s3 + $0x50] sm:$0xff] (!%p209_p2) }
   0x9   : > { %996 = vmatpush3.bf16.msra.mxu0 (!%p209_p2), %v993_v3  ;;  %1033 = vmatpush3.bf16.msra.mxu1 (!%p209_p2), %v993_v3  ;;  %v400_v18 = vld [vmem:[%s1471_s3 + $0x40] sm:$0xff] (!%p209_p2)  ;;  %v403_v26 = vld [vmem:[%s1471_s3 + $0x58] sm:$0xff] (!%p209_p2)  ;;  %v405_v29 = vld [vmem:[%s1471_s3 + $0x68] sm:$0xff] (!%p209_p2) }
   0xa   : > { %998 = vmatprep.subr.bf16.mxu0 (!%p209_p2), %v997_v5  ;;  %1026 = vmatprep.subr.bf16.mxu1 (!%p209_p2), %v997_v5  ;;  %v1009_v24 = vpack.c.bf16 (!%p209_p2), %v401_v19, %v400_v18  ;;  %v1013_v27 = vpack.c.bf16 (!%p209_p2), %v403_v26, %v402_v25  ;;  %v404_v28 = vld [vmem:[%s1471_s3 + $0x60] sm:$0xff] (!%p209_p2)  ;;  %v406_v35 = vld [vmem:[%s1471_s3 + $0x70] sm:$0xff] (!%p209_p2)  ;;  %v407_v36 = vld [vmem:[%s1471_s3 + $0x78] sm:$0xff] (!%p209_p2) }
   0xb   : > { %v1017_v33 = vpack.c.bf16 (!%p209_p2), %v405_v29, %v404_v28  ;;  %v1021_v43 = vpack.c.bf16 (!%p209_p2), %v407_v36, %v406_v35 }
   0xd   : > { %s1476_s29 = smov (!%p239_p3, %s856_s29), 63  ;;  %1000 = vmatpush3.bf16.msra.mxu0 %v997_v5  ;;  %1034 = vmatpush3.bf16.msra.mxu1 %v997_v5 }
   0xe   : > { %s857_s12 = sshll.u32 %s1476_s29, 3  ;;  %1002 = vmatprep.subr.bf16.mxu0 %v1001_v8  ;;  %1027 = vmatprep.subr.bf16.mxu1 %v1001_v8 }
   0xf   : > { %s1141_s23 = scalar_lea.vmem %s1468_s0, %s857_s12  ;;  %s1273_s24 = scalar_lea.vmem %s1472_s4, %s857_s12 }
  0x10   : > { %v250_v12 = vld [vmem:[%s1141_s23] sm:$0xff]  ;;  %v251_v30 = vld [vmem:[%s1141_s23 + $0x8] sm:$0xff]  ;;  %v252_v32 = vld [vmem:[%s1141_s23 + $0x10] sm:$0xff] }
  0x11   : > { %v266_v14 = vld [vmem:[%s1141_s23 + $0x80] sm:$0xff]  ;;  %v289_v15 = vmul.f32 %v1128_v9, %v250_v12  ;;  %1004 = vmatpush3.bf16.msra.mxu0 %v1001_v8  ;;  %1035 = vmatpush3.bf16.msra.mxu1 %v1001_v8  ;;  %v267_v31 = vld [vmem:[%s1141_s23 + $0x88] sm:$0xff]  ;;  %v268_v34 = vld [vmem:[%s1141_s23 + $0x90] sm:$0xff]  ;;  %v290_v37 = vmul.f32 %v1128_v9, %v251_v30  ;;  %v291_v39 = vmul.f32 %v1128_v9, %v252_v32 }
  0x12   : > { %v305_v16 = vmul.f32 %v1128_v9, %v266_v14  ;;  %1006 = vmatprep.subr.bf16.mxu0 %v1005_v17  ;;  %1028 = vmatprep.subr.bf16.mxu1 %v1005_v17  ;;  %v306_v38 = vmul.f32 %v1128_v9, %v267_v31  ;;  %v253_v40 = vld [vmem:[%s1141_s23 + $0x18] sm:$0xff]  ;;  %v307_v41 = vmul.f32 %v1128_v9, %v268_v34  ;;  %v254_v44 = vld [vmem:[%s1141_s23 + $0x20] sm:$0xff]  ;;  %v255_v51 = vld [vmem:[%s1141_s23 + $0x28] sm:$0xff] }
  0x13   : > { %v328_v20 = vadd.f32 %v1147_v13, %v289_v15  ;;  %v269_v42 = vld [vmem:[%s1141_s23 + $0x98] sm:$0xff]  ;;  %v270_v45 = vld [vmem:[%s1141_s23 + $0xa0] sm:$0xff]  ;;  %v329_v46 = vadd.f32 %v1147_v13, %v290_v37  ;;  %v292_v47 = vmul.f32 %v1128_v9, %v253_v40  ;;  %v330_v49 = vadd.f32 %v1147_v13, %v291_v39  ;;  %v271_v52 = vld [vmem:[%s1141_s23 + $0xa8] sm:$0xff] }
  0x14   : > { %v344_v21 = vadd.f32 %v1147_v13, %v305_v16  ;;  %v345_v48 = vadd.f32 %v1147_v13, %v306_v38  ;;  %v308_v50 = vmul.f32 %v1128_v9, %v269_v42  ;;  %v346_v53 = vadd.f32 %v1147_v13, %v307_v41  ;;  %v256_v56 = vld [vmem:[%s1141_s23 + $0x30] sm:$0xff]  ;;  %v257_v2 = vld [vmem:[%s1141_s23 + $0x38] sm:$0xff]  ;;  %v258_v8 = vld [vmem:[%s1141_s23 + $0x40] sm:$0xff] }
  0x15   : > { %v360_v22 = vmax.f32 %v328_v20, 0.0  ;;  %1008 = vmatpush3.bf16.msra.mxu0 %v1005_v17  ;;  %1036 = vmatpush3.bf16.msra.mxu1 %v1005_v17  ;;  %v293_v54 = vmul.f32 %v1128_v9, %v254_v44  ;;  %v309_v55 = vmul.f32 %v1128_v9, %v270_v45  ;;  %v272_v57 = vld [vmem:[%s1141_s23 + $0xb0] sm:$0xff]  ;;  %v361_v58 = vmax.f32 %v329_v46, 0.0  ;;  %v273_v7 = vld [vmem:[%s1141_s23 + $0xb8] sm:$0xff]  ;;  %v274_v10 = vld [vmem:[%s1141_s23 + $0xc0] sm:$0xff] }
  0x16   : > { %v376_v23 = vmax.f32 %v344_v21, 0.0  ;;  %1010 = vmatprep.subr.bf16.mxu0 %v1009_v24  ;;  %1029 = vmatprep.subr.bf16.mxu1 %v1009_v24  ;;  %v331_v59 = vadd.f32 %v1147_v13, %v292_v47  ;;  %v294_v60 = vmul.f32 %v1128_v9, %v255_v51  ;;  %v310_v61 = vmul.f32 %v1128_v9, %v271_v52  ;;  %v259_v20 = vld [vmem:[%s1141_s23 + $0x48] sm:$0xff]  ;;  %v260_v26 = vld [vmem:[%s1141_s23 + $0x50] sm:$0xff]  ;;  %v261_v36 = vld [vmem:[%s1141_s23 + $0x58] sm:$0xff] }
  0x17   : > { %945 = vmatprep.mubr.f32.mxu0 %v360_v22  ;;  %v377_v62 = vmax.f32 %v345_v48, 0.0  ;;  %v347_v63 = vadd.f32 %v1147_v13, %v308_v50  ;;  %v295_v0 = vmul.f32 %v1128_v9, %v256_v56  ;;  %v311_v1 = vmul.f32 %v1128_v9, %v272_v57  ;;  %v275_v21 = vld [vmem:[%s1141_s23 + $0xc8] sm:$0xff]  ;;  %v277_v41 = vld [vmem:[%s1141_s23 + $0xd8] sm:$0xff]  ;;  %v262_v42 = vld [vmem:[%s1141_s23 + $0x60] sm:$0xff] }
  0x18   : > { %969 = vmatprep.mubr.f32.mxu1 %v376_v23  ;;  %v362_v3 = vmax.f32 %v330_v49, 0.0  ;;  %v378_v4 = vmax.f32 %v346_v53, 0.0  ;;  %v332_v5 = vadd.f32 %v1147_v13, %v293_v54  ;;  %v348_v6 = vadd.f32 %v1147_v13, %v309_v55  ;;  %v263_v52 = vld [vmem:[%s1141_s23 + $0x68] sm:$0xff] }
  0x19   : > { %1012 = vmatpush3.bf16.msra.mxu0 %v1009_v24  ;;  %1037 = vmatpush3.bf16.msra.mxu1 %v1009_v24  ;;  %v363_v11 = vmax.f32 %v331_v59, 0.0  ;;  %v333_v12 = vadd.f32 %v1147_v13, %v294_v60  ;;  %v349_v14 = vadd.f32 %v1147_v13, %v310_v61  ;;  %v296_v15 = vmul.f32 %v1128_v9, %v257_v2  ;;  %v279_v57 = vld [vmem:[%s1141_s23 + $0xe8] sm:$0xff]  ;;  %v280_v59 = vld [vmem:[%s1141_s23 + $0xf0] sm:$0xff] }
  0x1a   : > { %1014 = vmatprep.subr.bf16.mxu0 %v1013_v27  ;;  %1030 = vmatprep.subr.bf16.mxu1 %v1013_v27  ;;  %v379_v16 = vmax.f32 %v347_v63, 0.0  ;;  %v334_v17 = vadd.f32 %v1147_v13, %v295_v0  ;;  %v350_v18 = vadd.f32 %v1147_v13, %v311_v1  ;;  %v312_v19 = vmul.f32 %v1128_v9, %v273_v7 }
  0x1b   : > { %v364_v22 = vmax.f32 %v332_v5, 0.0  ;;  %v380_v23 = vmax.f32 %v348_v6, 0.0  ;;  %v297_v24 = vmul.f32 %v1128_v9, %v258_v8  ;;  %v313_v25 = vmul.f32 %v1128_v9, %v274_v10  ;;  %v265_v8 = vld [vmem:[%s1141_s23 + $0x78] sm:$0xff] }
  0x1c   : > { %v365_v28 = vmax.f32 %v333_v12, 0.0  ;;  %v335_v29 = vadd.f32 %v1147_v13, %v296_v15  ;;  %v298_v30 = vmul.f32 %v1128_v9, %v259_v20  ;;  %v314_v31 = vmul.f32 %v1128_v9, %v275_v21  ;;  %v281_v10 = vld [vmem:[%s1141_s23 + $0xf8] sm:$0xff] }
  0x1d   : > { %1016 = vmatpush3.bf16.msra.mxu0 %v1013_v27  ;;  %1038 = vmatpush3.bf16.msra.mxu1 %v1013_v27  ;;  %v276_v27 = vld [vmem:[%s1141_s23 + $0xd0] sm:$0xff]  ;;  %v381_v32 = vmax.f32 %v349_v14, 0.0  ;;  %v351_v34 = vadd.f32 %v1147_v13, %v312_v19  ;;  %v299_v35 = vmul.f32 %v1128_v9, %v260_v26  ;;  %v382_v37 = vmax.f32 %v350_v18, 0.0 }
  0x1e   : > { %1018 = vmatprep.subr.bf16.mxu0 %v1017_v33  ;;  %1031 = vmatprep.subr.bf16.mxu1 %v1017_v33  ;;  %v336_v38 = vadd.f32 %v1147_v13, %v297_v24  ;;  %v352_v39 = vadd.f32 %v1147_v13, %v313_v25  ;;  %v315_v40 = vmul.f32 %v1128_v9, %v276_v27  ;;  %v367_v44 = vmax.f32 %v335_v29, 0.0 }
  0x1f   : > { %v337_v45 = vadd.f32 %v1147_v13, %v298_v30  ;;  %v353_v46 = vadd.f32 %v1147_v13, %v314_v31  ;;  %v300_v47 = vmul.f32 %v1128_v9, %v261_v36  ;;  %v383_v48 = vmax.f32 %v351_v34, 0.0 }
  0x20   : > { %v338_v49 = vadd.f32 %v1147_v13, %v299_v35  ;;  %v316_v50 = vmul.f32 %v1128_v9, %v277_v41  ;;  %v301_v51 = vmul.f32 %v1128_v9, %v262_v42  ;;  %v368_v53 = vmax.f32 %v336_v38, 0.0 }
  0x21   : > { %1020 = vmatpush3.bf16.msra.mxu0 %v1017_v33  ;;  %1039 = vmatpush3.bf16.msra.mxu1 %v1017_v33  ;;  %v366_v33 = vmax.f32 %v334_v17, 0.0  ;;  %v384_v54 = vmax.f32 %v352_v39, 0.0  ;;  %v354_v55 = vadd.f32 %v1147_v13, %v315_v40  ;;  %v369_v60 = vmax.f32 %v337_v45, 0.0 }
  0x22   : > { %1022 = vmatprep.subr.bf16.mxu0 %v1021_v43  ;;  %1032 = vmatprep.subr.bf16.mxu1 %v1021_v43  ;;  %v385_v61 = vmax.f32 %v353_v46, 0.0  ;;  %v302_v63 = vmul.f32 %v1128_v9, %v263_v52  ;;  %v370_v0 = vmax.f32 %v338_v49, 0.0  ;;  %v355_v1 = vadd.f32 %v1147_v13, %v316_v50 }
  0x23   : > { %v340_v2 = vadd.f32 %v1147_v13, %v301_v51  ;;  %v319_v7 = vmul.f32 %v1128_v9, %v280_v59  ;;  %v320_v17 = vmul.f32 %v1128_v9, %v281_v10 }
  0x24   : > { %v341_v12 = vadd.f32 %v1147_v13, %v302_v63  ;;  %v387_v14 = vmax.f32 %v355_v1, 0.0 }
  0x25   : > { %1024 = vmatpush3.bf16.msra.mxu0 %v1021_v43  ;;  %1040 = vmatpush3.bf16.msra.mxu1 %v1021_v43  ;;  %v278_v43 = vld [vmem:[%s1141_s23 + $0xe0] sm:$0xff]  ;;  %v372_v18 = vmax.f32 %v340_v2, 0.0  ;;  %v358_v21 = vadd.f32 %v1147_v13, %v319_v7  ;;  %v359_v25 = vadd.f32 %v1147_v13, %v320_v17 }
  0x26   : > { %v317_v56 = vmul.f32 %v1128_v9, %v278_v43 }
  0x27   : > { %v390_v26 = vmax.f32 %v358_v21, 0.0 }
  0x28   : > { %946 = vmatmul.mubr.f32.vlgmr.msra.gmra.mrb[0].mxu0 %v361_v58  ;;  %970 = vmatmul.mubr.f32.vlgmr.msra.gmra.mrb[0].mxu1 %v377_v62  ;;  %v264_v58 = vld [vmem:[%s1141_s23 + $0x70] sm:$0xff]  ;;  %v339_v62 = vadd.f32 %v1147_v13, %v300_v47  ;;  %v356_v5 = vadd.f32 %v1147_v13, %v317_v56 }
  0x29   : > { %948 = vmatprep.mubr.f32.mxu0 %v362_v3  ;;  %972 = vmatprep.mubr.f32.mxu1 %v378_v4  ;;  %v318_v3 = vmul.f32 %v1128_v9, %v279_v57  ;;  %v386_v4 = vmax.f32 %v354_v55, 0.0  ;;  %v303_v6 = vmul.f32 %v1128_v9, %v264_v58 }
  0x2a   : > { %v388_v19 = vmax.f32 %v356_v5, 0.0 }
  0x2b   : > { %v357_v15 = vadd.f32 %v1147_v13, %v318_v3  ;;  %v342_v20 = vadd.f32 %v1147_v13, %v303_v6 }
  0x2c   : > { %949 = vmatmul.mubr.f32.gmra.mrb[2].mxu0 %v363_v11  ;;  %973 = vmatmul.mubr.f32.gmra.mrb[2].mxu1 %v379_v16  ;;  %v371_v11 = vmax.f32 %v339_v62, 0.0  ;;  %v304_v16 = vmul.f32 %v1128_v9, %v265_v8 }
  0x2d   : > { %951 = vmatprep.mubr.f32.mxu0 %v364_v22  ;;  %975 = vmatprep.mubr.f32.mxu1 %v380_v23  ;;  %v373_v22 = vmax.f32 %v341_v12, 0.0  ;;  %v389_v23 = vmax.f32 %v357_v15, 0.0  ;;  %v374_v9 = vmax.f32 %v342_v20, 0.0 }
  0x2e   : > { %v343_v24 = vadd.f32 %v1147_v13, %v304_v16 }
  0x30   : > { %952 = vmatmul.mubr.f32.gmra.mrb[4].mxu0 %v365_v28  ;;  %976 = vmatmul.mubr.f32.gmra.mrb[4].mxu1 %v381_v32  ;;  %v375_v27 = vmax.f32 %v343_v24, 0.0  ;;  %v391_v28 = vmax.f32 %v359_v25, 0.0 }
  0x31   : > { %954 = vmatprep.mubr.f32.mxu0 %v366_v33  ;;  %978 = vmatprep.mubr.f32.mxu1 %v382_v37 }
  0x34   : > { %955 = vmatmul.mubr.f32.gmra.mrb[6].mxu0 %v367_v44  ;;  %979 = vmatmul.mubr.f32.gmra.mrb[6].mxu1 %v383_v48 }
  0x35   : > { %957 = vmatprep.mubr.f32.mxu0 %v368_v53  ;;  %981 = vmatprep.mubr.f32.mxu1 %v384_v54 }
  0x38   : > { %958 = vmatmul.mubr.f32.gmra.mrb[8].mxu0 %v369_v60  ;;  %982 = vmatmul.mubr.f32.gmra.mrb[8].mxu1 %v385_v61  ;;  %v1058_v60 = vmov (!%p862_p4), 0.0  }
  0x39   : > { %960 = vmatprep.mubr.f32.mxu0 %v370_v0  ;;  %984 = vmatprep.mubr.f32.mxu1 %v386_v4  ;;  %669 = vst [vmem:[%s1473_s5] sm:$0x1] (!%p862_p4), %v1058_v60  ;;  %670 = vst [vmem:[%s1474_s6] sm:$0x1] (!%p862_p4), %v1058_v60 }
  0x3c   : > { %961 = vmatmul.mubr.f32.gmra.mrb[10].mxu0 %v371_v11  ;;  %985 = vmatmul.mubr.f32.gmra.mrb[10].mxu1 %v387_v14 }
  0x3d   : > { %963 = vmatprep.mubr.f32.mxu0 %v372_v18  ;;  %987 = vmatprep.mubr.f32.mxu1 %v388_v19 }
  0x40   : > { %964 = vmatmul.mubr.f32.gmra.mrb[12].mxu0 %v373_v22  ;;  %988 = vmatmul.mubr.f32.gmra.mrb[12].mxu1 %v389_v23 }
  0x41   : > { %966 = vmatprep.mubr.f32.mxu0 %v374_v9  ;;  %990 = vmatprep.mubr.f32.mxu1 %v390_v26 }
  0x44   : > { %967 = vmatmul.mubr.f32.gmra.mrb[14].mxu0 %v375_v27  ;;  %991 = vmatmul.mubr.f32.gmra.mrb[14].mxu1 %v391_v28 }
  0xfb   : > { %v1275_v13 = vpop.f32.mrb[0].mxu0  ;;  %v1277_v29 = vpop.f32.mrb[0].mxu1 }
  0xfc   : > { %634 = vst [vmem:[%s1273_s24 + $0x8] sm:$0xff] %v1275_v13  ;;  %650 = vst [vmem:[%s1273_s24 + $0x88] sm:$0xff] %v1277_v29  ;;  %v1283_v30 = vpop.f32.mrb[1].mxu0  ;;  %v1285_v31 = vpop.f32.mrb[1].mxu1 }
  0xfd   : > { %633 = vst [vmem:[%s1273_s24] sm:$0xff] %v1283_v30  ;;  %649 = vst [vmem:[%s1273_s24 + $0x80] sm:$0xff] %v1285_v31 }
  0xff   : > { %v1291_v32 = vpop.f32.mrb[2].mxu0  ;;  %v1293_v33 = vpop.f32.mrb[2].mxu1 }
 0x100   : > { %636 = vst [vmem:[%s1273_s24 + $0x18] sm:$0xff] %v1291_v32  ;;  %652 = vst [vmem:[%s1273_s24 + $0x98] sm:$0xff] %v1293_v33  ;;  %v1299_v34 = vpop.f32.mrb[3].mxu0  ;;  %v1301_v35 = vpop.f32.mrb[3].mxu1 }
 0x101   : > { %635 = vst [vmem:[%s1273_s24 + $0x10] sm:$0xff] %v1299_v34  ;;  %651 = vst [vmem:[%s1273_s24 + $0x90] sm:$0xff] %v1301_v35 }
 0x103   : > { %v1307_v36 = vpop.f32.mrb[4].mxu0  ;;  %v1309_v37 = vpop.f32.mrb[4].mxu1 }
 0x104   : > { %638 = vst [vmem:[%s1273_s24 + $0x28] sm:$0xff] %v1307_v36  ;;  %654 = vst [vmem:[%s1273_s24 + $0xa8] sm:$0xff] %v1309_v37  ;;  %v494_v38 = vpop.f32.mrb[5].mxu0  ;;  %v1315_v39 = vpop.f32.mrb[5].mxu1 }
 0x105   : > { %637 = vst [vmem:[%s1273_s24 + $0x20] sm:$0xff] %v494_v38  ;;  %653 = vst [vmem:[%s1273_s24 + $0xa0] sm:$0xff] %v1315_v39 }
 0x107   : > { %v1320_v40 = vpop.f32.mrb[6].mxu0  ;;  %v1322_v41 = vpop.f32.mrb[6].mxu1 }
 0x108   : > { %640 = vst [vmem:[%s1273_s24 + $0x38] sm:$0xff] %v1320_v40  ;;  %656 = vst [vmem:[%s1273_s24 + $0xb8] sm:$0xff] %v1322_v41  ;;  %v504_v42 = vpop.f32.mrb[7].mxu0  ;;  %v1328_v43 = vpop.f32.mrb[7].mxu1 }
 0x109   : > { %639 = vst [vmem:[%s1273_s24 + $0x30] sm:$0xff] %v504_v42  ;;  %655 = vst [vmem:[%s1273_s24 + $0xb0] sm:$0xff] %v1328_v43 }
 0x10b   : > { %v1333_v44 = vpop.f32.mrb[8].mxu0  ;;  %v1335_v45 = vpop.f32.mrb[8].mxu1 }
 0x10c   : > { %642 = vst [vmem:[%s1273_s24 + $0x48] sm:$0xff] %v1333_v44  ;;  %658 = vst [vmem:[%s1273_s24 + $0xc8] sm:$0xff] %v1335_v45  ;;  %v514_v46 = vpop.f32.mrb[9].mxu0  ;;  %v1341_v47 = vpop.f32.mrb[9].mxu1 }
 0x10d   : > { %641 = vst [vmem:[%s1273_s24 + $0x40] sm:$0xff] %v514_v46  ;;  %657 = vst [vmem:[%s1273_s24 + $0xc0] sm:$0xff] %v1341_v47 }
 0x10f   : > { %v962_v48 = vpop.f32.mrb[10].mxu0  ;;  %v1346_v49 = vpop.f32.mrb[10].mxu1 }
 0x110   : > { %644 = vst [vmem:[%s1273_s24 + $0x58] sm:$0xff] %v962_v48  ;;  %660 = vst [vmem:[%s1273_s24 + $0xd8] sm:$0xff] %v1346_v49  ;;  %v524_v50 = vpop.f32.mrb[11].mxu0  ;;  %v1351_v51 = vpop.f32.mrb[11].mxu1 }
 0x111   : > { %643 = vst [vmem:[%s1273_s24 + $0x50] sm:$0xff] %v524_v50  ;;  %659 = vst [vmem:[%s1273_s24 + $0xd0] sm:$0xff] %v1351_v51 }
 0x113   : > { %v965_v52 = vpop.f32.mrb[12].mxu0  ;;  %v1356_v53 = vpop.f32.mrb[12].mxu1  ;;  %668 = sbr.rel (%p862_p4) target bundleno = 282 (0x11a), region = 40 }
 0x114   : > { %646 = vst [vmem:[%s1273_s24 + $0x68] sm:$0xff] %v965_v52  ;;  %662 = vst [vmem:[%s1273_s24 + $0xe8] sm:$0xff] %v1356_v53  ;;  %v534_v54 = vpop.f32.mrb[13].mxu0  ;;  %v1361_v55 = vpop.f32.mrb[13].mxu1 }
 0x115   : > { %645 = vst [vmem:[%s1273_s24 + $0x60] sm:$0xff] %v534_v54  ;;  %661 = vst [vmem:[%s1273_s24 + $0xe0] sm:$0xff] %v1361_v55 }
 0x117   : > { %v968_v56 = vpop.f32.mrb[14].mxu0  ;;  %v1366_v57 = vpop.f32.mrb[14].mxu1 }
 0x118   : > { %648 = vst [vmem:[%s1273_s24 + $0x78] sm:$0xff] %v968_v56  ;;  %664 = vst [vmem:[%s1273_s24 + $0xf8] sm:$0xff] %v1366_v57  ;;  %v544_v58 = vpop.f32.mrb[15].mxu0  ;;  %v1371_v59 = vpop.f32.mrb[15].mxu1 }
 0x119   : > { %647 = vst [vmem:[%s1273_s24 + $0x70] sm:$0xff] %v544_v58  ;;  %663 = vst [vmem:[%s1273_s24 + $0xf0] sm:$0xff] %v1371_v59 }
 0x11a PF: > { %v672_v61 = vadd.f32 %v1275_v13, %v1283_v30  ;;  %v712_v0 = vmul.f32 %v1283_v30, %v1283_v30  ;;  %v713_v1 = vmul.f32 %v1275_v13, %v1275_v13  ;;  %v714_v3 = vmul.f32 %v1299_v34, %v1299_v34 }
 0x11b   : > { %v715_v5 = vmul.f32 %v1291_v32, %v1291_v32  ;;  %v716_v8 = vmul.f32 %v494_v38, %v494_v38  ;;  %v717_v12 = vmul.f32 %v1307_v36, %v1307_v36  ;;  %v718_v16 = vmul.f32 %v504_v42, %v504_v42 }
 0x11c   : > { %v673_v62 = vadd.f32 %v672_v61, %v1299_v34  ;;  %v744_v6 = vadd.f32 %v713_v1, %v712_v0  ;;  %v719_v19 = vmul.f32 %v1320_v40, %v1320_v40  ;;  %v720_v22 = vmul.f32 %v514_v46, %v514_v46 }
 0x11d   : > { %v721_v25 = vmul.f32 %v1333_v44, %v1333_v44  ;;  %v722_v27 = vmul.f32 %v524_v50, %v524_v50  ;;  %v723_v30 = vmul.f32 %v962_v48, %v962_v48  ;;  %v726_v61 = vmul.f32 %v544_v58, %v544_v58 }
 0x11e   : > { %v674_v63 = vadd.f32 %v1291_v32, %v673_v62  ;;  %v745_v10 = vadd.f32 %v744_v6, %v714_v3 }
 0x120   : > { %v675_v2 = vadd.f32 %v674_v63, %v494_v38  ;;  %v746_v14 = vadd.f32 %v745_v10, %v715_v5  ;;  %v731_v5 = vmul.f32 %v1293_v33, %v1293_v33  ;;  %v733_v10 = vmul.f32 %v1309_v37, %v1309_v37 }
 0x122   : > { %v676_v4 = vadd.f32 %v1307_v36, %v675_v2  ;;  %v747_v17 = vadd.f32 %v746_v14, %v716_v8  ;;  %v724_v36 = vmul.f32 %v534_v54, %v534_v54 }
 0x124   : > { %v677_v7 = vadd.f32 %v676_v4, %v504_v42  ;;  %v748_v20 = vadd.f32 %v747_v17, %v717_v12  ;;  %v734_v12 = vmul.f32 %v1328_v43, %v1328_v43  ;;  %v736_v17 = vmul.f32 %v1341_v47, %v1341_v47 }
 0x126   : > { %v678_v11 = vadd.f32 %v1320_v40, %v677_v7  ;;  %v749_v23 = vadd.f32 %v748_v20, %v718_v16  ;;  %v725_v40 = vmul.f32 %v965_v52, %v965_v52  ;;  %v732_v7 = vmul.f32 %v1315_v39, %v1315_v39 }
 0x128   : > { %v679_v15 = vadd.f32 %v678_v11, %v514_v46  ;;  %v750_v9 = vadd.f32 %v749_v23, %v719_v19  ;;  %v737_v19 = vmul.f32 %v1335_v45, %v1335_v45  ;;  %v739_v23 = vmul.f32 %v1346_v49, %v1346_v49 }
 0x12a   : > { %v680_v18 = vadd.f32 %v1333_v44, %v679_v15  ;;  %v751_v28 = vadd.f32 %v750_v9, %v720_v22  ;;  %v727_v44 = vmul.f32 %v968_v56, %v968_v56  ;;  %v735_v15 = vmul.f32 %v1322_v41, %v1322_v41 }
 0x12c   : > { %v681_v21 = vadd.f32 %v680_v18, %v524_v50  ;;  %v752_v32 = vadd.f32 %v751_v28, %v721_v25  ;;  %v740_v25 = vmul.f32 %v1361_v55, %v1361_v55  ;;  %v742_v28 = vmul.f32 %v1371_v59, %v1371_v59 }
 0x12e   : > { %v682_v24 = vadd.f32 %v962_v48, %v681_v21  ;;  %v753_v38 = vadd.f32 %v752_v32, %v722_v27  ;;  %v728_v48 = vmul.f32 %v1285_v31, %v1285_v31  ;;  %v738_v21 = vmul.f32 %v1351_v51, %v1351_v51 }
 0x130   : > { %v683_v26 = vadd.f32 %v682_v24, %v534_v54  ;;  %v754_v60 = vadd.f32 %v753_v38, %v723_v30 }
 0x132   : > { %v684_v13 = vadd.f32 %v965_v52, %v683_v26  ;;  %v755_v62 = vadd.f32 %v754_v60, %v724_v36  ;;  %v729_v52 = vmul.f32 %v1277_v29, %v1277_v29  ;;  %v741_v26 = vmul.f32 %v1356_v53, %v1356_v53 }
 0x134   : > { %v685_v34 = vadd.f32 %v684_v13, %v544_v58  ;;  %v756_v0 = vadd.f32 %v755_v62, %v725_v40  ;;  %v730_v58 = vmul.f32 %v1301_v35, %v1301_v35 }
 0x136   : > { %v686_v42 = vadd.f32 %v968_v56, %v685_v34  ;;  %v757_v1 = vadd.f32 %v756_v0, %v726_v61 }
 0x138   : > { %v687_v46 = vadd.f32 %v686_v42, %v1285_v31  ;;  %v758_v2 = vadd.f32 %v757_v1, %v727_v44 }
 0x13a   : > { %v688_v63 = vadd.f32 %v1277_v29, %v687_v46  ;;  %v759_v4 = vadd.f32 %v758_v2, %v728_v48 }
 0x13c   : > { %v689_v50 = vadd.f32 %v688_v63, %v1301_v35  ;;  %v760_v6 = vadd.f32 %v759_v4, %v729_v52  ;;  %v711_v63 = vld [vmem:[%s1474_s6] sm:$0x1] }
 0x13e   : > { %v690_v54 = vadd.f32 %v1293_v33, %v689_v50  ;;  %v761_v8 = vadd.f32 %v760_v6, %v730_v58 }
 0x140   : > { %v691_v3 = vadd.f32 %v690_v54, %v1315_v39  ;;  %v762_v11 = vadd.f32 %v761_v8, %v731_v5 }
 0x142   : > { %v692_v56 = vadd.f32 %v1309_v37, %v691_v3  ;;  %v763_v14 = vadd.f32 %v762_v11, %v732_v7 }
 0x144   : > { %v693_v31 = vadd.f32 %v692_v56, %v1328_v43  ;;  %v764_v16 = vadd.f32 %v763_v14, %v733_v10 }
 0x146   : > { %v694_v29 = vadd.f32 %v1322_v41, %v693_v31  ;;  %v765_v18 = vadd.f32 %v764_v16, %v734_v12 }
 0x148   : > { %v695_v35 = vadd.f32 %v694_v29, %v1341_v47  ;;  %v766_v20 = vadd.f32 %v765_v18, %v735_v15 }
 0x14a   : > { %v696_v33 = vadd.f32 %v1335_v45, %v695_v35  ;;  %v767_v22 = vadd.f32 %v766_v20, %v736_v17 }
 0x14c   : > { %v697_v39 = vadd.f32 %v696_v33, %v1351_v51  ;;  %v768_v24 = vadd.f32 %v767_v22, %v737_v19 }
 0x14e   : > { %v698_v37 = vadd.f32 %v1346_v49, %v697_v39  ;;  %v769_v9 = vadd.f32 %v768_v24, %v738_v21  ;;  %v743_v49 = vmul.f32 %v1366_v57, %v1366_v57 }
 0x150   : > { %v699_v43 = vadd.f32 %v698_v37, %v1361_v55  ;;  %v770_v27 = vadd.f32 %v769_v9, %v739_v23 }
 0x152   : > { %v700_v41 = vadd.f32 %v1356_v53, %v699_v43  ;;  %v771_v13 = vadd.f32 %v770_v27, %v740_v25  ;;  %v671_v53 = vld [vmem:[%s1473_s5] sm:$0x1] }
 0x154   : > { %v701_v47 = vadd.f32 %v700_v41, %v1371_v59  ;;  %v772_v32 = vadd.f32 %v771_v13, %v741_v26 }
 0x156   : > { %v702_v45 = vadd.f32 %v1366_v57, %v701_v47  ;;  %v773_v36 = vadd.f32 %v772_v32, %v742_v28 }
 0x158   : > { %v703_v51 = vrot.slane %v702_v45, 4  ;;  %v774_v38 = vadd.f32 %v773_v36, %v743_v49 }
 0x15a   : > { %v704_v30 = vadd.f32 %v703_v51, %v702_v45  ;;  %v775_v40 = vrot.slane %v774_v38, 4 }
 0x15c   : > { %v705_v34 = vrot.slane %v704_v30, 2  ;;  %v776_v46 = vadd.f32 %v775_v40, %v774_v38 }
 0x15e   : > { %v706_v55 = vadd.f32 %v705_v34, %v704_v30  ;;  %v777_v59 = vrot.slane %v776_v46, 2 }
 0x160   : > { %v707_v42 = vrot.slane %v706_v55, 1  ;;  %v778_v57 = vadd.f32 %v777_v59, %v776_v46 }
 0x162   : > { %v708_v60 = vadd.f32 %v707_v42, %v706_v55  ;;  %v779_v62 = vrot.slane %v778_v57, 1 }
 0x164   : > { %v709_v61 = vadd.f32 %v708_v60, %v671_v53  ;;  %v780_v44 = vadd.f32 %v779_v62, %v778_v57 }
 0x166   : > { %710 = vst [vmem:[%s1473_s5] sm:$0x1] %v709_v61  ;;  %v781_v0 = vadd.f32 %v780_v44, %v711_v63 }
 0x168   : > { %782 = vst [vmem:[%s1474_s6] sm:$0x1] %v781_v0 }
 0x169 PF: > { %s17_s21 = sadd.s32 1, %s1056_s21  }
 0x16a   : > { %p14_p5 = scmp.ge.s32.totalorder %s17_s21, 4  }
 0x16c   :  { %16 = sbr.rel (!%p14_p5) target bundleno = 1 (0x1), region = 86 }

// kernel: bottleneck_forward.9
= control target key start
LH: loop header
LB: loop body
LE: loop exit
PB: predicated region body
PF: predicated region fallthrough
CT: control target
= control target key end

     0   :  { %s585_s15 = smov 0   ;;  %s786_s0 = inlined_call_operand.vmem [shape: f32[512,128], index: 0, kind: input, shape index: {}]   ;;  %s787_s1 = inlined_call_operand.vmem [shape: f32[1,128], index: 1, kind: input, shape index: {}]   ;;  %s788_s2 = inlined_call_operand.vmem [shape: f32[1,128], index: 2, kind: input, shape index: {}]   ;;  %s789_s3 = inlined_call_operand.vmem [shape: f32[512,128], index: 3, kind: input, shape index: {}]   ;;  %s790_s4 = inlined_call_operand.vmem [shape: f32[512,128], index: 4, kind: output, shape index: {}]  }
   0x1 LB: > { %s529_s16 = sadd.s32 4294967295, %s558_s15   ;;  %p533_p0 = scmp.ge.s32.totalorder %s558_s15, 1  ;;  %s558_s15 = sphi %s585_s15, %s14_s15  }
   0x2   : > { %p174_p1 = scmp.lt.s32.totalorder %s558_s15, 3 }
   0x4   : > { %p175_p2 = pnand %p533_p0, %p174_p1 }
   0x5   : > { %s534_s17 = sshll.u32 (!%p175_p2), %s529_s16, 5  ;;  %v598_v0 = vld [vmem:[%s787_s1] ss:$0 sm:$0xff] (!%p175_p2) }
   0x6   : > { %178 = sbr.rel (%p175_p2) target bundleno = 55 (0x37), region = 36  ;;  %p206_p3 = scmp.lt.s32.totalorder (!%p175_p2), %s534_s17, 63  ;;  %v616_v2 = vld [vmem:[%s788_s2] ss:$0 sm:$0xff] (!%p175_p2) }
   0xd   : > { %s792_s17 = smov (!%p206_p3, %s534_s17), 63 }
   0xe   : > { %s593_s18 = sshll.u32 %s792_s17, 3 }
   0xf   : > { %s604_s23 = scalar_lea.vmem %s786_s0, %s593_s18  ;;  %s610_s26 = scalar_lea.vmem %s789_s3, %s593_s18 }
  0x10   : > { %v223_v1 = vld [vmem:[%s604_s23] sm:$0xff]  ;;  %v224_v3 = vld [vmem:[%s604_s23 + $0x8] sm:$0xff]  ;;  %v225_v7 = vld [vmem:[%s604_s23 + $0x10] sm:$0xff]  ;;  %s646_s5 = scalar_lea.vmem %s790_s4, %s593_s18 }
  0x11   : > { %v262_v4 = vmul.f32 %v598_v0, %v223_v1  ;;  %v333_v5 = vld [vmem:[%s610_s26] sm:$0xff]  ;;  %v263_v6 = vmul.f32 %v598_v0, %v224_v3  ;;  %v334_v8 = vld [vmem:[%s610_s26 + $0x8] sm:$0xff]  ;;  %v264_v9 = vmul.f32 %v598_v0, %v225_v7  ;;  %v226_v10 = vld [vmem:[%s604_s23 + $0x18] sm:$0xff] }
  0x12   : > { %v227_v11 = vld [vmem:[%s604_s23 + $0x20] sm:$0xff]  ;;  %v335_v14 = vld [vmem:[%s610_s26 + $0x10] sm:$0xff]  ;;  %v265_v15 = vmul.f32 %v598_v0, %v226_v10  ;;  %v336_v16 = vld [vmem:[%s610_s26 + $0x18] sm:$0xff] }
  0x13   : > { %v301_v12 = vadd.f32 %v616_v2, %v262_v4  ;;  %v302_v13 = vadd.f32 %v616_v2, %v263_v6  ;;  %v266_v17 = vmul.f32 %v598_v0, %v227_v11  ;;  %v228_v18 = vld [vmem:[%s604_s23 + $0x28] sm:$0xff]  ;;  %v303_v19 = vadd.f32 %v616_v2, %v264_v9  ;;  %v337_v20 = vld [vmem:[%s610_s26 + $0x20] sm:$0xff]  ;;  %v229_v22 = vld [vmem:[%s604_s23 + $0x30] sm:$0xff] }
  0x14   : > { %v267_v21 = vmul.f32 %v598_v0, %v228_v18  ;;  %v230_v23 = vld [vmem:[%s604_s23 + $0x38] sm:$0xff]  ;;  %v304_v26 = vadd.f32 %v616_v2, %v265_v15  ;;  %v338_v28 = vld [vmem:[%s610_s26 + $0x28] sm:$0xff]  ;;  %v268_v31 = vmul.f32 %v598_v0, %v229_v22  ;;  %v231_v33 = vld [vmem:[%s604_s23 + $0x40] sm:$0xff] }
  0x15   : > { %v365_v24 = vadd.f32 %v333_v5, %v301_v12  ;;  %v366_v25 = vadd.f32 %v334_v8, %v302_v13  ;;  %v305_v27 = vadd.f32 %v616_v2, %v266_v17  ;;  %v367_v29 = vadd.f32 %v335_v14, %v303_v19  ;;  %v232_v34 = vld [vmem:[%s604_s23 + $0x48] sm:$0xff]  ;;  %v339_v39 = vld [vmem:[%s610_s26 + $0x30] sm:$0xff]  ;;  %v340_v40 = vld [vmem:[%s610_s26 + $0x38] sm:$0xff] }
  0x16   : > { %v306_v30 = vadd.f32 %v616_v2, %v267_v21  ;;  %v269_v32 = vmul.f32 %v598_v0, %v230_v23  ;;  %v368_v37 = vadd.f32 %v336_v16, %v304_v26  ;;  %v233_v41 = vld [vmem:[%s604_s23 + $0x50] sm:$0xff]  ;;  %v307_v44 = vadd.f32 %v616_v2, %v268_v31  ;;  %v234_v46 = vld [vmem:[%s604_s23 + $0x58] sm:$0xff]  ;;  %v235_v47 = vld [vmem:[%s604_s23 + $0x60] sm:$0xff] }
  0x17   : > { %v397_v35 = vmax.f32 %v365_v24, 0.0  ;;  %v398_v36 = vmax.f32 %v366_v25, 0.0  ;;  %v369_v38 = vadd.f32 %v337_v20, %v305_v27  ;;  %v399_v42 = vmax.f32 %v367_v29, 0.0  ;;  %v236_v52 = vld [vmem:[%s604_s23 + $0x68] sm:$0xff]  ;;  %v341_v56 = vld [vmem:[%s610_s26 + $0x40] sm:$0xff]  ;;  %v343_v61 = vld [vmem:[%s610_s26 + $0x50] sm:$0xff] }
  0x18   : > { %v370_v43 = vadd.f32 %v338_v28, %v306_v30  ;;  %v308_v45 = vadd.f32 %v616_v2, %v269_v32  ;;  %v400_v48 = vmax.f32 %v368_v37, 0.0  ;;  %v270_v50 = vmul.f32 %v598_v0, %v231_v33  ;;  %v342_v57 = vld [vmem:[%s610_s26 + $0x48] sm:$0xff]  ;;  %v237_v1 = vld [vmem:[%s604_s23 + $0x70] sm:$0xff]  ;;  %v238_v3 = vld [vmem:[%s604_s23 + $0x78] sm:$0xff] }
  0x19   : > { %429 = vst [vmem:[%s646_s5] sm:$0xff] %v397_v35  ;;  %430 = vst [vmem:[%s646_s5 + $0x8] sm:$0xff] %v398_v36  ;;  %v401_v49 = vmax.f32 %v369_v38, 0.0  ;;  %v271_v51 = vmul.f32 %v598_v0, %v232_v34  ;;  %v371_v54 = vadd.f32 %v339_v39, %v307_v44  ;;  %v272_v58 = vmul.f32 %v598_v0, %v233_v41  ;;  %v344_v7 = vld [vmem:[%s610_s26 + $0x58] sm:$0xff]  ;;  %v345_v8 = vld [vmem:[%s610_s26 + $0x60] sm:$0xff] }
  0x1a   : > { %431 = vst [vmem:[%s646_s5 + $0x10] sm:$0xff] %v399_v42  ;;  %v402_v53 = vmax.f32 %v370_v43, 0.0  ;;  %v372_v55 = vadd.f32 %v340_v40, %v308_v45  ;;  %432 = vst [vmem:[%s646_s5 + $0x18] sm:$0xff] %v400_v48  ;;  %v309_v59 = vadd.f32 %v616_v2, %v270_v50  ;;  %v273_v62 = vmul.f32 %v598_v0, %v234_v46  ;;  %v346_v14 = vld [vmem:[%s610_s26 + $0x68] sm:$0xff]  ;;  %v239_v19 = vld [vmem:[%s604_s23 + $0x80] sm:$0xff] }
  0x1b   : > { %433 = vst [vmem:[%s646_s5 + $0x20] sm:$0xff] %v401_v49  ;;  %v310_v60 = vadd.f32 %v616_v2, %v271_v51  ;;  %v274_v63 = vmul.f32 %v598_v0, %v235_v47  ;;  %v403_v4 = vmax.f32 %v371_v54, 0.0  ;;  %v311_v6 = vadd.f32 %v616_v2, %v272_v58  ;;  %v240_v20 = vld [vmem:[%s604_s23 + $0x88] sm:$0xff]  ;;  %v347_v25 = vld [vmem:[%s610_s26 + $0x70] sm:$0xff]  ;;  %v348_v26 = vld [vmem:[%s610_s26 + $0x78] sm:$0xff] }
  0x1c   : > { %434 = vst [vmem:[%s646_s5 + $0x28] sm:$0xff] %v402_v53  ;;  %v404_v5 = vmax.f32 %v372_v55, 0.0  ;;  %v275_v9 = vmul.f32 %v598_v0, %v236_v52  ;;  %v373_v10 = vadd.f32 %v341_v56, %v309_v59  ;;  %v312_v12 = vadd.f32 %v616_v2, %v273_v62  ;;  %v241_v27 = vld [vmem:[%s604_s23 + $0x90] sm:$0xff]  ;;  %v242_v32 = vld [vmem:[%s604_s23 + $0x98] sm:$0xff]  ;;  %v243_v33 = vld [vmem:[%s604_s23 + $0xa0] sm:$0xff] }
  0x1d   : > { %v374_v11 = vadd.f32 %v342_v57, %v310_v60  ;;  %v313_v13 = vadd.f32 %v616_v2, %v274_v63  ;;  %435 = vst [vmem:[%s646_s5 + $0x30] sm:$0xff] %v403_v4  ;;  %v375_v15 = vadd.f32 %v343_v61, %v311_v6  ;;  %v276_v17 = vmul.f32 %v598_v0, %v237_v1  ;;  %v244_v38 = vld [vmem:[%s604_s23 + $0xa8] sm:$0xff]  ;;  %v349_v42 = vld [vmem:[%s610_s26 + $0x80] sm:$0xff]  ;;  %v351_v47 = vld [vmem:[%s610_s26 + $0x90] sm:$0xff] }
  0x1e   : > { %436 = vst [vmem:[%s646_s5 + $0x38] sm:$0xff] %v404_v5  ;;  %v314_v16 = vadd.f32 %v616_v2, %v275_v9  ;;  %v277_v18 = vmul.f32 %v598_v0, %v238_v3  ;;  %v405_v21 = vmax.f32 %v373_v10, 0.0  ;;  %v376_v23 = vadd.f32 %v344_v7, %v312_v12  ;;  %v350_v43 = vld [vmem:[%s610_s26 + $0x88] sm:$0xff]  ;;  %v245_v50 = vld [vmem:[%s604_s23 + $0xb0] sm:$0xff]  ;;  %v246_v51 = vld [vmem:[%s604_s23 + $0xb8] sm:$0xff] }
  0x1f   : > { %v406_v22 = vmax.f32 %v374_v11, 0.0  ;;  %v377_v24 = vadd.f32 %v345_v8, %v313_v13  ;;  %v407_v28 = vmax.f32 %v375_v15, 0.0  ;;  %v315_v30 = vadd.f32 %v616_v2, %v276_v17  ;;  %v352_v55 = vld [vmem:[%s610_s26 + $0x98] sm:$0xff]  ;;  %v353_v56 = vld [vmem:[%s610_s26 + $0xa0] sm:$0xff]  ;;  %v354_v62 = vld [vmem:[%s610_s26 + $0xa8] sm:$0xff] }
  0x20   : > { %v378_v29 = vadd.f32 %v346_v14, %v314_v16  ;;  %v316_v31 = vadd.f32 %v616_v2, %v277_v18  ;;  %437 = vst [vmem:[%s646_s5 + $0x40] sm:$0xff] %v405_v21  ;;  %v408_v34 = vmax.f32 %v376_v23, 0.0  ;;  %v278_v36 = vmul.f32 %v598_v0, %v239_v19  ;;  %v247_v5 = vld [vmem:[%s604_s23 + $0xc0] sm:$0xff]  ;;  %v248_v6 = vld [vmem:[%s604_s23 + $0xc8] sm:$0xff]  ;;  %v355_v11 = vld [vmem:[%s610_s26 + $0xb0] sm:$0xff] }
  0x21   : > { %438 = vst [vmem:[%s646_s5 + $0x48] sm:$0xff] %v406_v22  ;;  %v409_v35 = vmax.f32 %v377_v24, 0.0  ;;  %v279_v37 = vmul.f32 %v598_v0, %v240_v20  ;;  %439 = vst [vmem:[%s646_s5 + $0x50] sm:$0xff] %v407_v28  ;;  %v379_v40 = vadd.f32 %v347_v25, %v315_v30  ;;  %v280_v44 = vmul.f32 %v598_v0, %v241_v27  ;;  %v356_v12 = vld [vmem:[%s610_s26 + $0xb8] sm:$0xff]  ;;  %v249_v13 = vld [vmem:[%s604_s23 + $0xd0] sm:$0xff] }
  0x22   : > { %v410_v39 = vmax.f32 %v378_v29, 0.0  ;;  %v380_v41 = vadd.f32 %v348_v26, %v316_v31  ;;  %440 = vst [vmem:[%s646_s5 + $0x58] sm:$0xff] %v408_v34  ;;  %v317_v45 = vadd.f32 %v616_v2, %v278_v36  ;;  %v281_v48 = vmul.f32 %v598_v0, %v242_v32  ;;  %v250_v18 = vld [vmem:[%s604_s23 + $0xd8] sm:$0xff]  ;;  %v251_v19 = vld [vmem:[%s604_s23 + $0xe0] sm:$0xff]  ;;  %v252_v24 = vld [vmem:[%s604_s23 + $0xe8] sm:$0xff] }
  0x23   : > { %441 = vst [vmem:[%s646_s5 + $0x60] sm:$0xff] %v409_v35  ;;  %v318_v46 = vadd.f32 %v616_v2, %v279_v37  ;;  %v282_v49 = vmul.f32 %v598_v0, %v243_v33  ;;  %v411_v52 = vmax.f32 %v379_v40, 0.0  ;;  %v319_v54 = vadd.f32 %v616_v2, %v280_v44  ;;  %v357_v28 = vld [vmem:[%s610_s26 + $0xc0] sm:$0xff]  ;;  %v358_v29 = vld [vmem:[%s610_s26 + $0xc8] sm:$0xff]  ;;  %v359_v33 = vld [vmem:[%s610_s26 + $0xd0] sm:$0xff] }
  0x24   : > { %442 = vst [vmem:[%s646_s5 + $0x68] sm:$0xff] %v410_v39  ;;  %v412_v53 = vmax.f32 %v380_v41, 0.0  ;;  %v283_v57 = vmul.f32 %v598_v0, %v244_v38  ;;  %v381_v58 = vadd.f32 %v349_v42, %v317_v45  ;;  %v320_v60 = vadd.f32 %v616_v2, %v281_v48  ;;  %v253_v36 = vld [vmem:[%s604_s23 + $0xf0] sm:$0xff]  ;;  %v254_v37 = vld [vmem:[%s604_s23 + $0xf8] sm:$0xff]  ;;  %v361_v42 = vld [vmem:[%s610_s26 + $0xe0] sm:$0xff] }
  0x25   : > { %v382_v59 = vadd.f32 %v350_v43, %v318_v46  ;;  %v321_v61 = vadd.f32 %v616_v2, %v282_v49  ;;  %443 = vst [vmem:[%s646_s5 + $0x70] sm:$0xff] %v411_v52  ;;  %v383_v63 = vadd.f32 %v351_v47, %v319_v54  ;;  %v284_v3 = vmul.f32 %v598_v0, %v245_v50  ;;  %v360_v41 = vld [vmem:[%s610_s26 + $0xd8] sm:$0xff]  ;;  %v362_v48 = vld [vmem:[%s610_s26 + $0xe8] sm:$0xff] }
  0x26   : > { %444 = vst [vmem:[%s646_s5 + $0x78] sm:$0xff] %v412_v53  ;;  %v322_v1 = vadd.f32 %v616_v2, %v283_v57  ;;  %v285_v4 = vmul.f32 %v598_v0, %v246_v51  ;;  %v413_v7 = vmax.f32 %v381_v58, 0.0  ;;  %v384_v9 = vadd.f32 %v352_v55, %v320_v60  ;;  %v363_v57 = vld [vmem:[%s610_s26 + $0xf0] sm:$0xff]  ;;  %v364_v58 = vld [vmem:[%s610_s26 + $0xf8] sm:$0xff] }
  0x27   : > { %v414_v8 = vmax.f32 %v382_v59, 0.0  ;;  %v385_v10 = vadd.f32 %v353_v56, %v321_v61  ;;  %v415_v14 = vmax.f32 %v383_v63, 0.0  ;;  %v323_v16 = vadd.f32 %v616_v2, %v284_v3 }
  0x28   : > { %v386_v15 = vadd.f32 %v354_v62, %v322_v1  ;;  %v324_v17 = vadd.f32 %v616_v2, %v285_v4  ;;  %445 = vst [vmem:[%s646_s5 + $0x80] sm:$0xff] %v413_v7  ;;  %v416_v20 = vmax.f32 %v384_v9, 0.0  ;;  %v286_v22 = vmul.f32 %v598_v0, %v247_v5 }
  0x29   : > { %446 = vst [vmem:[%s646_s5 + $0x88] sm:$0xff] %v414_v8  ;;  %v417_v21 = vmax.f32 %v385_v10, 0.0  ;;  %v287_v23 = vmul.f32 %v598_v0, %v248_v6  ;;  %447 = vst [vmem:[%s646_s5 + $0x90] sm:$0xff] %v415_v14  ;;  %v387_v26 = vadd.f32 %v355_v11, %v323_v16  ;;  %v288_v30 = vmul.f32 %v598_v0, %v249_v13 }
  0x2a   : > { %v418_v25 = vmax.f32 %v386_v15, 0.0  ;;  %v388_v27 = vadd.f32 %v356_v12, %v324_v17  ;;  %448 = vst [vmem:[%s646_s5 + $0x98] sm:$0xff] %v416_v20  ;;  %v325_v31 = vadd.f32 %v616_v2, %v286_v22  ;;  %v289_v34 = vmul.f32 %v598_v0, %v250_v18 }
  0x2b   : > { %449 = vst [vmem:[%s646_s5 + $0xa0] sm:$0xff] %v417_v21  ;;  %v326_v32 = vadd.f32 %v616_v2, %v287_v23  ;;  %v290_v35 = vmul.f32 %v598_v0, %v251_v19  ;;  %v419_v38 = vmax.f32 %v387_v26, 0.0  ;;  %v327_v40 = vadd.f32 %v616_v2, %v288_v30 }
  0x2c   : > { %450 = vst [vmem:[%s646_s5 + $0xa8] sm:$0xff] %v418_v25  ;;  %v420_v39 = vmax.f32 %v388_v27, 0.0  ;;  %v291_v43 = vmul.f32 %v598_v0, %v252_v24  ;;  %v389_v44 = vadd.f32 %v357_v28, %v325_v31  ;;  %v328_v46 = vadd.f32 %v616_v2, %v289_v34 }
  0x2d   : > { %v390_v45 = vadd.f32 %v358_v29, %v326_v32  ;;  %v329_v47 = vadd.f32 %v616_v2, %v290_v35  ;;  %451 = vst [vmem:[%s646_s5 + $0xb0] sm:$0xff] %v419_v38  ;;  %v391_v49 = vadd.f32 %v359_v33, %v327_v40  ;;  %v292_v51 = vmul.f32 %v598_v0, %v253_v36 }
  0x2e   : > { %452 = vst [vmem:[%s646_s5 + $0xb8] sm:$0xff] %v420_v39  ;;  %v330_v50 = vadd.f32 %v616_v2, %v291_v43  ;;  %v293_v52 = vmul.f32 %v598_v0, %v254_v37  ;;  %v421_v53 = vmax.f32 %v389_v44, 0.0  ;;  %v392_v55 = vadd.f32 %v360_v41, %v328_v46 }
  0x2f   : > { %v422_v54 = vmax.f32 %v390_v45, 0.0  ;;  %v393_v56 = vadd.f32 %v361_v42, %v329_v47  ;;  %v423_v59 = vmax.f32 %v391_v49, 0.0  ;;  %v331_v61 = vadd.f32 %v616_v2, %v292_v51 }
  0x30   : > { %v394_v60 = vadd.f32 %v362_v48, %v330_v50  ;;  %v332_v62 = vadd.f32 %v616_v2, %v293_v52  ;;  %453 = vst [vmem:[%s646_s5 + $0xc0] sm:$0xff] %v421_v53  ;;  %v424_v0 = vmax.f32 %v392_v55, 0.0 }
  0x31   : > { %454 = vst [vmem:[%s646_s5 + $0xc8] sm:$0xff] %v422_v54  ;;  %v425_v63 = vmax.f32 %v393_v56, 0.0  ;;  %455 = vst [vmem:[%s646_s5 + $0xd0] sm:$0xff] %v423_v59  ;;  %v395_v3 = vadd.f32 %v363_v57, %v331_v61 }
  0x32   : > { %v426_v1 = vmax.f32 %v394_v60, 0.0  ;;  %v396_v4 = vadd.f32 %v364_v58, %v332_v62  ;;  %456 = vst [vmem:[%s646_s5 + $0xd8] sm:$0xff] %v424_v0 }
  0x33   : > { %457 = vst [vmem:[%s646_s5 + $0xe0] sm:$0xff] %v425_v63  ;;  %v427_v5 = vmax.f32 %v395_v3, 0.0 }
  0x34   : > { %458 = vst [vmem:[%s646_s5 + $0xe8] sm:$0xff] %v426_v1  ;;  %v428_v6 = vmax.f32 %v396_v4, 0.0 }
  0x35   : > { %459 = vst [vmem:[%s646_s5 + $0xf0] sm:$0xff] %v427_v5 }
  0x36   : > { %460 = vst [vmem:[%s646_s5 + $0xf8] sm:$0xff] %v428_v6 }
  0x37 PF: > { %s14_s15 = sadd.s32 1, %s558_s15  }
  0x38   : > { %p11_p4 = scmp.ge.s32.totalorder %s14_s15, 4  }
  0x3a   :  { %13 = sbr.rel (!%p11_p4) target bundleno = 1 (0x1), region = 69 }

// kernel: bottleneck_forward.7
= control target key start
LH: loop header
LB: loop body
LE: loop exit
PB: predicated region body
PF: predicated region fallthrough
CT: control target
= control target key end

     0   :  { %s5189_s15 = smov 0   ;;  %s6479_s0 = inlined_call_operand.vmem [shape: f32[2,18,18,128], index: 0, kind: input, shape index: {}]   ;;  %s6480_s1 = inlined_call_operand.vmem [shape: f32[9,128,128], index: 1, kind: input, shape index: {}]   ;;  %s6481_s2 = inlined_call_operand.vmem [shape: f32[2,256,128], index: 2, kind: output, shape index: {0}]   ;;  %s6482_s3 = inlined_call_operand.vmem [shape: f32[1,128], index: 3, kind: output, shape index: {1}]   ;;  %s6483_s4 = inlined_call_operand.vmem [shape: f32[1,128], index: 4, kind: output, shape index: {2}]  }
   0x1 LB: > { %s5195_s16 = sadd.s32 4294967295, %s5161_s15   ;;  %p3105_p0 = scmp.ge.s32.totalorder %s5161_s15, 1  ;;  %s5161_s15 = sphi %s5189_s15, %s15_s15  }
   0x2   : > { %p157_p1 = scmp.lt.s32.totalorder %s5161_s15, 3 }
   0x4   : > { %p158_p2 = pnand %p3105_p0, %p157_p1 }
   0x6   : > { %161 = sbr.rel (%p158_p2) target bundleno = 628 (0x274), region = 28 }
   0xd   : > { %v3109_v0 = vld [vmem:[%s6480_s1 + $0x80] sm:$0xff]  ;;  %v3110_v1 = vld [vmem:[%s6480_s1 + $0x88] sm:$0xff]  ;;  %p183_p3 = scmp.lt.s32.totalorder %s5195_s16, 1  ;;  %v3111_v5 = vld [vmem:[%s6480_s1 + $0x90] sm:$0xff]  ;;  %p3429_p4 = scmp.ne.s32.totalorder %s5195_s16, 0 }
   0xe   : > { %v3221_v2 = vld [vmem:[%s6480_s1 + $0x200] sm:$0xff]  ;;  %v4585_v3 = vpack.c.bf16 %v3110_v1, %v3109_v0  ;;  %v3222_v4 = vld [vmem:[%s6480_s1 + $0x208] sm:$0xff]  ;;  %v3112_v6 = vld [vmem:[%s6480_s1 + $0x98] sm:$0xff] }
   0xf   : > { %v5218_v7 = vpack.c.bf16 %v3222_v4, %v3221_v2  ;;  %v4589_v8 = vpack.c.bf16 %v3112_v6, %v3111_v5  ;;  %v3223_v9 = vld [vmem:[%s6480_s1 + $0x210] sm:$0xff]  ;;  %v3224_v10 = vld [vmem:[%s6480_s1 + $0x218] sm:$0xff]  ;;  %v3113_v11 = vld [vmem:[%s6480_s1 + $0xa0] sm:$0xff]  ;;  %s5230_s9 = scalar_select %p183_p3, %s5195_s16, 1 }
  0x10   : > { %4586 = vmatprep.subr.bf16.mxu1 %v4585_v3  ;;  %v5232_v12 = vpack.c.bf16 %v3224_v10, %v3223_v9  ;;  %v3114_v13 = vld [vmem:[%s6480_s1 + $0xa8] sm:$0xff]  ;;  %v3225_v14 = vld [vmem:[%s6480_s1 + $0x220] sm:$0xff]  ;;  %v3115_v18 = vld [vmem:[%s6480_s1 + $0xb0] sm:$0xff] }
  0x11   : > { %v3226_v15 = vld [vmem:[%s6480_s1 + $0x228] sm:$0xff]  ;;  %4714 = vmatprep.subr.bf16.mxu0 %v5218_v7  ;;  %4588 = vmatpush3.bf16.msra.mxu1 %v4585_v3  ;;  %s5145_s18 = smul.u32 432, %s5230_s9  ;;  %v4593_v16 = vpack.c.bf16 %v3114_v13, %v3113_v11  ;;  %v3116_v19 = vld [vmem:[%s6480_s1 + $0xb8] sm:$0xff]  ;;  %v3227_v20 = vld [vmem:[%s6480_s1 + $0x230] sm:$0xff] }
  0x12   : > { %6522 = vst [vmem:[#allocation2_spill] sm:$0xff] %v5232_v12  ;;  %4716 = vmatpush3.bf16.msra.mxu0 %v5218_v7  ;;  %4590 = vmatprep.subr.bf16.mxu1 %v4589_v8  ;;  %v5247_v17 = vpack.c.bf16 %v3226_v15, %v3225_v14  ;;  %v3228_v21 = vld [vmem:[%s6480_s1 + $0x238] sm:$0xff]  ;;  %v4597_v22 = vpack.c.bf16 %v3116_v19, %v3115_v18  ;;  %v3117_v24 = vld [vmem:[%s6480_s1 + $0xc0] sm:$0xff]  ;;  %v3118_v25 = vld [vmem:[%s6480_s1 + $0xc8] sm:$0xff] }
  0x13   : > { %4718 = vmatprep.subr.bf16.mxu0 %v5232_v12  ;;  %s5264_s29 = scalar_lea.vmem %s6479_s0, %s5145_s18  ;;  %v5268_v23 = vpack.c.bf16 %v3228_v21, %v3227_v20  ;;  %v3229_v27 = vld [vmem:[%s6480_s1 + $0x240] sm:$0xff]  ;;  %v3230_v28 = vld [vmem:[%s6480_s1 + $0x248] sm:$0xff]  ;;  %v4601_v30 = vpack.c.bf16 %v3118_v25, %v3117_v24  ;;  %v3119_v32 = vld [vmem:[%s6480_s1 + $0xd0] sm:$0xff] }
  0x14   : > { %6523 = vst [vmem:[#allocation3_spill] sm:$0xff] %v5247_v17  ;;  %v241_v26 = vld [vmem:[%s5264_s29 + $0x1] sm:$0xff]  ;;  %v5284_v29 = vld [vmem:[%s5264_s29 + $0x19] sm:$0xff]  ;;  %v5289_v31 = vpack.c.bf16 %v3230_v28, %v3229_v27  ;;  %v3231_v34 = vld [vmem:[%s6480_s1 + $0x250] sm:$0xff] }
  0x15   : > { %4592 = vmatpush3.bf16.msra.mxu1 %v4589_v8  ;;  %6524 = vst [vmem:[#allocation4_spill] sm:$0xff] %v5268_v23  ;;  %3897 = vmatprep.mubr.f32.mxu1 %v241_v26  ;;  %v3120_v33 = vld [vmem:[%s6480_s1 + $0xd8] sm:$0xff]  ;;  %v3121_v38 = vld [vmem:[%s6480_s1 + $0xe0] sm:$0xff]  ;;  %v3122_v39 = vld [vmem:[%s6480_s1 + $0xe8] sm:$0xff] }
  0x16   : > { %4720 = vmatpush3.bf16.msra.mxu0 %v5232_v12  ;;  %4594 = vmatprep.subr.bf16.mxu1 %v4593_v16  ;;  %6525 = vst [vmem:[#allocation5_spill] sm:$0xff] %v5289_v31  ;;  %v3232_v35 = vld [vmem:[%s6480_s1 + $0x258] sm:$0xff]  ;;  %v4605_v36 = vpack.c.bf16 %v3120_v33, %v3119_v32  ;;  %v3233_v40 = vld [vmem:[%s6480_s1 + $0x260] sm:$0xff]  ;;  %v3234_v41 = vld [vmem:[%s6480_s1 + $0x268] sm:$0xff]  ;;  %v4609_v42 = vpack.c.bf16 %v3122_v39, %v3121_v38 }
  0x17   : > { %4722 = vmatprep.subr.bf16.mxu0 %v5247_v17  ;;  %4217 = vmatprep.mubr.f32.mxu0 %v5284_v29  ;;  %v5305_v37 = vpack.c.bf16 %v3232_v35, %v3231_v34  ;;  %v5321_v43 = vpack.c.bf16 %v3234_v41, %v3233_v40  ;;  %v3123_v44 = vld [vmem:[%s6480_s1 + $0xf0] sm:$0xff]  ;;  %v3124_v45 = vld [vmem:[%s6480_s1 + $0xf8] sm:$0xff]  ;;  %v225_v50 = vld [vmem:[%s6480_s1] sm:$0xff] }
  0x18   : > { %v3235_v46 = vld [vmem:[%s6480_s1 + $0x270] sm:$0xff]  ;;  %v3236_v47 = vld [vmem:[%s6480_s1 + $0x278] sm:$0xff]  ;;  %v4613_v48 = vpack.c.bf16 %v3124_v45, %v3123_v44  ;;  %v226_v51 = vld [vmem:[%s6480_s1 + $0x8] sm:$0xff] }
  0x19   : > { %4596 = vmatpush3.bf16.msra.mxu1 %v4593_v16  ;;  %6526 = vst [vmem:[#allocation6_spill] sm:$0xff] %v5305_v37  ;;  %6527 = vst [vmem:[#allocation7_spill] sm:$0xff] %v5321_v43  ;;  %v5337_v49 = vpack.c.bf16 %v3236_v47, %v3235_v46  ;;  %v3269_v52 = vld [vmem:[%s6480_s1 + $0x280] sm:$0xff]  ;;  %v3270_v53 = vld [vmem:[%s6480_s1 + $0x288] sm:$0xff]  ;;  %v4617_v54 = vpack.c.bf16 %v226_v51, %v225_v50 }
  0x1a   : > { %4724 = vmatpush3.bf16.msra.mxu0 %v5247_v17  ;;  %4598 = vmatprep.subr.bf16.mxu1 %v4597_v22  ;;  %v4745_v55 = vpack.c.bf16 %v3270_v53, %v3269_v52  ;;  %v3271_v56 = vld [vmem:[%s6480_s1 + $0x290] sm:$0xff]  ;;  %v3272_v57 = vld [vmem:[%s6480_s1 + $0x298] sm:$0xff]  ;;  %v3190_v61 = vld [vmem:[%s5264_s29 + $0x21] sm:$0xff] }
  0x1b   : > { %4726 = vmatprep.subr.bf16.mxu0 %v5268_v23  ;;  %6528 = vst [vmem:[#allocation8_spill] sm:$0xff] %v5337_v49  ;;  %v242_v58 = vld [vmem:[%s5264_s29 + $0x9] sm:$0xff]  ;;  %v228_v60 = vld [vmem:[%s6480_s1 + $0x18] sm:$0xff]  ;;  %v4749_v62 = vpack.c.bf16 %v3272_v57, %v3271_v56  ;;  %v3273_v1 = vld [vmem:[%s6480_s1 + $0x2a0] sm:$0xff] }
  0x1c   : > { %v227_v59 = vld [vmem:[%s6480_s1 + $0x10] sm:$0xff]  ;;  %v3274_v2 = vld [vmem:[%s6480_s1 + $0x2a8] sm:$0xff]  ;;  %v229_v3 = vld [vmem:[%s6480_s1 + $0x20] sm:$0xff] }
  0x1d   : > { %4600 = vmatpush3.bf16.msra.mxu1 %v4597_v22  ;;  %v3191_v63 = vld [vmem:[%s5264_s29 + $0x31] sm:$0xff]  ;;  %v4621_v0 = vpack.c.bf16 %v228_v60, %v227_v59  ;;  %v230_v4 = vld [vmem:[%s6480_s1 + $0x28] sm:$0xff]  ;;  %v3192_v5 = vld [vmem:[%s5264_s29 + $0x39] sm:$0xff]  ;;  %v4753_v8 = vpack.c.bf16 %v3274_v2, %v3273_v1 }
  0x1e   : > { %4728 = vmatpush3.bf16.msra.mxu0 %v5268_v23  ;;  %4602 = vmatprep.subr.bf16.mxu1 %v4601_v30  ;;  %v3193_v6 = vld [vmem:[%s5264_s29 + $0x49] sm:$0xff]  ;;  %v3276_v10 = vld [vmem:[%s6480_s1 + $0x2b8] sm:$0xff]  ;;  %v4625_v11 = vpack.c.bf16 %v230_v4, %v229_v3  ;;  %v3195_v16 = vld [vmem:[%s5264_s29 + $0x61] sm:$0xff] }
  0x1f   : > { %4730 = vmatprep.subr.bf16.mxu0 %v5289_v31  ;;  %v3275_v9 = vld [vmem:[%s6480_s1 + $0x2b0] sm:$0xff]  ;;  %v232_v14 = vld [vmem:[%s6480_s1 + $0x38] sm:$0xff]  ;;  %v3277_v19 = vld [vmem:[%s6480_s1 + $0x2c0] sm:$0xff] }
  0x20   : > { %v231_v13 = vld [vmem:[%s6480_s1 + $0x30] sm:$0xff]  ;;  %v4757_v18 = vpack.c.bf16 %v3276_v10, %v3275_v9  ;;  %v3278_v20 = vld [vmem:[%s6480_s1 + $0x2c8] sm:$0xff]  ;;  %v233_v22 = vld [vmem:[%s6480_s1 + $0x40] sm:$0xff] }
  0x21   : > { %4604 = vmatpush3.bf16.msra.mxu1 %v4601_v30  ;;  %v3194_v15 = vld [vmem:[%s5264_s29 + $0x51] sm:$0xff]  ;;  %v4629_v21 = vpack.c.bf16 %v232_v14, %v231_v13  ;;  %v234_v24 = vld [vmem:[%s6480_s1 + $0x48] sm:$0xff]  ;;  %v3197_v26 = vld [vmem:[%s5264_s29 + $0x79] sm:$0xff]  ;;  %v4761_v27 = vpack.c.bf16 %v3278_v20, %v3277_v19 }
  0x22   : > { %4732 = vmatpush3.bf16.msra.mxu0 %v5289_v31  ;;  %4606 = vmatprep.subr.bf16.mxu1 %v4605_v36  ;;  %v3196_v25 = vld [vmem:[%s5264_s29 + $0x69] sm:$0xff]  ;;  %v4633_v30 = vpack.c.bf16 %v234_v24, %v233_v22  ;;  %v236_v33 = vld [vmem:[%s6480_s1 + $0x58] sm:$0xff]  ;;  %v3198_v34 = vld [vmem:[%s5264_s29 + $0x81] sm:$0xff] }
  0x23   : > { %4734 = vmatprep.subr.bf16.mxu0 %v5305_v37  ;;  %v3279_v28 = vld [vmem:[%s6480_s1 + $0x2d0] sm:$0xff]  ;;  %v3281_v38 = vld [vmem:[%s6480_s1 + $0x2e0] sm:$0xff]  ;;  %v3282_v39 = vld [vmem:[%s6480_s1 + $0x2e8] sm:$0xff] }
  0x24   : > { %v235_v32 = vld [vmem:[%s6480_s1 + $0x50] sm:$0xff]  ;;  %v237_v41 = vld [vmem:[%s6480_s1 + $0x60] sm:$0xff]  ;;  %v4769_v46 = vpack.c.bf16 %v3282_v39, %v3281_v38  ;;  %v240_v52 = vld [vmem:[%s6480_s1 + $0x78] sm:$0xff] }
  0x25   : > { %4608 = vmatpush3.bf16.msra.mxu1 %v4605_v36  ;;  %v5426_v35 = vld [vmem:[%s5264_s29 + $0x91] sm:$0xff]  ;;  %v4637_v40 = vpack.c.bf16 %v236_v33, %v235_v32  ;;  %v3200_v44 = vld [vmem:[%s5264_s29 + $0x99] sm:$0xff]  ;;  %v3201_v45 = vld [vmem:[%s5264_s29 + $0xa9] sm:$0xff] }
  0x26   : > { %4736 = vmatpush3.bf16.msra.mxu0 %v5305_v37  ;;  %4610 = vmatprep.subr.bf16.mxu1 %v4609_v42  ;;  %v3283_v47 = vld [vmem:[%s6480_s1 + $0x2f0] sm:$0xff]  ;;  %v3317_v56 = vld [vmem:[%s6480_s1 + $0x300] sm:$0xff]  ;;  %v3318_v57 = vld [vmem:[%s6480_s1 + $0x308] sm:$0xff] }
  0x27   : > { %4738 = vmatprep.subr.bf16.mxu0 %v5321_v43  ;;  %v239_v51 = vld [vmem:[%s6480_s1 + $0x70] sm:$0xff]  ;;  %v3125_v59 = vld [vmem:[%s6480_s1 + $0x100] sm:$0xff]  ;;  %v3126_v60 = vld [vmem:[%s6480_s1 + $0x108] sm:$0xff] }
  0x28   : > { %v3202_v53 = vld [vmem:[%s5264_s29 + $0xb1] sm:$0xff]  ;;  %v5485_v2 = vpack.c.bf16 %v3126_v60, %v3125_v59  ;;  %v5491_v3 = vld [vmem:[%s5264_s29 + $0x22] sm:$0xff]  ;;  %v5494_v4 = vld [vmem:[%s5264_s29 + $0xd9] sm:$0xff] }
  0x29   : > { %4612 = vmatpush3.bf16.msra.mxu1 %v4609_v42  ;;  %v238_v42 = vld [vmem:[%s6480_s1 + $0x68] sm:$0xff]  ;;  %v3320_v1 = vld [vmem:[%s6480_s1 + $0x318] sm:$0xff]  ;;  %v3327_v33 = vld [vmem:[%s6480_s1 + $0x350] sm:$0xff] }
  0x2a   : > { %4740 = vmatpush3.bf16.msra.mxu0 %v5321_v43  ;;  %4614 = vmatprep.subr.bf16.mxu1 %v4613_v48  ;;  %v4641_v50 = vpack.c.bf16 %v238_v42, %v237_v41  ;;  %v3322_v9 = vld [vmem:[%s6480_s1 + $0x328] sm:$0xff]  ;;  %v5517_v13 = vld [vmem:[%s5264_s29 + $0xf1] sm:$0xff]  ;;  %v5532_v19 = vld [vmem:[%s5264_s29 + $0xf9] sm:$0xff] }
  0x2b   : > { %4742 = vmatprep.subr.bf16.mxu0 %v5337_v49  ;;  %v5510_v10 = vld [vmem:[%s5264_s29 + $0xe1] sm:$0xff]  ;;  %v5520_v14 = vld [vmem:[%s5264_s29 + $0x4a] sm:$0xff]  ;;  %v5536_v20 = vld [vmem:[%s5264_s29 + $0x52] sm:$0xff] }
  0x2c   : > { %v5542_v22 = vld [vmem:[%s5264_s29 + $0x62] sm:$0xff]  ;;  %v5583_v39 = vld [vmem:[%s5264_s29 + $0x139] sm:$0xff] }
  0x2d   : > { %4616 = vmatpush3.bf16.msra.mxu1 %v4613_v48  ;;  %v3284_v48 = vld [vmem:[%s6480_s1 + $0x2f8] sm:$0xff]  ;;  %v5580_v38 = vld [vmem:[%s5264_s29 + $0x82] sm:$0xff]  ;;  %6533 = vst [vmem:[#allocation13_spill] sm:$0xff] %v5583_v39 }
  0x2e   : > { %4744 = vmatpush3.bf16.msra.mxu0 %v5337_v49  ;;  %4618 = vmatprep.subr.bf16.mxu1 %v4617_v54  ;;  %v3329_v42 = vld [vmem:[%s6480_s1 + $0x360] sm:$0xff]  ;;  %v3366_v60 = vld [vmem:[%s6480_s1 + $0x388] sm:$0xff]  ;;  %v3136_v49 = vld [vmem:[%s6480_s1 + $0x158] sm:$0xff] }
  0x2f   : > { %4746 = vmatprep.subr.bf16.mxu0 %v4745_v55  ;;  %v3365_v59 = vld [vmem:[%s6480_s1 + $0x380] sm:$0xff]  ;;  %v5760_v43 = vld [vmem:[%s5264_s29 + $0x152] sm:$0xff]  ;;  %v3174_v17 = vld [vmem:[%s6480_s1 + $0x188] sm:$0xff] }
  0x30   : > { %3898 = vmatmul.mubr.f32.vlgmr.msra.gmra.mrb[0].mxu1 %v242_v58  ;;  %v4645_v58 = vpack.c.bf16 %v240_v52, %v239_v51  ;;  %v3331_v51 = vld [vmem:[%s6480_s1 + $0x370] sm:$0xff]  ;;  %v3332_v52 = vld [vmem:[%s6480_s1 + $0x378] sm:$0xff]  ;;  %v3137_v37 = vld [vmem:[%s6480_s1 + $0x160] sm:$0xff] }
  0x31   : > { %4218 = vmatmul.mubr.f32.vlgmr.msra.gmra.mrb[0].mxu0 %v3190_v61  ;;  %4620 = vmatpush3.bf16.msra.mxu1 %v4617_v54  ;;  %v5458_v54 = vld [vmem:[%s5264_s29 + $0xc1] sm:$0xff]  ;;  %v3368_v12 = vld [vmem:[%s6480_s1 + $0x398] sm:$0xff] }
  0x32   : > { %4748 = vmatpush3.bf16.msra.mxu0 %v4745_v55  ;;  %3900 = vmatprep.mubr.f32.mxu1 %v5284_v29  ;;  %v3280_v29 = vld [vmem:[%s6480_s1 + $0x2d8] sm:$0xff]  ;;  %v4773_v55 = vpack.c.bf16 %v3284_v48, %v3283_v47  ;;  %v5608_v48 = vld [vmem:[%s5264_s29 + $0xaa] sm:$0xff]  ;;  %v3267_v23 = vld [vmem:[%s5264_s29 + $0x182] sm:$0xff] }
  0x33   : > { %4220 = vmatprep.mubr.f32.mxu0 %v3191_v63  ;;  %4750 = vmatprep.subr.bf16.mxu0 %v4749_v62  ;;  %v4765_v36 = vpack.c.bf16 %v3280_v29, %v3279_v28  ;;  %v5558_v28 = vld [vmem:[%s5264_s29 + $0x6a] sm:$0xff]  ;;  %v5561_v29 = vld [vmem:[%s5264_s29 + $0x121] sm:$0xff] }
  0x34   : > { %3901 = vmatmul.mubr.f32.gmra.mrb[2].mxu1 %v3190_v61  ;;  %4622 = vmatprep.subr.bf16.mxu1 %v4621_v0  ;;  %v5474_v61 = vld [vmem:[%s5264_s29 + $0xc9] sm:$0xff]  ;;  %6531 = vst [vmem:[#allocation11_spill] sm:$0xff] %v5561_v29  ;;  %v5605_v47 = vld [vmem:[%s5264_s29 + $0x151] sm:$0xff] }
  0x35   : > { %4221 = vmatmul.mubr.f32.gmra.mrb[2].mxu0 %v3192_v5  ;;  %3903 = vmatprep.mubr.f32.mxu1 %v3191_v63  ;;  %v4777_v63 = vpack.c.bf16 %v3318_v57, %v3317_v56  ;;  %6535 = vst [vmem:[#allocation15_spill] sm:$0xff] %v5605_v47  ;;  %v5627_v56 = vld [vmem:[%s5264_s29 + $0x169] sm:$0xff] }
  0x36   : > { %4752 = vmatpush3.bf16.msra.mxu0 %v4749_v62  ;;  %4223 = vmatprep.mubr.f32.mxu0 %v3193_v6  ;;  %v5477_v62 = vld [vmem:[%s5264_s29 + $0x1a] sm:$0xff]  ;;  %6537 = vst [vmem:[#allocation17_spill] sm:$0xff] %v5627_v56  ;;  %v5630_v57 = vld [vmem:[%s5264_s29 + $0xc2] sm:$0xff] }
  0x37   : > { %4754 = vmatprep.subr.bf16.mxu0 %v4753_v8  ;;  %4624 = vmatpush3.bf16.msra.mxu1 %v4621_v0  ;;  %v3319_v0 = vld [vmem:[%s6480_s1 + $0x310] sm:$0xff] }
  0x38   : > { %3904 = vmatmul.mubr.f32.gmra.mrb[4].mxu1 %v3192_v5  ;;  %4626 = vmatprep.subr.bf16.mxu1 %v4625_v11  ;;  %v5497_v5 = vld [vmem:[%s5264_s29 + $0x32] sm:$0xff] }
  0x39   : > { %4224 = vmatmul.mubr.f32.gmra.mrb[4].mxu0 %v3194_v15  ;;  %3906 = vmatprep.mubr.f32.mxu1 %v3193_v6  ;;  %v4781_v6 = vpack.c.bf16 %v3320_v1, %v3319_v0  ;;  %v5646_v0 = vld [vmem:[%s5264_s29 + $0xca] sm:$0xff]  ;;  %v193_v1 = vld [vmem:[%s5264_s29] sm:$0xff] }
  0x3a   : > { %4756 = vmatpush3.bf16.msra.mxu0 %v4753_v8  ;;  %4226 = vmatprep.mubr.f32.mxu0 %v3195_v16  ;;  %v3321_v8 = vld [vmem:[%s6480_s1 + $0x320] sm:$0xff] }
  0x3b   : > { %4758 = vmatprep.subr.bf16.mxu0 %v4757_v18  ;;  %4628 = vmatpush3.bf16.msra.mxu1 %v4625_v11  ;;  %v5514_v11 = vld [vmem:[%s5264_s29 + $0x3a] sm:$0xff] }
  0x3c   : > { %3907 = vmatmul.mubr.f32.gmra.mrb[6].mxu1 %v3194_v15  ;;  %4630 = vmatprep.subr.bf16.mxu1 %v4629_v21  ;;  %v4785_v15 = vpack.c.bf16 %v3322_v9, %v3321_v8  ;;  %v5652_v8 = vpack.c.bf16 %v3366_v60, %v3365_v59  ;;  %v3127_v9 = vld [vmem:[%s6480_s1 + $0x110] sm:$0xff]  ;;  %v5713_v59 = vld [vmem:[%s5264_s29 + $0x48] sm:$0xff] }
  0x3d   : > { %4227 = vmatmul.mubr.f32.gmra.mrb[6].mxu0 %v3196_v25  ;;  %3909 = vmatprep.mubr.f32.mxu1 %v3195_v16  ;;  %v3323_v16 = vld [vmem:[%s6480_s1 + $0x330] sm:$0xff]  ;;  %6541 = vst [vmem:[#allocation21_spill] sm:$0xff] %v5713_v59  ;;  %v5716_v60 = vld [vmem:[%s5264_s29 + $0x122] sm:$0xff] }
  0x3e   : > { %4760 = vmatpush3.bf16.msra.mxu0 %v4757_v18  ;;  %4229 = vmatprep.mubr.f32.mxu0 %v3197_v26  ;;  %v3324_v18 = vld [vmem:[%s6480_s1 + $0x338] sm:$0xff] }
  0x3f   : > { %4762 = vmatprep.subr.bf16.mxu0 %v4761_v27  ;;  %4632 = vmatpush3.bf16.msra.mxu1 %v4629_v21  ;;  %v5539_v21 = vld [vmem:[%s5264_s29 + $0x109] sm:$0xff]  ;;  %v4789_v24 = vpack.c.bf16 %v3324_v18, %v3323_v16 }
  0x40   : > { %3910 = vmatmul.mubr.f32.gmra.mrb[8].mxu1 %v3196_v25  ;;  %4634 = vmatprep.subr.bf16.mxu1 %v4633_v30  ;;  %6529 = vst [vmem:[#allocation9_spill] sm:$0xff] %v5539_v21  ;;  %v3325_v25 = vld [vmem:[%s6480_s1 + $0x340] sm:$0xff]  ;;  %v194_v16 = vld [vmem:[%s5264_s29 + $0x8] sm:$0xff] }
  0x41   : > { %4230 = vmatmul.mubr.f32.gmra.mrb[8].mxu0 %v3198_v34  ;;  %3912 = vmatprep.mubr.f32.mxu1 %v3197_v26  ;;  %v3326_v26 = vld [vmem:[%s6480_s1 + $0x348] sm:$0xff] }
  0x42   : > { %4764 = vmatpush3.bf16.msra.mxu0 %v4761_v27  ;;  %4232 = vmatprep.mubr.f32.mxu0 %v5426_v35  ;;  %v5554_v27 = vld [vmem:[%s5264_s29 + $0x111] sm:$0xff]  ;;  %v4793_v32 = vpack.c.bf16 %v3326_v26, %v3325_v25  ;;  %v5665_v18 = vld [vmem:[%s5264_s29 + $0xe2] sm:$0xff] }
  0x43   : > { %4766 = vmatprep.subr.bf16.mxu0 %v4765_v36  ;;  %4636 = vmatpush3.bf16.msra.mxu1 %v4633_v30  ;;  %6530 = vst [vmem:[#allocation10_spill] sm:$0xff] %v5554_v27  ;;  %v5564_v30 = vld [vmem:[%s5264_s29 + $0x7a] sm:$0xff]  ;;  %v5671_v25 = vld [vmem:[%s5264_s29 + $0xf2] sm:$0xff] }
  0x44   : > { %3913 = vmatmul.mubr.f32.gmra.mrb[10].mxu1 %v3198_v34  ;;  %4638 = vmatprep.subr.bf16.mxu1 %v4637_v40  ;;  %v3328_v34 = vld [vmem:[%s6480_s1 + $0x358] sm:$0xff] }
  0x45   : > { %4233 = vmatmul.mubr.f32.gmra.mrb[10].mxu0 %v3200_v44  ;;  %3915 = vmatprep.mubr.f32.mxu1 %v5426_v35  ;;  %v4797_v41 = vpack.c.bf16 %v3328_v34, %v3327_v33  ;;  %v3130_v33 = vld [vmem:[%s6480_s1 + $0x128] sm:$0xff]  ;;  %v5683_v34 = vld [vmem:[%s5264_s29 + $0x20] sm:$0xff] }
  0x46   : > { %4768 = vmatpush3.bf16.msra.mxu0 %v4765_v36  ;;  %4235 = vmatprep.mubr.f32.mxu0 %v3201_v45  ;;  %v5576_v36 = vld [vmem:[%s5264_s29 + $0x129] sm:$0xff] }
  0x47   : > { %4770 = vmatprep.subr.bf16.mxu0 %v4769_v46  ;;  %4640 = vmatpush3.bf16.msra.mxu1 %v4637_v40  ;;  %6532 = vst [vmem:[#allocation12_spill] sm:$0xff] %v5576_v36  ;;  %v5586_v40 = vld [vmem:[%s5264_s29 + $0x92] sm:$0xff] }
  0x48   : > { %3916 = vmatmul.mubr.f32.gmra.mrb[12].mxu1 %v3200_v44  ;;  %4642 = vmatprep.subr.bf16.mxu1 %v4641_v50  ;;  %v3330_v44 = vld [vmem:[%s6480_s1 + $0x368] sm:$0xff] }
  0x49   : > { %4236 = vmatmul.mubr.f32.gmra.mrb[12].mxu0 %v3202_v53  ;;  %3918 = vmatprep.mubr.f32.mxu1 %v3201_v45  ;;  %v5598_v45 = vld [vmem:[%s5264_s29 + $0x141] sm:$0xff] }
  0x4a   : > { %4772 = vmatpush3.bf16.msra.mxu0 %v4769_v46  ;;  %4238 = vmatprep.mubr.f32.mxu0 %v5458_v54  ;;  %6534 = vst [vmem:[#allocation14_spill] sm:$0xff] %v5598_v45  ;;  %v5602_v46 = vld [vmem:[%s5264_s29 + $0x9a] sm:$0xff] }
  0x4b   : > { %4774 = vmatprep.subr.bf16.mxu0 %v4773_v55  ;;  %4644 = vmatpush3.bf16.msra.mxu1 %v4641_v50  ;;  %v4801_v50 = vpack.c.bf16 %v3330_v44, %v3329_v42  ;;  %v5691_v42 = vld [vmem:[%s5264_s29 + $0x30] sm:$0xff] }
  0x4c   : > { %3919 = vmatmul.mubr.f32.gmra.mrb[14].mxu1 %v3202_v53  ;;  %4646 = vmatprep.subr.bf16.mxu1 %v4645_v58  ;;  %v5620_v53 = vld [vmem:[%s5264_s29 + $0x159] sm:$0xff]  ;;  %6539 = vst [vmem:[#allocation19_spill] sm:$0xff] %v5691_v42  ;;  %v5694_v44 = vld [vmem:[%s5264_s29 + $0x10a] sm:$0xff] }
  0x4d   : > { %4239 = vmatmul.mubr.f32.gmra.mrb[14].mxu0 %v5474_v61  ;;  %3921 = vmatprep.mubr.f32.mxu1 %v5458_v54  ;;  %6536 = vst [vmem:[#allocation16_spill] sm:$0xff] %v5620_v53 }
  0x4e   : > { %4776 = vmatpush3.bf16.msra.mxu0 %v4773_v55  ;;  %4297 = vmatprep.mubr.f32.mxu0 %v5477_v62  ;;  %v5624_v55 = vld [vmem:[%s5264_s29 + $0xb2] sm:$0xff] }
  0x4f   : > { %4778 = vmatprep.subr.bf16.mxu0 %v4777_v63  ;;  %4648 = vmatpush3.bf16.msra.mxu1 %v4645_v58  ;;  %v4805_v58 = vpack.c.bf16 %v3332_v52, %v3331_v51  ;;  %v3132_v51 = vld [vmem:[%s6480_s1 + $0x138] sm:$0xff] }
  0x50   : > { %3922 = vmatmul.mubr.f32.gmra.mrb[16].mxu1 %v5474_v61  ;;  %4650 = vmatprep.subr.bf16.mxu1 %v5485_v2  ;;  %v5706_v52 = vld [vmem:[%s5264_s29 + $0x38] sm:$0xff] }
  0x51   : > { %4298 = vmatmul.mubr.f32.vlgmr.msra.gmra.mrb[0].mxu0 %v5491_v3  ;;  %3924 = vmatprep.mubr.f32.mxu1 %v5494_v4  ;;  %6540 = vst [vmem:[#allocation20_spill] sm:$0xff] %v5706_v52 }
  0x52   : > { %4780 = vmatpush3.bf16.msra.mxu0 %v4777_v63  ;;  %4300 = vmatprep.mubr.f32.mxu0 %v5497_v5  ;;  %v5642_v63 = vld [vmem:[%s5264_s29 + $0x171] sm:$0xff] }
  0x53   : > { %4782 = vmatprep.subr.bf16.mxu0 %v4781_v6  ;;  %6538 = vst [vmem:[#allocation18_spill] sm:$0xff] %v5642_v63 }
  0x54   : > { %3925 = vmatmul.mubr.f32.gmra.mrb[18].mxu1 %v5510_v10 }
  0x55   : > { %4301 = vmatmul.mubr.f32.gmra.mrb[2].mxu0 %v5514_v11  ;;  %3927 = vmatprep.mubr.f32.mxu1 %v5517_v13 }
  0x56   : > { %4303 = vmatprep.mubr.f32.mxu0 %v5520_v14  ;;  %4784 = vmatpush3.bf16.msra.mxu0 %v4781_v6  ;;  %v5650_v6 = vld [vmem:[%s5264_s29 + $0xda] sm:$0xff] }
  0x57   : > { %4786 = vmatprep.subr.bf16.mxu0 %v4785_v15 }
  0x58   : > { %3928 = vmatmul.mubr.f32.gmra.mrb[20].mxu1 %v5532_v19 }
  0x59   : > { %4304 = vmatmul.mubr.f32.gmra.mrb[4].mxu0 %v5536_v20  ;;  %3930 = vmatprep.mubr.f32.mxu1 %v5539_v21  ;;  %v3372_v21 = vld [vmem:[%s6480_s1 + $0x3b8] sm:$0xff] }
  0x5a   : > { %4306 = vmatprep.mubr.f32.mxu0 %v5542_v22  ;;  %4788 = vmatpush3.bf16.msra.mxu0 %v4785_v15  ;;  %v3128_v15 = vld [vmem:[%s6480_s1 + $0x118] sm:$0xff] }
  0x5b   : > { %4790 = vmatprep.subr.bf16.mxu0 %v4789_v24  ;;  %v4653_v26 = vpack.c.bf16 %v3128_v15, %v3127_v9  ;;  %v3133_v9 = vld [vmem:[%s6480_s1 + $0x140] sm:$0xff]  ;;  %v3134_v15 = vld [vmem:[%s6480_s1 + $0x148] sm:$0xff] }
  0x5c   : > { %3931 = vmatmul.mubr.f32.gmra.mrb[22].mxu1 %v5554_v27  ;;  %v3367_v27 = vld [vmem:[%s6480_s1 + $0x390] sm:$0xff] }
  0x5d   : > { %4307 = vmatmul.mubr.f32.gmra.mrb[6].mxu0 %v5558_v28  ;;  %3933 = vmatprep.mubr.f32.mxu1 %v5561_v29 }
  0x5e   : > { %4309 = vmatprep.mubr.f32.mxu0 %v5564_v30  ;;  %4792 = vmatpush3.bf16.msra.mxu0 %v4789_v24  ;;  %v5668_v24 = vld [vmem:[%s5264_s29 + $0x18] sm:$0xff] }
  0x5f   : > { %4794 = vmatprep.subr.bf16.mxu0 %v4793_v32 }
  0x60   : > { %3934 = vmatmul.mubr.f32.gmra.mrb[24].mxu1 %v5576_v36  ;;  %v3173_v36 = vld [vmem:[%s6480_s1 + $0x180] sm:$0xff] }
  0x61   : > { %4310 = vmatmul.mubr.f32.gmra.mrb[8].mxu0 %v5580_v38  ;;  %3936 = vmatprep.mubr.f32.mxu1 %v5583_v39  ;;  %v5820_v29 = vpack.c.bf16 %v3174_v17, %v3173_v36  ;;  %v5835_v17 = vld [vmem:[%s5264_s29 + $0xd8] sm:$0xff]  ;;  %v3369_v36 = vld [vmem:[%s6480_s1 + $0x3a0] sm:$0xff] }
  0x62   : > { %4312 = vmatprep.mubr.f32.mxu0 %v5586_v40  ;;  %4796 = vmatpush3.bf16.msra.mxu0 %v4793_v32  ;;  %v3129_v32 = vld [vmem:[%s6480_s1 + $0x120] sm:$0xff] }
  0x63   : > { %4798 = vmatprep.subr.bf16.mxu0 %v4797_v41 }
  0x64   : > { %3937 = vmatmul.mubr.f32.gmra.mrb[26].mxu1 %v5598_v45  ;;  %v3140_v45 = vld [vmem:[%s6480_s1 + $0x178] sm:$0xff] }
  0x65   : > { %4313 = vmatmul.mubr.f32.gmra.mrb[10].mxu0 %v5602_v46  ;;  %3939 = vmatprep.mubr.f32.mxu1 %v5605_v47  ;;  %v3139_v47 = vld [vmem:[%s6480_s1 + $0x170] sm:$0xff] }
  0x66   : > { %4315 = vmatprep.mubr.f32.mxu0 %v5608_v48  ;;  %4800 = vmatpush3.bf16.msra.mxu0 %v4797_v41  ;;  %v5688_v41 = vld [vmem:[%s5264_s29 + $0xfa] sm:$0xff]  ;;  %v4677_v39 = vpack.c.bf16 %v3140_v45, %v3139_v47  ;;  %v3268_v45 = vld [vmem:[%s5264_s29 + $0x18a] sm:$0xff] }
  0x67   : > { %4802 = vmatprep.subr.bf16.mxu0 %v4801_v50  ;;  %v5818_v47 = vld [vmem:[%s5264_s29 + $0xc0] sm:$0xff] }
  0x68   : > { %3940 = vmatmul.mubr.f32.gmra.mrb[28].mxu1 %v5620_v53  ;;  %v5782_v53 = vld [vmem:[%s5264_s29 + $0x16a] sm:$0xff]  ;;  %6551 = vst [vmem:[#allocation31_spill] sm:$0xff] %v5818_v47 }
  0x69   : > { %4316 = vmatmul.mubr.f32.gmra.mrb[12].mxu0 %v5624_v55  ;;  %3942 = vmatprep.mubr.f32.mxu1 %v5627_v56  ;;  %v3138_v56 = vld [vmem:[%s6480_s1 + $0x168] sm:$0xff] }
  0x6a   : > { %4318 = vmatprep.mubr.f32.mxu0 %v5630_v57  ;;  %4804 = vmatpush3.bf16.msra.mxu0 %v4801_v50  ;;  %v4657_v50 = vpack.c.bf16 %v3130_v33, %v3129_v32  ;;  %v5735_v32 = vld [vmem:[%s5264_s29 + $0x60] sm:$0xff]  ;;  %v4673_v31 = vpack.c.bf16 %v3138_v56, %v3137_v37  ;;  %v5798_v37 = vld [vmem:[%s5264_s29 + $0x172] sm:$0xff]  ;;  %v5801_v56 = vld [vmem:[%s5264_s29 + $0xa8] sm:$0xff] }
  0x6b   : > { %4806 = vmatprep.subr.bf16.mxu0 %v4805_v58  ;;  %6543 = vst [vmem:[#allocation23_spill] sm:$0xff] %v5735_v32  ;;  %v5738_v33 = vld [vmem:[%s5264_s29 + $0x13a] sm:$0xff]  ;;  %6549 = vst [vmem:[#allocation29_spill] sm:$0xff] %v5801_v56 }
  0x6c   : > { %3943 = vmatmul.mubr.f32.gmra.mrb[30].mxu1 %v5642_v63 }
  0x6d   : > { %4319 = vmatmul.mubr.f32.gmra.mrb[14].mxu0 %v5646_v0  ;;  %3977 = vmatprep.mubr.f32.mxu1 %v193_v1 }
  0x6e   : > { %4321 = vmatprep.mubr.f32.mxu0 %v5650_v6  ;;  %4808 = vmatpush3.bf16.msra.mxu0 %v4805_v58  ;;  %v5710_v58 = vld [vmem:[%s5264_s29 + $0x112] sm:$0xff] }
  0x6f   : > { %4810 = vmatprep.subr.bf16.mxu0 %v5652_v8 }
  0x70   : > { %3978 = vmatmul.mubr.f32.vlgmr.msra.gmra.mrb[0].mxu1 %v194_v16  ;;  %v5728_v16 = vld [vmem:[%s5264_s29 + $0x50] sm:$0xff] }
  0x71   : > { %4322 = vmatmul.mubr.f32.gmra.mrb[16].mxu0 %v5665_v18  ;;  %4652 = vmatpush3.bf16.msra.mxu1 %v5485_v2  ;;  %v3131_v2 = vld [vmem:[%s6480_s1 + $0x130] sm:$0xff]  ;;  %6542 = vst [vmem:[#allocation22_spill] sm:$0xff] %v5728_v16 }
  0x72   : > { %3980 = vmatprep.mubr.f32.mxu1 %v5668_v24  ;;  %4324 = vmatprep.mubr.f32.mxu0 %v5671_v25  ;;  %v4661_v1 = vpack.c.bf16 %v3132_v51, %v3131_v2  ;;  %v4665_v2 = vpack.c.bf16 %v3134_v15, %v3133_v9  ;;  %v3135_v51 = vld [vmem:[%s6480_s1 + $0x150] sm:$0xff]  ;;  %v5754_v9 = vld [vmem:[%s5264_s29 + $0x142] sm:$0xff]  ;;  %v5757_v15 = vld [vmem:[%s5264_s29 + $0x78] sm:$0xff] }
  0x73   : > { %4654 = vmatprep.subr.bf16.mxu1 %v4653_v26  ;;  %6545 = vst [vmem:[#allocation25_spill] sm:$0xff] %v5757_v15  ;;  %v4669_v63 = vpack.c.bf16 %v3136_v49, %v3135_v51  ;;  %v5776_v49 = vld [vmem:[%s5264_s29 + $0x15a] sm:$0xff]  ;;  %v5779_v51 = vld [vmem:[%s5264_s29 + $0x90] sm:$0xff] }
  0x74   : > { %3981 = vmatmul.mubr.f32.gmra.mrb[2].mxu1 %v5683_v34  ;;  %6547 = vst [vmem:[#allocation27_spill] sm:$0xff] %v5779_v51 }
  0x75   : > { %4325 = vmatmul.mubr.f32.gmra.mrb[18].mxu0 %v5688_v41  ;;  %3983 = vmatprep.mubr.f32.mxu1 %v5691_v42 }
  0x76   : > { %4327 = vmatprep.mubr.f32.mxu0 %v5694_v44  ;;  %4656 = vmatpush3.bf16.msra.mxu1 %v4653_v26  ;;  %v5732_v26 = vld [vmem:[%s5264_s29 + $0x12a] sm:$0xff] }
  0x77   : > { %4658 = vmatprep.subr.bf16.mxu1 %v4657_v50 }
  0x78   : > { %3984 = vmatmul.mubr.f32.gmra.mrb[4].mxu1 %v5706_v52 }
  0x79   : > { %4328 = vmatmul.mubr.f32.gmra.mrb[20].mxu0 %v5710_v58  ;;  %3986 = vmatprep.mubr.f32.mxu1 %v5713_v59 }
  0x7a   : > { %4330 = vmatprep.mubr.f32.mxu0 %v5716_v60  ;;  %4660 = vmatpush3.bf16.msra.mxu1 %v4657_v50  ;;  %v5750_v50 = vld [vmem:[%s5264_s29 + $0x68] sm:$0xff] }
  0x7b   : > { %4662 = vmatprep.subr.bf16.mxu1 %v4661_v1  ;;  %6544 = vst [vmem:[#allocation24_spill] sm:$0xff] %v5750_v50 }
  0x7c   : > { %3987 = vmatmul.mubr.f32.gmra.mrb[6].mxu1 %v5728_v16 }
  0x7d   : > { %4331 = vmatmul.mubr.f32.gmra.mrb[22].mxu0 %v5732_v26  ;;  %3989 = vmatprep.mubr.f32.mxu1 %v5735_v32 }
  0x7e   : > { %4333 = vmatprep.mubr.f32.mxu0 %v5738_v33  ;;  %4664 = vmatpush3.bf16.msra.mxu1 %v4661_v1  ;;  %v5772_v1 = vld [vmem:[%s5264_s29 + $0x80] sm:$0xff] }
  0x7f   : > { %4666 = vmatprep.subr.bf16.mxu1 %v4665_v2  ;;  %6546 = vst [vmem:[#allocation26_spill] sm:$0xff] %v5772_v1 }
  0x80   : > { %3990 = vmatmul.mubr.f32.gmra.mrb[8].mxu1 %v5750_v50 }
  0x81   : > { %4334 = vmatmul.mubr.f32.gmra.mrb[24].mxu0 %v5754_v9  ;;  %3992 = vmatprep.mubr.f32.mxu1 %v5757_v15 }
  0x82   : > { %4336 = vmatprep.mubr.f32.mxu0 %v5760_v43  ;;  %4668 = vmatpush3.bf16.msra.mxu1 %v4665_v2  ;;  %v5794_v2 = vld [vmem:[%s5264_s29 + $0x98] sm:$0xff] }
  0x83   : > { %4670 = vmatprep.subr.bf16.mxu1 %v4669_v63  ;;  %6548 = vst [vmem:[#allocation28_spill] sm:$0xff] %v5794_v2 }
  0x84   : > { %3993 = vmatmul.mubr.f32.gmra.mrb[10].mxu1 %v5772_v1 }
  0x85   : > { %4337 = vmatmul.mubr.f32.gmra.mrb[26].mxu0 %v5776_v49  ;;  %3995 = vmatprep.mubr.f32.mxu1 %v5779_v51 }
  0x86   : > { %4339 = vmatprep.mubr.f32.mxu0 %v5782_v53  ;;  %4672 = vmatpush3.bf16.msra.mxu1 %v4669_v63  ;;  %v5814_v63 = vld [vmem:[%s5264_s29 + $0xb0] sm:$0xff] }
  0x87   : > { %4674 = vmatprep.subr.bf16.mxu1 %v4673_v31  ;;  %6550 = vst [vmem:[#allocation30_spill] sm:$0xff] %v5814_v63 }
  0x88   : > { %3996 = vmatmul.mubr.f32.gmra.mrb[12].mxu1 %v5794_v2 }
  0x89   : > { %4340 = vmatmul.mubr.f32.gmra.mrb[28].mxu0 %v5798_v37  ;;  %3998 = vmatprep.mubr.f32.mxu1 %v5801_v56 }
  0x8a   : > { %4342 = vmatprep.mubr.f32.mxu0 %v3267_v23  ;;  %4676 = vmatpush3.bf16.msra.mxu1 %v4673_v31  ;;  %v5831_v23 = vld [vmem:[%s5264_s29 + $0xc8] sm:$0xff]  ;;  %v4813_v31 = vpack.c.bf16 %v3368_v12, %v3367_v27  ;;  %v5853_v12 = vld [vmem:[%s5264_s29 + $0xf0] sm:$0xff] }
  0x8b   : > { %4678 = vmatprep.subr.bf16.mxu1 %v4677_v39  ;;  %6552 = vst [vmem:[#allocation32_spill] sm:$0xff] %v5831_v23 }
  0x8c   : > { %3999 = vmatmul.mubr.f32.gmra.mrb[14].mxu1 %v5814_v63 }
  0x8d   : > { %4343 = vmatmul.mubr.f32.gmra.mrb[30].mxu0 %v3268_v45  ;;  %4001 = vmatprep.mubr.f32.mxu1 %v5818_v47  ;;  %v3370_v45 = vld [vmem:[%s6480_s1 + $0x3a8] sm:$0xff] }
  0x8e   : > { %4377 = vmatprep.mubr.f32.mxu0 %v5691_v42  ;;  %4680 = vmatpush3.bf16.msra.mxu1 %v4677_v39  ;;  %v5848_v39 = vld [vmem:[%s5264_s29 + $0xe0] sm:$0xff]  ;;  %v4817_v27 = vpack.c.bf16 %v3370_v45, %v3369_v36  ;;  %v5869_v36 = vld [vmem:[%s5264_s29 + $0x108] sm:$0xff] }
  0x8f   : > { %4682 = vmatprep.subr.bf16.mxu1 %v5820_v29  ;;  %v741_v42 = vld [vmem:[%s5264_s29 + $0xa] sm:$0xff] }
  0x90   : > { %4002 = vmatmul.mubr.f32.gmra.mrb[16].mxu1 %v5831_v23 }
  0x91   : > { %4378 = vmatmul.mubr.f32.vlgmr.msra.gmra.mrb[0].mxu0 %v5706_v52  ;;  %4004 = vmatprep.mubr.f32.mxu1 %v5835_v17  ;;  %v3371_v52 = vld [vmem:[%s6480_s1 + $0x3b0] sm:$0xff] }
  0x92   : > { %4812 = vmatpush3.bf16.msra.mxu0 %v5652_v8  ;;  %4380 = vmatprep.mubr.f32.mxu0 %v5713_v59  ;;  %v5865_v8 = vld [vmem:[%s5264_s29 + $0xf8] sm:$0xff]  ;;  %v4821_v45 = vpack.c.bf16 %v3372_v21, %v3371_v52  ;;  %v3373_v59 = vld [vmem:[%s6480_s1 + $0x3c0] sm:$0xff] }
  0x93   : > { %4814 = vmatprep.subr.bf16.mxu0 %v4813_v31  ;;  %v5885_v21 = vld [vmem:[%s5264_s29 + $0x120] sm:$0xff] }
  0x94   : > { %4005 = vmatmul.mubr.f32.gmra.mrb[18].mxu1 %v5848_v39 }
  0x95   : > { %4381 = vmatmul.mubr.f32.gmra.mrb[2].mxu0 %v5728_v16  ;;  %4007 = vmatprep.mubr.f32.mxu1 %v5853_v12  ;;  %v3374_v16 = vld [vmem:[%s6480_s1 + $0x3c8] sm:$0xff] }
  0x96   : > { %4383 = vmatprep.mubr.f32.mxu0 %v5735_v32  ;;  %4816 = vmatpush3.bf16.msra.mxu0 %v4813_v31  ;;  %v5881_v31 = vld [vmem:[%s5264_s29 + $0x110] sm:$0xff]  ;;  %v4825_v52 = vpack.c.bf16 %v3374_v16, %v3373_v59  ;;  %v5901_v59 = vld [vmem:[%s5264_s29 + $0x138] sm:$0xff] }
  0x97   : > { %4818 = vmatprep.subr.bf16.mxu0 %v4817_v27  ;;  %v3375_v32 = vld [vmem:[%s6480_s1 + $0x3d0] sm:$0xff] }
  0x98   : > { %4008 = vmatmul.mubr.f32.gmra.mrb[20].mxu1 %v5865_v8 }
  0x99   : > { %4384 = vmatmul.mubr.f32.gmra.mrb[4].mxu0 %v5750_v50  ;;  %4010 = vmatprep.mubr.f32.mxu1 %v5869_v36  ;;  %v3376_v50 = vld [vmem:[%s6480_s1 + $0x3d8] sm:$0xff] }
  0x9a   : > { %4386 = vmatprep.mubr.f32.mxu0 %v5757_v15  ;;  %4820 = vmatpush3.bf16.msra.mxu0 %v4817_v27  ;;  %v5897_v15 = vld [vmem:[%s5264_s29 + $0x128] sm:$0xff]  ;;  %v4829_v16 = vpack.c.bf16 %v3376_v50, %v3375_v32  ;;  %v3377_v27 = vld [vmem:[%s6480_s1 + $0x3e0] sm:$0xff]  ;;  %v5917_v32 = vld [vmem:[%s5264_s29 + $0x150] sm:$0xff] }
  0x9b   : > { %4822 = vmatprep.subr.bf16.mxu0 %v4821_v45 }
  0x9c   : > { %4011 = vmatmul.mubr.f32.gmra.mrb[22].mxu1 %v5881_v31 }
  0x9d   : > { %4387 = vmatmul.mubr.f32.gmra.mrb[6].mxu0 %v5772_v1  ;;  %4013 = vmatprep.mubr.f32.mxu1 %v5885_v21  ;;  %v3378_v1 = vld [vmem:[%s6480_s1 + $0x3e8] sm:$0xff] }
  0x9e   : > { %4389 = vmatprep.mubr.f32.mxu0 %v5779_v51  ;;  %4824 = vmatpush3.bf16.msra.mxu0 %v4821_v45  ;;  %v5913_v51 = vld [vmem:[%s5264_s29 + $0x140] sm:$0xff]  ;;  %v4833_v50 = vpack.c.bf16 %v3378_v1, %v3377_v27  ;;  %v3379_v45 = vld [vmem:[%s6480_s1 + $0x3f0] sm:$0xff]  ;;  %v5933_v1 = vld [vmem:[%s5264_s29 + $0x168] sm:$0xff] }
  0x9f   : > { %4826 = vmatprep.subr.bf16.mxu0 %v4825_v52  ;;  %v3413_v27 = vld [vmem:[%s6480_s1 + $0x400] sm:$0xff] }
  0xa0   : > { %4014 = vmatmul.mubr.f32.gmra.mrb[24].mxu1 %v5897_v15 }
  0xa1   : > { %4390 = vmatmul.mubr.f32.gmra.mrb[8].mxu0 %v5794_v2  ;;  %4016 = vmatprep.mubr.f32.mxu1 %v5901_v59  ;;  %v3380_v2 = vld [vmem:[%s6480_s1 + $0x3f8] sm:$0xff] }
  0xa2   : > { %4392 = vmatprep.mubr.f32.mxu0 %v5801_v56  ;;  %4828 = vmatpush3.bf16.msra.mxu0 %v4825_v52  ;;  %v5929_v56 = vld [vmem:[%s5264_s29 + $0x158] sm:$0xff]  ;;  %v4837_v52 = vpack.c.bf16 %v3380_v2, %v3379_v45  ;;  %v740_v2 = vld [vmem:[%s5264_s29 + $0x2] sm:$0xff]  ;;  %v3175_v45 = vld [vmem:[%s6480_s1 + $0x190] sm:$0xff] }
  0xa3   : > { %4830 = vmatprep.subr.bf16.mxu0 %v4829_v16 }
  0xa4   : > { %4017 = vmatmul.mubr.f32.gmra.mrb[26].mxu1 %v5913_v51 }
  0xa5   : > { %4393 = vmatmul.mubr.f32.gmra.mrb[10].mxu0 %v5814_v63  ;;  %4019 = vmatprep.mubr.f32.mxu1 %v5917_v32  ;;  %v3414_v63 = vld [vmem:[%s6480_s1 + $0x408] sm:$0xff] }
  0xa6   : > { %4395 = vmatprep.mubr.f32.mxu0 %v5818_v47  ;;  %4832 = vmatpush3.bf16.msra.mxu0 %v4829_v16  ;;  %v5945_v47 = vld [vmem:[%s5264_s29 + $0x170] sm:$0xff]  ;;  %v5949_v16 = vpack.c.bf16 %v3414_v63, %v3413_v27  ;;  %v3177_v63 = vld [vmem:[%s6480_s1 + $0x1a0] sm:$0xff]  ;;  %v3178_v27 = vld [vmem:[%s6480_s1 + $0x1a8] sm:$0xff] }
  0xa7   : > { %4834 = vmatprep.subr.bf16.mxu0 %v4833_v50 }
  0xa8   : > { %4020 = vmatmul.mubr.f32.gmra.mrb[28].mxu1 %v5929_v56 }
  0xa9   : > { %4396 = vmatmul.mubr.f32.gmra.mrb[12].mxu0 %v5831_v23  ;;  %4022 = vmatprep.mubr.f32.mxu1 %v5933_v1  ;;  %v3176_v23 = vld [vmem:[%s6480_s1 + $0x198] sm:$0xff] }
  0xaa   : > { %4398 = vmatprep.mubr.f32.mxu0 %v5835_v17  ;;  %4836 = vmatpush3.bf16.msra.mxu0 %v4833_v50  ;;  %v4685_v50 = vpack.c.bf16 %v3176_v23, %v3175_v45  ;;  %v4689_v23 = vpack.c.bf16 %v3178_v27, %v3177_v63  ;;  %v3186_v45 = vld [vmem:[%s6480_s1 + $0x1e8] sm:$0xff]  ;;  %v3188_v63 = vld [vmem:[%s6480_s1 + $0x1f8] sm:$0xff] }
  0xab   : > { %4838 = vmatprep.subr.bf16.mxu0 %v4837_v52  ;;  %v3315_v27 = vld [vmem:[%s5264_s29 + $0x198] sm:$0xff] }
  0xac   : > { %4023 = vmatmul.mubr.f32.gmra.mrb[30].mxu1 %v5945_v47 }
  0xad   : > { %4399 = vmatmul.mubr.f32.gmra.mrb[14].mxu0 %v5848_v39  ;;  %4057 = vmatprep.mubr.f32.mxu1 %v740_v2  ;;  %v3184_v2 = vld [vmem:[%s6480_s1 + $0x1d8] sm:$0xff] }
  0xae   : > { %4401 = vmatprep.mubr.f32.mxu0 %v5853_v12  ;;  %4840 = vmatpush3.bf16.msra.mxu0 %v4837_v52  ;;  %v3180_v52 = vld [vmem:[%s6480_s1 + $0x1b8] sm:$0xff] }
  0xaf   : > { %4842 = vmatprep.subr.bf16.mxu0 %v5949_v16 }
  0xb0   : > { %4058 = vmatmul.mubr.f32.vlgmr.msra.gmra.mrb[0].mxu1 %v741_v42  ;;  %v3179_v42 = vld [vmem:[%s6480_s1 + $0x1b0] sm:$0xff] }
  0xb1   : > { %4402 = vmatmul.mubr.f32.gmra.mrb[16].mxu0 %v5865_v8  ;;  %4684 = vmatpush3.bf16.msra.mxu1 %v5820_v29  ;;  %v3182_v29 = vld [vmem:[%s6480_s1 + $0x1c8] sm:$0xff] }
  0xb2   : > { %4060 = vmatprep.mubr.f32.mxu1 %v5477_v62  ;;  %4404 = vmatprep.mubr.f32.mxu0 %v5869_v36  ;;  %v4693_v62 = vpack.c.bf16 %v3180_v52, %v3179_v42  ;;  %v3415_v42 = vld [vmem:[%s6480_s1 + $0x410] sm:$0xff] }
  0xb3   : > { %4686 = vmatprep.subr.bf16.mxu1 %v4685_v50  ;;  %v3335_v52 = vld [vmem:[%s5264_s29 + $0x49] sm:$0xff] }
  0xb4   : > { %4061 = vmatmul.mubr.f32.gmra.mrb[2].mxu1 %v5491_v3  ;;  %v3181_v3 = vld [vmem:[%s6480_s1 + $0x1c0] sm:$0xff] }
  0xb5   : > { %4405 = vmatmul.mubr.f32.gmra.mrb[18].mxu0 %v5881_v31  ;;  %4063 = vmatprep.mubr.f32.mxu1 %v5497_v5  ;;  %v4697_v5 = vpack.c.bf16 %v3182_v29, %v3181_v3  ;;  %v3418_v3 = vld [vmem:[%s6480_s1 + $0x428] sm:$0xff] }
  0xb6   : > { %4407 = vmatprep.mubr.f32.mxu0 %v5885_v21  ;;  %4688 = vmatpush3.bf16.msra.mxu1 %v4685_v50  ;;  %v3187_v50 = vld [vmem:[%s6480_s1 + $0x1f0] sm:$0xff]  ;;  %v3337_v29 = vld [vmem:[%s5264_s29 + $0x61] sm:$0xff] }
  0xb7   : > { %4690 = vmatprep.subr.bf16.mxu1 %v4689_v23 }
  0xb8   : > { %4064 = vmatmul.mubr.f32.gmra.mrb[4].mxu1 %v5514_v11  ;;  %v3183_v11 = vld [vmem:[%s6480_s1 + $0x1d0] sm:$0xff] }
  0xb9   : > { %4408 = vmatmul.mubr.f32.gmra.mrb[20].mxu0 %v5897_v15  ;;  %4066 = vmatprep.mubr.f32.mxu1 %v5520_v14  ;;  %v4701_v14 = vpack.c.bf16 %v3184_v2, %v3183_v11  ;;  %v3420_v11 = vld [vmem:[%s6480_s1 + $0x438] sm:$0xff] }
  0xba   : > { %4410 = vmatprep.mubr.f32.mxu0 %v5901_v59  ;;  %4692 = vmatpush3.bf16.msra.mxu1 %v4689_v23  ;;  %v3316_v23 = vld [vmem:[%s5264_s29 + $0x1a0] sm:$0xff] }
  0xbb   : > { %4694 = vmatprep.subr.bf16.mxu1 %v4693_v62 }
  0xbc   : > { %4067 = vmatmul.mubr.f32.gmra.mrb[6].mxu1 %v5536_v20  ;;  %v3185_v20 = vld [vmem:[%s6480_s1 + $0x1e0] sm:$0xff] }
  0xbd   : > { %4411 = vmatmul.mubr.f32.gmra.mrb[22].mxu0 %v5913_v51  ;;  %4069 = vmatprep.mubr.f32.mxu1 %v5542_v22  ;;  %v6013_v22 = vld [vmem:[%s5264_s29 + $0x180] sm:$0xff] }
  0xbe   : > { %4413 = vmatprep.mubr.f32.mxu0 %v5917_v32  ;;  %4696 = vmatpush3.bf16.msra.mxu1 %v4693_v62 }
  0xbf   : > { %4698 = vmatprep.subr.bf16.mxu1 %v4697_v5 }
  0xc0   : > { %4070 = vmatmul.mubr.f32.gmra.mrb[8].mxu1 %v5558_v28  ;;  %v4705_v28 = vpack.c.bf16 %v3186_v45, %v3185_v20  ;;  %v3424_v45 = vld [vmem:[%s6480_s1 + $0x458] sm:$0xff] }
  0xc1   : > { %4414 = vmatmul.mubr.f32.gmra.mrb[24].mxu0 %v5929_v56  ;;  %4072 = vmatprep.mubr.f32.mxu1 %v5564_v30  ;;  %v6026_v30 = vld [vmem:[%s5264_s29 + $0x188] sm:$0xff] }
  0xc2   : > { %4416 = vmatprep.mubr.f32.mxu0 %v5933_v1  ;;  %4700 = vmatpush3.bf16.msra.mxu1 %v4697_v5  ;;  %v3419_v5 = vld [vmem:[%s6480_s1 + $0x430] sm:$0xff] }
  0xc3   : > { %4702 = vmatprep.subr.bf16.mxu1 %v4701_v14  ;;  %v4853_v2 = vpack.c.bf16 %v3420_v11, %v3419_v5  ;;  %v6150_v5 = vld [vmem:[%s5264_s29 + $0x189] sm:$0xff]  ;;  %v3363_v11 = vld [vmem:[%s5264_s29 + $0x199] sm:$0xff] }
  0xc4   : > { %4073 = vmatmul.mubr.f32.gmra.mrb[10].mxu1 %v5580_v38  ;;  %v4709_v38 = vpack.c.bf16 %v3188_v63, %v3187_v50  ;;  %v3426_v63 = vld [vmem:[%s6480_s1 + $0x468] sm:$0xff] }
  0xc5   : > { %4417 = vmatmul.mubr.f32.gmra.mrb[26].mxu0 %v5945_v47  ;;  %4075 = vmatprep.mubr.f32.mxu1 %v5586_v40  ;;  %v3333_v40 = vld [vmem:[%s5264_s29 + $0x31] sm:$0xff] }
  0xc6   : > { %4419 = vmatprep.mubr.f32.mxu0 %v6013_v22  ;;  %4704 = vmatpush3.bf16.msra.mxu1 %v4701_v14  ;;  %v3422_v14 = vld [vmem:[%s6480_s1 + $0x448] sm:$0xff] }
  0xc7   : > { %4706 = vmatprep.subr.bf16.mxu1 %v4705_v28 }
  0xc8   : > { %4076 = vmatmul.mubr.f32.gmra.mrb[12].mxu1 %v5602_v46  ;;  %v3416_v46 = vld [vmem:[%s6480_s1 + $0x418] sm:$0xff] }
  0xc9   : > { %4420 = vmatmul.mubr.f32.gmra.mrb[28].mxu0 %v6026_v30  ;;  %4078 = vmatprep.mubr.f32.mxu1 %v5608_v48  ;;  %v3334_v48 = vld [vmem:[%s5264_s29 + $0x39] sm:$0xff]  ;;  %v4845_v62 = vpack.c.bf16 %v3416_v46, %v3415_v42 }
  0xca   : > { %4422 = vmatprep.mubr.f32.mxu0 %v3315_v27  ;;  %4708 = vmatpush3.bf16.msra.mxu1 %v4705_v28  ;;  %v3343_v28 = vld [vmem:[%s5264_s29 + $0xa9] sm:$0xff]  ;;  %v3428_v27 = vld [vmem:[%s6480_s1 + $0x478] sm:$0xff]  ;;  %v6571_v46 = vld [vmem:[#allocation26_spill] sm:$0xff] }
  0xcb   : > { %4710 = vmatprep.subr.bf16.mxu1 %v4709_v38  ;;  %v6570_v42 = vld [vmem:[#allocation5_spill] sm:$0xff] }
  0xcc   : > { %4079 = vmatmul.mubr.f32.gmra.mrb[14].mxu1 %v5624_v55  ;;  %v3417_v55 = vld [vmem:[%s6480_s1 + $0x420] sm:$0xff] }
  0xcd   : > { %4423 = vmatmul.mubr.f32.gmra.mrb[30].mxu0 %v3316_v23  ;;  %4081 = vmatprep.mubr.f32.mxu1 %v5630_v57  ;;  %v3336_v57 = vld [vmem:[%s5264_s29 + $0x51] sm:$0xff] }
  0xce   : > { %4457 = vmatprep.mubr.f32.mxu0 %v3333_v40  ;;  %4712 = vmatpush3.bf16.msra.mxu1 %v4709_v38  ;;  %v6567_v38 = vld [vmem:[#allocation14_spill] sm:$0xff]  ;;  %v6568_v23 = vld [vmem:[#allocation25_spill] sm:$0xff]  ;;  %v6569_v40 = vld [vmem:[#allocation15_spill] sm:$0xff] }
  0xcf   : > { %4873 = vmatprep.subr.bf16.mxu1 %v5218_v7 }
  0xd0   : > { %4082 = vmatmul.mubr.f32.gmra.mrb[16].mxu1 %v5646_v0  ;;  %v4849_v0 = vpack.c.bf16 %v3418_v3, %v3417_v55  ;;  %v6142_v55 = vld [vmem:[%s5264_s29 + $0x181] sm:$0xff] }
  0xd1   : > { %4458 = vmatmul.mubr.f32.vlgmr.msra.gmra.mrb[0].mxu0 %v3334_v48  ;;  %4084 = vmatprep.mubr.f32.mxu1 %v5650_v6  ;;  %v3338_v6 = vld [vmem:[%s5264_s29 + $0x69] sm:$0xff]  ;;  %v6575_v3 = vld [vmem:[#allocation6_spill] sm:$0xff] }
  0xd2   : > { %4844 = vmatpush3.bf16.msra.mxu0 %v5949_v16  ;;  %4460 = vmatprep.mubr.f32.mxu0 %v3335_v52  ;;  %v3339_v16 = vld [vmem:[%s5264_s29 + $0x79] sm:$0xff]  ;;  %v6572_v48 = vld [vmem:[#allocation16_spill] sm:$0xff]  ;;  %v6573_v52 = vld [vmem:[#allocation27_spill] sm:$0xff] }
  0xd3   : > { %4846 = vmatprep.subr.bf16.mxu0 %v4845_v62 }
  0xd4   : > { %4085 = vmatmul.mubr.f32.gmra.mrb[18].mxu1 %v5665_v18  ;;  %v3421_v18 = vld [vmem:[%s6480_s1 + $0x440] sm:$0xff] }
  0xd5   : > { %4461 = vmatmul.mubr.f32.gmra.mrb[2].mxu0 %v3336_v57  ;;  %4087 = vmatprep.mubr.f32.mxu1 %v5671_v25  ;;  %v3340_v25 = vld [vmem:[%s5264_s29 + $0x81] sm:$0xff]  ;;  %v4857_v20 = vpack.c.bf16 %v3422_v14, %v3421_v18  ;;  %v6576_v57 = vld [vmem:[#allocation28_spill] sm:$0xff] }
  0xd6   : > { %4463 = vmatprep.mubr.f32.mxu0 %v3337_v29  ;;  %4848 = vmatpush3.bf16.msra.mxu0 %v4845_v62  ;;  %v6574_v62 = vld [vmem:[#allocation17_spill] sm:$0xff]  ;;  %v6577_v29 = vld [vmem:[#allocation18_spill] sm:$0xff] }
  0xd7   : > { %4850 = vmatprep.subr.bf16.mxu0 %v4849_v0  ;;  %v3364_v18 = vld [vmem:[%s5264_s29 + $0x1a1] sm:$0xff]  ;;  %v3381_v14 = vld [vmem:[%s5264_s29 + $0x32] sm:$0xff] }
  0xd8   : > { %4088 = vmatmul.mubr.f32.gmra.mrb[20].mxu1 %v5688_v41  ;;  %v3423_v41 = vld [vmem:[%s6480_s1 + $0x450] sm:$0xff] }
  0xd9   : > { %4464 = vmatmul.mubr.f32.gmra.mrb[4].mxu0 %v3338_v6  ;;  %4090 = vmatprep.mubr.f32.mxu1 %v5694_v44  ;;  %v3342_v44 = vld [vmem:[%s5264_s29 + $0x99] sm:$0xff]  ;;  %v4861_v50 = vpack.c.bf16 %v3424_v45, %v3423_v41  ;;  %v6579_v6 = vld [vmem:[#allocation7_spill] sm:$0xff] }
  0xda   : > { %4466 = vmatprep.mubr.f32.mxu0 %v3339_v16  ;;  %4852 = vmatpush3.bf16.msra.mxu0 %v4849_v0  ;;  %v6578_v0 = vld [vmem:[#allocation29_spill] sm:$0xff]  ;;  %v6580_v16 = vld [vmem:[#allocation30_spill] sm:$0xff]  ;;  %v3383_v45 = vld [vmem:[%s5264_s29 + $0x4a] sm:$0xff] }
  0xdb   : > { %4854 = vmatprep.subr.bf16.mxu0 %v4853_v2  ;;  %v3382_v41 = vld [vmem:[%s5264_s29 + $0x3a] sm:$0xff] }
  0xdc   : > { %4091 = vmatmul.mubr.f32.gmra.mrb[22].mxu1 %v5710_v58  ;;  %v3425_v58 = vld [vmem:[%s6480_s1 + $0x460] sm:$0xff] }
  0xdd   : > { %4467 = vmatmul.mubr.f32.gmra.mrb[6].mxu0 %v3340_v25  ;;  %4093 = vmatprep.mubr.f32.mxu1 %v5716_v60  ;;  %v4865_v60 = vpack.c.bf16 %v3426_v63, %v3425_v58  ;;  %v6582_v25 = vld [vmem:[#allocation8_spill] sm:$0xff]  ;;  %v3398_v58 = vld [vmem:[%s5264_s29 + $0xfa] sm:$0xff] }
  0xde   : > { %4469 = vmatprep.mubr.f32.mxu0 %v5426_v35  ;;  %4856 = vmatpush3.bf16.msra.mxu0 %v4853_v2  ;;  %v3344_v35 = vld [vmem:[%s5264_s29 + $0xb1] sm:$0xff]  ;;  %v6581_v2 = vld [vmem:[#allocation31_spill] sm:$0xff]  ;;  %v3208_v63 = vld [vmem:[%s5264_s29 + $0xf9] sm:$0xff] }
  0xdf   : > { %4858 = vmatprep.subr.bf16.mxu0 %v4857_v20 }
  0xe0   : > { %4094 = vmatmul.mubr.f32.gmra.mrb[24].mxu1 %v5732_v26  ;;  %v3427_v26 = vld [vmem:[%s6480_s1 + $0x470] sm:$0xff] }
  0xe1   : > { %4470 = vmatmul.mubr.f32.gmra.mrb[8].mxu0 %v3342_v44  ;;  %4096 = vmatprep.mubr.f32.mxu1 %v5738_v33  ;;  %v4869_v33 = vpack.c.bf16 %v3428_v27, %v3427_v26  ;;  %v3384_v44 = vld [vmem:[%s5264_s29 + $0x52] sm:$0xff]  ;;  %v3402_v27 = vld [vmem:[%s5264_s29 + $0x12a] sm:$0xff] }
  0xe2   : > { %4472 = vmatprep.mubr.f32.mxu0 %v3343_v28  ;;  %4860 = vmatpush3.bf16.msra.mxu0 %v4857_v20  ;;  %v6583_v20 = vld [vmem:[#allocation32_spill] sm:$0xff]  ;;  %v3385_v28 = vld [vmem:[%s5264_s29 + $0x62] sm:$0xff] }
  0xe3   : > { %4862 = vmatprep.subr.bf16.mxu0 %v4861_v50  ;;  %v3210_v26 = vld [vmem:[%s5264_s29 + $0x111] sm:$0xff] }
  0xe4   : > { %4097 = vmatmul.mubr.f32.gmra.mrb[26].mxu1 %v5754_v9  ;;  %v6564_v9 = vld [vmem:[#allocation13_spill] sm:$0xff] }
  0xe5   : > { %4473 = vmatmul.mubr.f32.gmra.mrb[10].mxu0 %v3344_v35  ;;  %4099 = vmatprep.mubr.f32.mxu1 %v5760_v43  ;;  %v6553_v43 = vld [vmem:[#allocation19_spill] sm:$0xff]  ;;  %v3400_v35 = vld [vmem:[%s5264_s29 + $0x112] sm:$0xff] }
  0xe6   : > { %4475 = vmatprep.mubr.f32.mxu0 %v5458_v54  ;;  %4864 = vmatpush3.bf16.msra.mxu0 %v4861_v50  ;;  %v6554_v54 = vld [vmem:[#allocation9_spill] sm:$0xff] }
  0xe7   : > { %4866 = vmatprep.subr.bf16.mxu0 %v4865_v60  ;;  %v3387_v50 = vld [vmem:[%s5264_s29 + $0x7a] sm:$0xff] }
  0xe8   : > { %4100 = vmatmul.mubr.f32.gmra.mrb[28].mxu1 %v5776_v49  ;;  %v6565_v49 = vld [vmem:[#allocation4_spill] sm:$0xff] }
  0xe9   : > { %4476 = vmatmul.mubr.f32.gmra.mrb[12].mxu0 %v5474_v61  ;;  %4102 = vmatprep.mubr.f32.mxu1 %v5782_v53  ;;  %v6555_v61 = vld [vmem:[#allocation2_spill] sm:$0xff]  ;;  %v6558_v53 = vld [vmem:[#allocation21_spill] sm:$0xff] }
  0xea   : > { %4478 = vmatprep.mubr.f32.mxu0 %v5494_v4  ;;  %4868 = vmatpush3.bf16.msra.mxu0 %v4865_v60  ;;  %v6556_v4 = vld [vmem:[#allocation20_spill] sm:$0xff]  ;;  %v3401_v60 = vld [vmem:[%s5264_s29 + $0x122] sm:$0xff] }
  0xeb   : > { %4870 = vmatprep.subr.bf16.mxu0 %v4869_v33 }
  0xec   : > { %4103 = vmatmul.mubr.f32.gmra.mrb[30].mxu1 %v5798_v37  ;;  %v6566_v37 = vld [vmem:[#allocation24_spill] sm:$0xff] }
  0xed   : > { %4479 = vmatmul.mubr.f32.gmra.mrb[14].mxu0 %v5510_v10  ;;  %4137 = vmatprep.mubr.f32.mxu1 %v5668_v24  ;;  %v6557_v10 = vld [vmem:[#allocation10_spill] sm:$0xff]  ;;  %v6560_v24 = vld [vmem:[#allocation3_spill] sm:$0xff] }
  0xee   : > { %4481 = vmatprep.mubr.f32.mxu0 %v5517_v13  ;;  %4872 = vmatpush3.bf16.msra.mxu0 %v4869_v33  ;;  %v6559_v13 = vld [vmem:[#allocation11_spill] sm:$0xff] }
  0xef   : > { %v3211_v33 = vld [vmem:[%s5264_s29 + $0x121] sm:$0xff] }
  0xf0   : > { %4138 = vmatmul.mubr.f32.vlgmr.msra.gmra.mrb[0].mxu1 %v5683_v34  ;;  %v6563_v34 = vld [vmem:[#allocation23_spill] sm:$0xff] }
  0xf1   : > { %4482 = vmatmul.mubr.f32.gmra.mrb[16].mxu0 %v5532_v19  ;;  %4881 = vmatpush3.bf16.msra.mxu1 %v5218_v7  ;;  %v6561_v19 = vld [vmem:[#allocation22_spill] sm:$0xff]  ;;  %v6562_v7 = vld [vmem:[#allocation12_spill] sm:$0xff] }
  0xf2   : > { %4140 = vmatprep.mubr.f32.mxu1 %v6553_v43  ;;  %4484 = vmatprep.mubr.f32.mxu0 %v6554_v54  ;;  %v3403_v43 = vld [vmem:[%s5264_s29 + $0x13a] sm:$0xff]  ;;  %v3212_v54 = vld [vmem:[%s5264_s29 + $0x129] sm:$0xff] }
  0xf3   : > { %4874 = vmatprep.subr.bf16.mxu1 %v6555_v61 }
  0xf4   : > { %4141 = vmatmul.mubr.f32.gmra.mrb[2].mxu1 %v6556_v4  ;;  %v3213_v4 = vld [vmem:[%s5264_s29 + $0x139] sm:$0xff] }
  0xf5   : > { %4485 = vmatmul.mubr.f32.gmra.mrb[18].mxu0 %v6557_v10  ;;  %4143 = vmatprep.mubr.f32.mxu1 %v6558_v53  ;;  %v3405_v10 = vld [vmem:[%s5264_s29 + $0x152] sm:$0xff]  ;;  %v3214_v53 = vld [vmem:[%s5264_s29 + $0x141] sm:$0xff] }
  0xf6   : > { %4487 = vmatprep.mubr.f32.mxu0 %v6559_v13  ;;  %4882 = vmatpush3.bf16.msra.mxu1 %v6555_v61  ;;  %v3404_v61 = vld [vmem:[%s5264_s29 + $0x142] sm:$0xff]  ;;  %v3406_v13 = vld [vmem:[%s5264_s29 + $0x15a] sm:$0xff] }
  0xf7   : > { %4875 = vmatprep.subr.bf16.mxu1 %v6560_v24 }
  0xf8   : > { %4144 = vmatmul.mubr.f32.gmra.mrb[4].mxu1 %v6561_v19  ;;  %v3407_v19 = vld [vmem:[%s5264_s29 + $0x16a] sm:$0xff] }
  0xf9   : > { %4488 = vmatmul.mubr.f32.gmra.mrb[20].mxu0 %v6562_v7  ;;  %4146 = vmatprep.mubr.f32.mxu1 %v6563_v34  ;;  %v3216_v7 = vld [vmem:[%s5264_s29 + $0x159] sm:$0xff] }
  0xfa   : > { %4490 = vmatprep.mubr.f32.mxu0 %v6564_v9  ;;  %4883 = vmatpush3.bf16.msra.mxu1 %v6560_v24  ;;  %v3215_v24 = vld [vmem:[%s5264_s29 + $0x151] sm:$0xff]  ;;  %v3217_v9 = vld [vmem:[%s5264_s29 + $0x169] sm:$0xff] }
  0xfb   : > { %4876 = vmatprep.subr.bf16.mxu1 %v6565_v49  ;;  %v3408_v34 = vld [vmem:[%s5264_s29 + $0x172] sm:$0xff] }
  0xfc   : > { %4147 = vmatmul.mubr.f32.gmra.mrb[6].mxu1 %v6566_v37  ;;  %v3218_v37 = vld [vmem:[%s5264_s29 + $0x171] sm:$0xff] }
  0xfd   : > { %4491 = vmatmul.mubr.f32.gmra.mrb[22].mxu0 %v6567_v38  ;;  %4149 = vmatprep.mubr.f32.mxu1 %v6568_v23  ;;  %v3410_v38 = vld [vmem:[%s5264_s29 + $0x18a] sm:$0xff]  ;;  %v3411_v23 = vld [vmem:[%s5264_s29 + $0x19a] sm:$0xff] }
  0xfe   : > { %4493 = vmatprep.mubr.f32.mxu0 %v6569_v40  ;;  %4884 = vmatpush3.bf16.msra.mxu1 %v6565_v49  ;;  %v3409_v49 = vld [vmem:[%s5264_s29 + $0x182] sm:$0xff] }
  0xff   : > { %4877 = vmatprep.subr.bf16.mxu1 %v6570_v42  ;;  %v3412_v40 = vld [vmem:[%s5264_s29 + $0x1a2] sm:$0xff] }
 0x100   : > { %4150 = vmatmul.mubr.f32.gmra.mrb[8].mxu1 %v6571_v46 }
 0x101   : > { %4494 = vmatmul.mubr.f32.gmra.mrb[24].mxu0 %v6572_v48  ;;  %4152 = vmatprep.mubr.f32.mxu1 %v6573_v52 }
 0x102   : > { %4496 = vmatprep.mubr.f32.mxu0 %v6574_v62  ;;  %4885 = vmatpush3.bf16.msra.mxu1 %v6570_v42 }
 0x103   : > { %4878 = vmatprep.subr.bf16.mxu1 %v6575_v3 }
 0x104   : > { %4153 = vmatmul.mubr.f32.gmra.mrb[10].mxu1 %v6576_v57 }
 0x105   : > { %4497 = vmatmul.mubr.f32.gmra.mrb[26].mxu0 %v6577_v29  ;;  %4155 = vmatprep.mubr.f32.mxu1 %v6578_v0 }
 0x106   : > { %4499 = vmatprep.mubr.f32.mxu0 %v6142_v55  ;;  %4886 = vmatpush3.bf16.msra.mxu1 %v6575_v3 }
 0x107   : > { %4879 = vmatprep.subr.bf16.mxu1 %v6579_v6 }
 0x108   : > { %4156 = vmatmul.mubr.f32.gmra.mrb[12].mxu1 %v6580_v16 }
 0x109   : > { %4500 = vmatmul.mubr.f32.gmra.mrb[28].mxu0 %v6150_v5  ;;  %4158 = vmatprep.mubr.f32.mxu1 %v6581_v2 }
 0x10a   : > { %4502 = vmatprep.mubr.f32.mxu0 %v3363_v11  ;;  %4887 = vmatpush3.bf16.msra.mxu1 %v6579_v6 }
 0x10b   : > { %4880 = vmatprep.subr.bf16.mxu1 %v6582_v25 }
 0x10c   : > { %4159 = vmatmul.mubr.f32.gmra.mrb[14].mxu1 %v6583_v20 }
 0x10d   : > { %4503 = vmatmul.mubr.f32.gmra.mrb[30].mxu0 %v3364_v18  ;;  %4161 = vmatprep.mubr.f32.mxu1 %v5835_v17  ;;  %v3386_v17 = vld [vmem:[%s5264_s29 + $0x6a] sm:$0xff] }
 0x10e   : > { %4537 = vmatprep.mubr.f32.mxu0 %v3381_v14  ;;  %4888 = vmatpush3.bf16.msra.mxu1 %v6582_v25 }
 0x110   : > { %4162 = vmatmul.mubr.f32.gmra.mrb[16].mxu1 %v5848_v39  ;;  %v3388_v39 = vld [vmem:[%s5264_s29 + $0x82] sm:$0xff] }
 0x111   : > { %4538 = vmatmul.mubr.f32.vlgmr.msra.gmra.mrb[0].mxu0 %v3382_v41  ;;  %4164 = vmatprep.mubr.f32.mxu1 %v5853_v12  ;;  %v3389_v12 = vld [vmem:[%s5264_s29 + $0x92] sm:$0xff] }
 0x112   : > { %4540 = vmatprep.mubr.f32.mxu0 %v3383_v45 }
 0x114   : > { %4165 = vmatmul.mubr.f32.gmra.mrb[18].mxu1 %v5865_v8  ;;  %v3390_v8 = vld [vmem:[%s5264_s29 + $0x9a] sm:$0xff] }
 0x115   : > { %4541 = vmatmul.mubr.f32.gmra.mrb[2].mxu0 %v3384_v44  ;;  %4167 = vmatprep.mubr.f32.mxu1 %v5869_v36  ;;  %v3391_v36 = vld [vmem:[%s5264_s29 + $0xaa] sm:$0xff] }
 0x116   : > { %4543 = vmatprep.mubr.f32.mxu0 %v3385_v28 }
 0x118   : > { %4168 = vmatmul.mubr.f32.gmra.mrb[20].mxu1 %v5881_v31  ;;  %v3392_v31 = vld [vmem:[%s5264_s29 + $0xb2] sm:$0xff] }
 0x119   : > { %4544 = vmatmul.mubr.f32.gmra.mrb[4].mxu0 %v3386_v17  ;;  %4170 = vmatprep.mubr.f32.mxu1 %v5885_v21  ;;  %v3393_v21 = vld [vmem:[%s5264_s29 + $0xc2] sm:$0xff] }
 0x11a   : > { %4546 = vmatprep.mubr.f32.mxu0 %v3387_v50 }
 0x11c   : > { %4171 = vmatmul.mubr.f32.gmra.mrb[22].mxu1 %v5897_v15  ;;  %v3394_v15 = vld [vmem:[%s5264_s29 + $0xca] sm:$0xff] }
 0x11d   : > { %4547 = vmatmul.mubr.f32.gmra.mrb[6].mxu0 %v3388_v39  ;;  %4173 = vmatprep.mubr.f32.mxu1 %v5901_v59  ;;  %v3396_v59 = vld [vmem:[%s5264_s29 + $0xe2] sm:$0xff] }
 0x11e   : > { %4549 = vmatprep.mubr.f32.mxu0 %v3389_v12 }
 0x120   : > { %4174 = vmatmul.mubr.f32.gmra.mrb[24].mxu1 %v5913_v51  ;;  %v3395_v51 = vld [vmem:[%s5264_s29 + $0xda] sm:$0xff] }
 0x121   : > { %4550 = vmatmul.mubr.f32.gmra.mrb[8].mxu0 %v3390_v8  ;;  %4176 = vmatprep.mubr.f32.mxu1 %v5917_v32  ;;  %v3397_v32 = vld [vmem:[%s5264_s29 + $0xf2] sm:$0xff] }
 0x122   : > { %4552 = vmatprep.mubr.f32.mxu0 %v3391_v36 }
 0x124   : > { %4177 = vmatmul.mubr.f32.gmra.mrb[26].mxu1 %v5929_v56  ;;  %v3205_v56 = vld [vmem:[%s5264_s29 + $0xd9] sm:$0xff] }
 0x125   : > { %4553 = vmatmul.mubr.f32.gmra.mrb[10].mxu0 %v3392_v31  ;;  %4179 = vmatprep.mubr.f32.mxu1 %v5933_v1  ;;  %v3206_v1 = vld [vmem:[%s5264_s29 + $0xe1] sm:$0xff] }
 0x126   : > { %4555 = vmatprep.mubr.f32.mxu0 %v3393_v21 }
 0x128   : > { %4180 = vmatmul.mubr.f32.gmra.mrb[28].mxu1 %v5945_v47  ;;  %v3207_v47 = vld [vmem:[%s5264_s29 + $0xf1] sm:$0xff] }
 0x129   : > { %4556 = vmatmul.mubr.f32.gmra.mrb[12].mxu0 %v3394_v15  ;;  %4182 = vmatprep.mubr.f32.mxu1 %v6013_v22  ;;  %v3399_v22 = vld [vmem:[%s5264_s29 + $0x10a] sm:$0xff] }
 0x12a   : > { %4558 = vmatprep.mubr.f32.mxu0 %v3395_v51 }
 0x12c   : > { %4183 = vmatmul.mubr.f32.gmra.mrb[30].mxu1 %v6026_v30  ;;  %v3209_v30 = vld [vmem:[%s5264_s29 + $0x109] sm:$0xff]  ;;  %s3432_s29 = sshll.u32 %s5230_s9, 8 }
 0x12d   : > { %4559 = vmatmul.mubr.f32.gmra.mrb[14].mxu0 %v3396_v59  ;;  %4241 = vmatprep.mubr.f32.mxu1 %v3205_v56  ;;  %s6231_s23 = scalar_lea.vmem %s6481_s2, %s3432_s29 }
 0x12e   : > { %4561 = vmatprep.mubr.f32.mxu0 %v3397_v32 }
 0x130   : > { %4242 = vmatmul.mubr.f32.vlgmr.msra.gmra.mrb[16].mxu1 %v3206_v1 }
 0x131   : > { %4562 = vmatmul.mubr.f32.gmra.mrb[16].mxu0 %v3398_v58  ;;  %4244 = vmatprep.mubr.f32.mxu1 %v3207_v47 }
 0x132   : > { %4564 = vmatprep.mubr.f32.mxu0 %v3399_v22 }
 0x134   : > { %4245 = vmatmul.mubr.f32.gmra.mrb[18].mxu1 %v3208_v63 }
 0x135   : > { %4565 = vmatmul.mubr.f32.gmra.mrb[18].mxu0 %v3400_v35  ;;  %4247 = vmatprep.mubr.f32.mxu1 %v3209_v30 }
 0x136   : > { %4567 = vmatprep.mubr.f32.mxu0 %v3401_v60 }
 0x138   : > { %4248 = vmatmul.mubr.f32.gmra.mrb[20].mxu1 %v3210_v26 }
 0x139   : > { %4568 = vmatmul.mubr.f32.gmra.mrb[20].mxu0 %v3402_v27  ;;  %4250 = vmatprep.mubr.f32.mxu1 %v3211_v33 }
 0x13a   : > { %4570 = vmatprep.mubr.f32.mxu0 %v3403_v43 }
 0x13c   : > { %4251 = vmatmul.mubr.f32.gmra.mrb[22].mxu1 %v3212_v54 }
 0x13d   : > { %4571 = vmatmul.mubr.f32.gmra.mrb[22].mxu0 %v3404_v61  ;;  %4253 = vmatprep.mubr.f32.mxu1 %v3213_v4 }
 0x13e   : > { %4573 = vmatprep.mubr.f32.mxu0 %v3405_v10 }
 0x140   : > { %4254 = vmatmul.mubr.f32.gmra.mrb[24].mxu1 %v3214_v53 }
 0x141   : > { %4574 = vmatmul.mubr.f32.gmra.mrb[24].mxu0 %v3406_v13  ;;  %4256 = vmatprep.mubr.f32.mxu1 %v3215_v24 }
 0x142   : > { %4576 = vmatprep.mubr.f32.mxu0 %v3407_v19 }
 0x144   : > { %4257 = vmatmul.mubr.f32.gmra.mrb[26].mxu1 %v3216_v7 }
 0x145   : > { %4577 = vmatmul.mubr.f32.gmra.mrb[26].mxu0 %v3408_v34  ;;  %4259 = vmatprep.mubr.f32.mxu1 %v3217_v9 }
 0x146   : > { %4579 = vmatprep.mubr.f32.mxu0 %v3409_v49 }
 0x148   : > { %4260 = vmatmul.mubr.f32.gmra.mrb[28].mxu1 %v3218_v37 }
 0x149   : > { %4580 = vmatmul.mubr.f32.gmra.mrb[28].mxu0 %v3410_v38  ;;  %4262 = vmatprep.mubr.f32.mxu1 %v6142_v55 }
 0x14a   : > { %4582 = vmatprep.mubr.f32.mxu0 %v3411_v23 }
 0x14c   : > { %4263 = vmatmul.mubr.f32.gmra.mrb[30].mxu1 %v6150_v5 }
 0x14d   : > { %4583 = vmatmul.mubr.f32.gmra.mrb[30].mxu0 %v3412_v40 }
 0x1c3   : > { %v4139_v42 = vpop.f32.mrb[0].mxu1 }
 0x1c4   : > { %v1162_v46 = vpop.f32.mrb[1].mxu1 }
 0x1c7   : > { %v4142_v48 = vpop.f32.mrb[2].mxu1 }
 0x1c8   : > { %v1172_v52 = vpop.f32.mrb[3].mxu1 }
 0x1cb   : > { %v4145_v62 = vpop.f32.mrb[4].mxu1 }
 0x1cc   : > { %v1182_v3 = vpop.f32.mrb[5].mxu1 }
 0x1cf   : > { %v4148_v57 = vpop.f32.mrb[6].mxu1 }
 0x1d0   : > { %v1192_v29 = vpop.f32.mrb[7].mxu1 }
 0x1d3   : > { %v4151_v0 = vpop.f32.mrb[8].mxu1 }
 0x1d4   : > { %v1202_v11 = vpop.f32.mrb[9].mxu1 }
 0x1d7   : > { %v4154_v6 = vpop.f32.mrb[10].mxu1 }
 0x1d8   : > { %v1212_v16 = vpop.f32.mrb[11].mxu1 }
 0x1db   : > { %v4157_v2 = vpop.f32.mrb[12].mxu1 }
 0x1dc   : > { %v1222_v55 = vpop.f32.mrb[13].mxu1 }
 0x1df   : > { %v4160_v18 = vpop.f32.mrb[14].mxu1 }
 0x1e0   : > { %v1232_v14 = vpop.f32.mrb[15].mxu1 }
 0x1e4   : > { %v4539_v5 = vpop.f32.mrb[0].mxu0 }
 0x1e5   : > { %v6233_v25 = vadd.f32 %v4539_v5, %v4139_v42  ;;  %v2693_v20 = vpop.f32.mrb[1].mxu0 }
 0x1e6   : > { %v6235_v41 = vadd.f32 %v2693_v20, %v1162_v46 }
 0x1e7   : > { %2885 = vst [vmem:[%s6231_s23 + $0x8] sm:$0xff] %v6233_v25 }
 0x1e8   : > { %2884 = vst [vmem:[%s6231_s23] sm:$0xff] %v6235_v41  ;;  %v4542_v45 = vpop.f32.mrb[2].mxu0 }
 0x1e9   : > { %v6241_v44 = vadd.f32 %v4542_v45, %v4142_v48  ;;  %v2703_v28 = vpop.f32.mrb[3].mxu0 }
 0x1ea   : > { %v6243_v17 = vadd.f32 %v2703_v28, %v1172_v52 }
 0x1eb   : > { %2887 = vst [vmem:[%s6231_s23 + $0x18] sm:$0xff] %v6241_v44 }
 0x1ec   : > { %2886 = vst [vmem:[%s6231_s23 + $0x10] sm:$0xff] %v6243_v17  ;;  %v4545_v50 = vpop.f32.mrb[4].mxu0 }
 0x1ed   : > { %v6249_v39 = vadd.f32 %v4545_v50, %v4145_v62  ;;  %v2713_v12 = vpop.f32.mrb[5].mxu0 }
 0x1ee   : > { %v6251_v8 = vadd.f32 %v2713_v12, %v1182_v3 }
 0x1ef   : > { %2889 = vst [vmem:[%s6231_s23 + $0x28] sm:$0xff] %v6249_v39 }
 0x1f0   : > { %2888 = vst [vmem:[%s6231_s23 + $0x20] sm:$0xff] %v6251_v8  ;;  %v4548_v36 = vpop.f32.mrb[6].mxu0 }
 0x1f1   : > { %v6257_v31 = vadd.f32 %v4548_v36, %v4148_v57  ;;  %v2723_v21 = vpop.f32.mrb[7].mxu0 }
 0x1f2   : > { %v6259_v15 = vadd.f32 %v2723_v21, %v1192_v29 }
 0x1f3   : > { %2891 = vst [vmem:[%s6231_s23 + $0x38] sm:$0xff] %v6257_v31 }
 0x1f4   : > { %2890 = vst [vmem:[%s6231_s23 + $0x30] sm:$0xff] %v6259_v15  ;;  %v4551_v51 = vpop.f32.mrb[8].mxu0 }
 0x1f5   : > { %v6265_v59 = vadd.f32 %v4551_v51, %v4151_v0  ;;  %v2733_v56 = vpop.f32.mrb[9].mxu0 }
 0x1f6   : > { %v6267_v32 = vadd.f32 %v2733_v56, %v1202_v11 }
 0x1f7   : > { %2893 = vst [vmem:[%s6231_s23 + $0x48] sm:$0xff] %v6265_v59 }
 0x1f8   : > { %2892 = vst [vmem:[%s6231_s23 + $0x40] sm:$0xff] %v6267_v32  ;;  %v4554_v1 = vpop.f32.mrb[10].mxu0 }
 0x1f9   : > { %v6273_v58 = vadd.f32 %v4554_v1, %v4154_v6  ;;  %v2743_v47 = vpop.f32.mrb[11].mxu0 }
 0x1fa   : > { %v6275_v22 = vadd.f32 %v2743_v47, %v1212_v16 }
 0x1fb   : > { %2895 = vst [vmem:[%s6231_s23 + $0x58] sm:$0xff] %v6273_v58 }
 0x1fc   : > { %2894 = vst [vmem:[%s6231_s23 + $0x50] sm:$0xff] %v6275_v22  ;;  %v4557_v63 = vpop.f32.mrb[12].mxu0 }
 0x1fd   : > { %v6281_v35 = vadd.f32 %v4557_v63, %v4157_v2  ;;  %v2753_v30 = vpop.f32.mrb[13].mxu0 }
 0x1fe   : > { %v6283_v60 = vadd.f32 %v2753_v30, %v1222_v55 }
 0x1ff   : > { %2897 = vst [vmem:[%s6231_s23 + $0x68] sm:$0xff] %v6281_v35 }
 0x200   : > { %2896 = vst [vmem:[%s6231_s23 + $0x60] sm:$0xff] %v6283_v60  ;;  %v4560_v26 = vpop.f32.mrb[14].mxu0 }
 0x201   : > { %v6289_v27 = vadd.f32 %v4560_v26, %v4160_v18  ;;  %v2763_v33 = vpop.f32.mrb[15].mxu0 }
 0x202   : > { %v6291_v43 = vadd.f32 %v2763_v33, %v1232_v14 }
 0x203   : > { %2899 = vst [vmem:[%s6231_s23 + $0x78] sm:$0xff] %v6289_v27  ;;  %v4243_v54 = vpop.f32.mrb[16].mxu1 }
 0x204   : > { %2898 = vst [vmem:[%s6231_s23 + $0x70] sm:$0xff] %v6291_v43  ;;  %v4563_v61 = vpop.f32.mrb[16].mxu0  ;;  %v1548_v4 = vpop.f32.mrb[17].mxu1 }
 0x205   : > { %v6297_v10 = vadd.f32 %v4563_v61, %v4243_v54  ;;  %v2773_v53 = vpop.f32.mrb[17].mxu0  ;;  %v5163_v54 = vmov (!%p3429_p4), 0.0  }
 0x206   : > { %v6299_v13 = vadd.f32 %v2773_v53, %v1548_v4  ;;  %2920 = vst [vmem:[%s6482_s3] sm:$0x1] (!%p3429_p4), %v5163_v54  ;;  %2921 = vst [vmem:[%s6483_s4] sm:$0x1] (!%p3429_p4), %v5163_v54 }
 0x207   : > { %2901 = vst [vmem:[%s6231_s23 + $0x88] sm:$0xff] %v6297_v10  ;;  %v4246_v24 = vpop.f32.mrb[18].mxu1 }
 0x208   : > { %2900 = vst [vmem:[%s6231_s23 + $0x80] sm:$0xff] %v6299_v13  ;;  %v4566_v19 = vpop.f32.mrb[18].mxu0  ;;  %v1558_v7 = vpop.f32.mrb[19].mxu1 }
 0x209   : > { %v6305_v34 = vadd.f32 %v4566_v19, %v4246_v24  ;;  %v2783_v9 = vpop.f32.mrb[19].mxu0 }
 0x20a   : > { %v6307_v49 = vadd.f32 %v2783_v9, %v1558_v7 }
 0x20b   : > { %2903 = vst [vmem:[%s6231_s23 + $0x98] sm:$0xff] %v6305_v34  ;;  %v4249_v37 = vpop.f32.mrb[20].mxu1 }
 0x20c   : > { %2902 = vst [vmem:[%s6231_s23 + $0x90] sm:$0xff] %v6307_v49  ;;  %v4569_v38 = vpop.f32.mrb[20].mxu0  ;;  %v1568_v23 = vpop.f32.mrb[21].mxu1 }
 0x20d   : > { %v6313_v40 = vadd.f32 %v4569_v38, %v4249_v37  ;;  %v2793_v42 = vpop.f32.mrb[21].mxu0 }
 0x20e   : > { %v6315_v46 = vadd.f32 %v2793_v42, %v1568_v23 }
 0x20f   : > { %2905 = vst [vmem:[%s6231_s23 + $0xa8] sm:$0xff] %v6313_v40  ;;  %v4252_v48 = vpop.f32.mrb[22].mxu1 }
 0x210   : > { %2904 = vst [vmem:[%s6231_s23 + $0xa0] sm:$0xff] %v6315_v46  ;;  %v4572_v52 = vpop.f32.mrb[22].mxu0  ;;  %v1578_v62 = vpop.f32.mrb[23].mxu1 }
 0x211   : > { %v6321_v3 = vadd.f32 %v4572_v52, %v4252_v48  ;;  %v2803_v57 = vpop.f32.mrb[23].mxu0 }
 0x212   : > { %v6323_v29 = vadd.f32 %v2803_v57, %v1578_v62 }
 0x213   : > { %2907 = vst [vmem:[%s6231_s23 + $0xb8] sm:$0xff] %v6321_v3  ;;  %v4255_v0 = vpop.f32.mrb[24].mxu1 }
 0x214   : > { %2906 = vst [vmem:[%s6231_s23 + $0xb0] sm:$0xff] %v6323_v29  ;;  %v4575_v11 = vpop.f32.mrb[24].mxu0  ;;  %v1588_v6 = vpop.f32.mrb[25].mxu1 }
 0x215   : > { %v6329_v16 = vadd.f32 %v4575_v11, %v4255_v0  ;;  %v2813_v2 = vpop.f32.mrb[25].mxu0 }
 0x216   : > { %v6331_v55 = vadd.f32 %v2813_v2, %v1588_v6 }
 0x217   : > { %2909 = vst [vmem:[%s6231_s23 + $0xc8] sm:$0xff] %v6329_v16  ;;  %v4258_v18 = vpop.f32.mrb[26].mxu1 }
 0x218   : > { %2908 = vst [vmem:[%s6231_s23 + $0xc0] sm:$0xff] %v6331_v55  ;;  %v4578_v14 = vpop.f32.mrb[26].mxu0  ;;  %v1598_v5 = vpop.f32.mrb[27].mxu1 }
 0x219   : > { %v6337_v20 = vadd.f32 %v4578_v14, %v4258_v18  ;;  %v2823_v45 = vpop.f32.mrb[27].mxu0 }
 0x21a   : > { %v6339_v28 = vadd.f32 %v2823_v45, %v1598_v5 }
 0x21b   : > { %2911 = vst [vmem:[%s6231_s23 + $0xd8] sm:$0xff] %v6337_v20  ;;  %v4261_v50 = vpop.f32.mrb[28].mxu1 }
 0x21c   : > { %2910 = vst [vmem:[%s6231_s23 + $0xd0] sm:$0xff] %v6339_v28  ;;  %v4581_v12 = vpop.f32.mrb[28].mxu0  ;;  %v1608_v36 = vpop.f32.mrb[29].mxu1 }
 0x21d   : > { %v6345_v21 = vadd.f32 %v4581_v12, %v4261_v50  ;;  %v2833_v51 = vpop.f32.mrb[29].mxu0 }
 0x21e   : > { %v6347_v56 = vadd.f32 %v2833_v51, %v1608_v36  ;;  %2919 = sbr.rel (%p3429_p4) target bundleno = 549 (0x225), region = 32 }
 0x21f   : > { %2913 = vst [vmem:[%s6231_s23 + $0xe8] sm:$0xff] %v6345_v21  ;;  %v4264_v1 = vpop.f32.mrb[30].mxu1 }
 0x220   : > { %2912 = vst [vmem:[%s6231_s23 + $0xe0] sm:$0xff] %v6347_v56  ;;  %v4584_v47 = vpop.f32.mrb[30].mxu0  ;;  %v1618_v63 = vpop.f32.mrb[31].mxu1 }
 0x221   : > { %v6353_v30 = vadd.f32 %v4584_v47, %v4264_v1  ;;  %v2843_v26 = vpop.f32.mrb[31].mxu0 }
 0x222   : > { %v6355_v33 = vadd.f32 %v2843_v26, %v1618_v63 }
 0x223   : > { %2915 = vst [vmem:[%s6231_s23 + $0xf8] sm:$0xff] %v6353_v30 }
 0x224   : > { %2914 = vst [vmem:[%s6231_s23 + $0xf0] sm:$0xff] %v6355_v33 }
 0x225 PF: > { %v2923_v61 = vadd.f32 %v6235_v41, %v6233_v25  ;;  %v2963_v24 = vmul.f32 %v6235_v41, %v6235_v41  ;;  %v2964_v19 = vmul.f32 %v6233_v25, %v6233_v25  ;;  %v2965_v9 = vmul.f32 %v6243_v17, %v6243_v17 }
 0x226   : > { %v2966_v38 = vmul.f32 %v6241_v44, %v6241_v44  ;;  %v2967_v48 = vmul.f32 %v6251_v8, %v6251_v8  ;;  %v2968_v25 = vmul.f32 %v6249_v39, %v6249_v39  ;;  %v2969_v57 = vmul.f32 %v6259_v15, %v6259_v15 }
 0x227   : > { %v2924_v4 = vadd.f32 %v6243_v17, %v2923_v61  ;;  %v2995_v23 = vadd.f32 %v2964_v19, %v2963_v24  ;;  %v2970_v11 = vmul.f32 %v6257_v31, %v6257_v31  ;;  %v2971_v2 = vmul.f32 %v6267_v32, %v6267_v32 }
 0x228   : > { %v2972_v14 = vmul.f32 %v6265_v59, %v6265_v59  ;;  %v2973_v45 = vmul.f32 %v6275_v22, %v6275_v22  ;;  %v2974_v12 = vmul.f32 %v6273_v58, %v6273_v58  ;;  %v2975_v51 = vmul.f32 %v6283_v60, %v6283_v60 }
 0x229   : > { %v2925_v53 = vadd.f32 %v6241_v44, %v2924_v4  ;;  %v2996_v41 = vadd.f32 %v2995_v23, %v2965_v9  ;;  %v2976_v47 = vmul.f32 %v6281_v35, %v6281_v35  ;;  %v2977_v26 = vmul.f32 %v6291_v43, %v6291_v43 }
 0x22a   : > { %v2978_v61 = vmul.f32 %v6289_v27, %v6289_v27  ;;  %v2980_v19 = vmul.f32 %v6297_v10, %v6297_v10  ;;  %v2981_v9 = vmul.f32 %v6307_v49, %v6307_v49 }
 0x22b   : > { %v2926_v7 = vadd.f32 %v6251_v8, %v2925_v53  ;;  %v2997_v62 = vadd.f32 %v2996_v41, %v2966_v38  ;;  %v2979_v53 = vmul.f32 %v6299_v13, %v6299_v13  ;;  %v2982_v38 = vmul.f32 %v6305_v34, %v6305_v34 }
 0x22c   : > { %v2984_v41 = vmul.f32 %v6313_v40, %v6313_v40 }
 0x22d   : > { %v2927_v37 = vadd.f32 %v6249_v39, %v2926_v7  ;;  %v2998_v0 = vadd.f32 %v2997_v62, %v2967_v48 }
 0x22f   : > { %v2928_v42 = vadd.f32 %v6259_v15, %v2927_v37  ;;  %v2999_v6 = vadd.f32 %v2998_v0, %v2968_v25  ;;  %v2985_v25 = vmul.f32 %v6323_v29, %v6323_v29  ;;  %v2987_v0 = vmul.f32 %v6331_v55, %v6331_v55 }
 0x231   : > { %v2929_v52 = vadd.f32 %v6257_v31, %v2928_v42  ;;  %v3000_v18 = vadd.f32 %v2999_v6, %v2969_v57  ;;  %v2983_v42 = vmul.f32 %v6315_v46, %v6315_v46 }
 0x233   : > { %v2930_v17 = vadd.f32 %v6267_v32, %v2929_v52  ;;  %v3001_v5 = vadd.f32 %v3000_v18, %v2970_v11  ;;  %v2988_v11 = vmul.f32 %v6329_v16, %v6329_v16  ;;  %v2990_v18 = vmul.f32 %v6337_v20, %v6337_v20 }
 0x235   : > { %v2931_v44 = vadd.f32 %v6265_v59, %v2930_v17  ;;  %v3002_v50 = vadd.f32 %v3001_v5, %v2971_v2  ;;  %v2986_v17 = vmul.f32 %v6321_v3, %v6321_v3 }
 0x237   : > { %v2932_v8 = vadd.f32 %v6275_v22, %v2931_v44  ;;  %v3003_v36 = vadd.f32 %v3002_v50, %v2972_v14  ;;  %v2991_v14 = vmul.f32 %v6347_v56, %v6347_v56  ;;  %v2993_v50 = vmul.f32 %v6355_v33, %v6355_v33 }
 0x239   : > { %v2933_v39 = vadd.f32 %v6273_v58, %v2932_v8  ;;  %v3004_v1 = vadd.f32 %v3003_v36, %v2973_v45  ;;  %v2989_v8 = vmul.f32 %v6339_v28, %v6339_v28 }
 0x23b   : > { %v2934_v15 = vadd.f32 %v6283_v60, %v2933_v39  ;;  %v3005_v63 = vadd.f32 %v3004_v1, %v2974_v12 }
 0x23d   : > { %v2935_v31 = vadd.f32 %v6281_v35, %v2934_v15  ;;  %v3006_v54 = vadd.f32 %v3005_v63, %v2975_v51  ;;  %v2992_v15 = vmul.f32 %v6345_v21, %v6345_v21 }
 0x23f   : > { %v2936_v32 = vadd.f32 %v6291_v43, %v2935_v31  ;;  %v3007_v4 = vadd.f32 %v3006_v54, %v2976_v47 }
 0x241   : > { %v2937_v59 = vadd.f32 %v6289_v27, %v2936_v32  ;;  %v3008_v24 = vadd.f32 %v3007_v4, %v2977_v26 }
 0x243   : > { %v2938_v22 = vadd.f32 %v6299_v13, %v2937_v59  ;;  %v3009_v7 = vadd.f32 %v3008_v24, %v2978_v61 }
 0x245   : > { %v2939_v58 = vadd.f32 %v6297_v10, %v2938_v22  ;;  %v3010_v37 = vadd.f32 %v3009_v7, %v2979_v53 }
 0x247   : > { %v2940_v60 = vadd.f32 %v6307_v49, %v2939_v58  ;;  %v3011_v23 = vadd.f32 %v3010_v37, %v2980_v19  ;;  %v2962_v58 = vld [vmem:[%s6483_s4] sm:$0x1] }
 0x249   : > { %v2941_v35 = vadd.f32 %v6305_v34, %v2940_v60  ;;  %v3012_v48 = vadd.f32 %v3011_v23, %v2981_v9 }
 0x24b   : > { %v2942_v43 = vadd.f32 %v6315_v46, %v2941_v35  ;;  %v3013_v52 = vadd.f32 %v3012_v48, %v2982_v38 }
 0x24d   : > { %v2943_v27 = vadd.f32 %v6313_v40, %v2942_v43  ;;  %v3014_v62 = vadd.f32 %v3013_v52, %v2983_v42 }
 0x24f   : > { %v2944_v13 = vadd.f32 %v6323_v29, %v2943_v27  ;;  %v3015_v57 = vadd.f32 %v3014_v62, %v2984_v41 }
 0x251   : > { %v2945_v10 = vadd.f32 %v6321_v3, %v2944_v13  ;;  %v3016_v44 = vadd.f32 %v3015_v57, %v2985_v25 }
 0x253   : > { %v2946_v49 = vadd.f32 %v6331_v55, %v2945_v10  ;;  %v3017_v6 = vadd.f32 %v3016_v44, %v2986_v17 }
 0x255   : > { %v2947_v34 = vadd.f32 %v6329_v16, %v2946_v49  ;;  %v3018_v2 = vadd.f32 %v3017_v6, %v2987_v0 }
 0x257   : > { %v2948_v46 = vadd.f32 %v6339_v28, %v2947_v34  ;;  %v3019_v39 = vadd.f32 %v3018_v2, %v2988_v11 }
 0x259   : > { %v2949_v40 = vadd.f32 %v6337_v20, %v2948_v46  ;;  %v3020_v5 = vadd.f32 %v3019_v39, %v2989_v8  ;;  %v2994_v20 = vmul.f32 %v6353_v30, %v6353_v30 }
 0x25b   : > { %v2950_v29 = vadd.f32 %v6347_v56, %v2949_v40  ;;  %v3021_v45 = vadd.f32 %v3020_v5, %v2990_v18 }
 0x25d   : > { %v2951_v3 = vadd.f32 %v6345_v21, %v2950_v29  ;;  %v3022_v31 = vadd.f32 %v3021_v45, %v2991_v14  ;;  %v2922_v21 = vld [vmem:[%s6482_s3] sm:$0x1] }
 0x25f   : > { %v2952_v55 = vadd.f32 %v6355_v33, %v2951_v3  ;;  %v3023_v36 = vadd.f32 %v3022_v31, %v2992_v15 }
 0x261   : > { %v2953_v16 = vadd.f32 %v6353_v30, %v2952_v55  ;;  %v3024_v51 = vadd.f32 %v3023_v36, %v2993_v50 }
 0x263   : > { %v2954_v28 = vrot.slane %v2953_v16, 4  ;;  %v3025_v1 = vadd.f32 %v3024_v51, %v2994_v20 }
 0x265   : > { %v2955_v12 = vadd.f32 %v2954_v28, %v2953_v16  ;;  %v3026_v47 = vrot.slane %v3025_v1, 4 }
 0x267   : > { %v2956_v32 = vrot.slane %v2955_v12, 2  ;;  %v3027_v22 = vadd.f32 %v3026_v47, %v3025_v1 }
 0x269   : > { %v2957_v56 = vadd.f32 %v2956_v32, %v2955_v12  ;;  %v3028_v33 = vrot.slane %v3027_v22, 2 }
 0x26b   : > { %v2958_v59 = vrot.slane %v2957_v56, 1  ;;  %v3029_v30 = vadd.f32 %v3028_v33, %v3027_v22 }
 0x26d   : > { %v2959_v63 = vadd.f32 %v2958_v59, %v2957_v56  ;;  %v3030_v54 = vrot.slane %v3029_v30, 1 }
 0x26f   : > { %v2960_v26 = vadd.f32 %v2959_v63, %v2922_v21  ;;  %v3031_v61 = vadd.f32 %v3030_v54, %v3029_v30 }
 0x271   : > { %2961 = vst [vmem:[%s6482_s3] sm:$0x1] %v2960_v26  ;;  %v3032_v4 = vadd.f32 %v3031_v61, %v2962_v58 }
 0x273   : > { %3033 = vst [vmem:[%s6483_s4] sm:$0x1] %v3032_v4 }
 0x274 PF: > { %s15_s15 = sadd.s32 1, %s5161_s15  }
 0x275   : > { %p12_p5 = scmp.ge.s32.totalorder %s15_s15, 4  }
 0x277   :  { %14 = sbr.rel (!%p12_p5) target bundleno = 1 (0x1), region = 88 }

</bundles_post_ra>
